<compile_context>
chip_gen: v7x
topology: tpu7x:2x2x1
jax: 0.10.0
libtpu: 0.0.40
codegen_flags: <defaults>
</compile_context>

<pallas_src>
import functools
import math

import jax
import jax.numpy as jnp
from jax.experimental import pallas as pl
from jax.experimental.pallas import tpu as pltpu


# ----------------------------- config ---------------------------------------
class GPTConfig:
    vocab_size = 128
    context_len = 16
    n_embed = 32
    n_head = 4
    n_layer = 2
    init_linear_std = 0.02


# ----------------------------- kernel ----------------------------------------
def _layernorm(x, w, b, eps=1e-5):
    # x: (N, C) f32, w/b: (1, C) f32
    mu = jnp.mean(x, axis=-1, keepdims=True)
    var = jnp.mean((x - mu) ** 2, axis=-1, keepdims=True)
    return (x - mu) * jax.lax.rsqrt(var + eps) * w + b


def gpt_fused_kernel(
    x_ref, mask_ref,
    ln1_w_ref, ln1_b_ref, wqkv_ref, bqkv_ref, wproj_ref, bproj_ref,
    ln2_w_ref, ln2_b_ref, wfc_ref, bfc_ref, wp2_ref, bp2_ref,
    lnf_w_ref, lnf_b_ref, wte_t_ref,
    out_ref,
    acc_ref,
    *, n_head, batch,
):
    layer = pl.program_id(1)
    n_layer = pl.num_programs(1)
    bf16 = jnp.bfloat16

    # Load the embedded tokens for this row-block into the VMEM-resident
    # residual stream once (start of this block's layer sweep).
    @pl.when(layer == 0)
    def _():
        acc_ref[...] = x_ref[...]

    x = acc_ref[...]                       # (rows, C) residual stream, f32
    rows, C = x.shape
    B = batch
    T = rows // B
    H = n_head
    hd = C // H
    scale = 1.0 / math.sqrt(hd)
    bias = mask_ref[...]                   # (1, T, T) additive causal mask, f32

    # ---- attention branch ----------------------------------------------------
    h = _layernorm(x, ln1_w_ref[...], ln1_b_ref[...])
    qkv = jnp.dot(h.astype(bf16), wqkv_ref[...],
                  preferred_element_type=jnp.float32) + bqkv_ref[...]
    # NOTE: q/k/v boundaries at 32-lane offsets are in-lane selects (3C=96<128);
    # acceptable at toy scale, disappears once C % 128 == 0.
    q = qkv[:, 0:C].reshape(B, T, C).astype(bf16)
    k = qkv[:, C:2 * C].reshape(B, T, C).astype(bf16)
    v = qkv[:, 2 * C:3 * C].reshape(B, T, C).astype(bf16)

    y_proj = None
    for hh in range(H):                    # static unroll over heads (H small)
        sl = slice(hh * hd, (hh + 1) * hd)
        s = jnp.einsum("btd,bsd->bts", q[:, :, sl], k[:, :, sl],
                       preferred_element_type=jnp.float32)
        s = s * scale + bias               # f32 scores + f32 mask
        s = s - jnp.max(s, axis=-1, keepdims=True)
        p = jnp.exp(s)
        # approx reciprocal on the EUP; ~1e-3 relative deviation from exact.
        p = p * pl.reciprocal(jnp.sum(p, axis=-1, keepdims=True), approx=True)
        yh = jnp.einsum("bts,bsd->btd", p.astype(bf16), v[:, :, sl],
                        preferred_element_type=jnp.float32)
        # Project this head directly through its (sublane-aligned) wproj slice
        # and accumulate -- mathematically identical to concat-then-project,
        # but removes the lane-dim concatenate entirely.
        contrib = jnp.dot(yh.reshape(rows, hd).astype(bf16), wproj_ref[sl, :],
                          preferred_element_type=jnp.float32)
        y_proj = contrib if y_proj is None else y_proj + contrib
    x = x + y_proj + bproj_ref[...]

    # ---- MLP branch ------------------------------------------------------------
    h2 = _layernorm(x, ln2_w_ref[...], ln2_b_ref[...])
    hfc = jnp.dot(h2.astype(bf16), wfc_ref[...],
                  preferred_element_type=jnp.float32) + bfc_ref[...]
    # exact (erf-based) GELU in f32, matching nn.GELU() default
    hfc = 0.5 * hfc * (1.0 + jax.lax.erf(hfc * (1.0 / math.sqrt(2.0))))
    x = x + jnp.dot(hfc.astype(bf16), wp2_ref[...],
                    preferred_element_type=jnp.float32) + bp2_ref[...]

    acc_ref[...] = x

    # ---- final LayerNorm + tied lm_head, only on the last layer ----------------
    @pl.when(layer == n_layer - 1)
    def _():
        hf = _layernorm(x, lnf_w_ref[...], lnf_b_ref[...])
        logits = jnp.dot(hf.astype(bf16), wte_t_ref[...],
                         preferred_element_type=jnp.float32)
        out_ref[...] = logits.astype(out_ref.dtype)   # lane-dense (rows, V=128)


# ----------------------------- wrapper ----------------------------------------
def gpt_forward(idx, params, cfg, n_split=2):
    B, T = idx.shape
    assert T <= cfg.context_len
    C, V, L, H = cfg.n_embed, cfg.vocab_size, cfg.n_layer, cfg.n_head
    BT = B * T
    if B % n_split != 0 or (BT // n_split) % 8 != 0:
        n_split = 1
    rows = BT // n_split                     # rows per grid row-block
    B_blk = B // n_split

    # Embedding lookups (gather) stay in plain JAX glue.
    x = (params["wte"][idx] + params["wpe"][:T][None]).astype(jnp.float32)
    x2d = x.reshape(BT, C)

    # Precomputed additive causal bias (hoisted out of the kernel's layer loop).
    causal = jnp.tril(jnp.ones((T, T), jnp.bool_))
    mask = jnp.where(causal, 0.0, -1e30).astype(jnp.float32)[None]   # (1, T, T)

    # bf16 weight streaming (halves per-layer weight DMA, native MXU rate);
    # LN params / biases stay f32.
    bf16 = jnp.bfloat16
    wqkv = params["wqkv"].astype(bf16)
    wproj = params["wproj"].astype(bf16)
    wfc = params["wfc"].astype(bf16)
    wp2 = params["wp2"].astype(bf16)
    wte_t = params["wte"].T.astype(bf16)     # pre-transposed tied lm_head (C, V)

    weight_args = (
        params["ln1_w"], params["ln1_b"], wqkv, params["bqkv"], wproj, params["bproj"],
        params["ln2_w"], params["ln2_b"], wfc, params["bfc"], wp2, params["bp2"],
    )

    def layer_spec(a):
        trailing = tuple(a.shape[1:])
        return pl.BlockSpec((pl.Squeezed(),) + trailing,
                            lambda r, l: (l,) + (0,) * len(trailing))

    def const_spec(a):
        shape = tuple(a.shape)
        return pl.BlockSpec(shape, lambda r, l: (0,) * len(shape))

    in_specs = [pl.BlockSpec((rows, C), lambda r, l: (r, 0)), const_spec(mask)]
    in_specs += [layer_spec(w) for w in weight_args]
    in_specs += [const_spec(params["lnf_w"]), const_spec(params["lnf_b"]),
                 const_spec(wte_t)]

    kernel = functools.partial(gpt_fused_kernel, n_head=H, batch=B_blk)

    # Advisory cost estimate for XLA's scheduler.
    flops_layer = (2 * BT * C * 3 * C      # qkv projection
                   + 4 * B * T * T * C     # attention scores + p@v (all heads)
                   + 2 * BT * C * C        # attention output projection
                   + 2 * BT * C * 4 * C    # mlp c_fc
                   + 2 * BT * 4 * C * C)   # mlp c_proj
    flops = int(L * flops_layer + 2 * BT * C * V)
    transcendentals = int(L * (B * H * T * T + BT * 4 * C) + 3 * L * BT + BT)
    all_inputs = (x2d, mask) + weight_args + (params["lnf_w"], params["lnf_b"], wte_t)
    bytes_accessed = int(sum(int(a.size) * a.dtype.itemsize for a in all_inputs)
                         + BT * V * 4)

    # TODO(synk): at real GPT-2 scale, tile the lm_head over a vocab grid axis
    # and re-audit VMEM (double-buffered layer weights + resident wte would
    # exceed v7x's 64 MiB even in bf16).
    logits2d = pl.pallas_call(
        kernel,
        out_shape=jax.ShapeDtypeStruct((BT, V), jnp.float32),
        grid=(n_split, L),
        in_specs=in_specs,
        out_specs=pl.BlockSpec((rows, V), lambda r, l: (r, 0)),
        scratch_shapes=[pltpu.VMEM((rows, C), jnp.float32)],
        compiler_params=pltpu.CompilerParams(
            dimension_semantics=("parallel", "arbitrary"),
            vmem_limit_bytes=32 * 1024 * 1024),
        cost_estimate=pl.CostEstimate(
            flops=flops, transcendentals=transcendentals,
            bytes_accessed=bytes_accessed),
    )(x2d, mask, *weight_args, params["lnf_w"], params["lnf_b"], wte_t)

    # TODO(synk): targets / cross-entropy loss path not implemented (targets=None only)
    return logits2d.reshape(B, T, V)


# ----------------------------- reference (pure JAX) --------------------------
def gpt_forward_ref(idx, params, cfg):
    def ln(x, w, b):
        mu = x.mean(-1, keepdims=True)
        var = ((x - mu) ** 2).mean(-1, keepdims=True)
        return (x - mu) / jnp.sqrt(var + 1e-5) * w + b

    B, T = idx.shape
    C, H = cfg.n_embed, cfg.n_head
    hd = C // H
    x = params["wpe"][:T][None] + params["wte"][idx]
    for l in range(cfg.n_layer):
        h = ln(x, params["ln1_w"][l], params["ln1_b"][l])
        qkv = h @ params["wqkv"][l] + params["bqkv"][l]
        q, k, v = jnp.split(qkv, 3, axis=-1)
        q = q.reshape(B, T, H, hd).transpose(0, 2, 1, 3)
        k = k.reshape(B, T, H, hd).transpose(0, 2, 1, 3)
        v = v.reshape(B, T, H, hd).transpose(0, 2, 1, 3)
        s = jnp.einsum("bhtd,bhsd->bhts", q, k) / math.sqrt(hd)
        mask = jnp.tril(jnp.ones((T, T), bool))
        s = jnp.where(mask, s, -jnp.inf)
        a = jax.nn.softmax(s, axis=-1)
        y = jnp.einsum("bhts,bhsd->bhtd", a, v)
        y = y.transpose(0, 2, 1, 3).reshape(B, T, C)
        x = x + y @ params["wproj"][l] + params["bproj"][l]
        h2 = ln(x, params["ln2_w"][l], params["ln2_b"][l])
        hf = h2 @ params["wfc"][l] + params["bfc"][l]
        hf = 0.5 * hf * (1.0 + jax.lax.erf(hf / math.sqrt(2.0)))
        x = x + hf @ params["wp2"][l] + params["bp2"][l]
    x = ln(x, params["lnf_w"], params["lnf_b"])
    return x @ params["wte"].T


# ----------------------------- param init ------------------------------------
def init_params(key, cfg):
    C, L, V = cfg.n_embed, cfg.n_layer, cfg.vocab_size
    std = cfg.init_linear_std
    resid_std = (2 * L) ** (-0.5)

    def nrm(k, shape, s):
        return s * jax.random.normal(k, shape, jnp.float32)

    k = jax.random.split(key, 6)
    # Per-layer weights are stacked with a leading layer axis so the fused
    # kernel can stream them with a "layers" grid axis.
    return {
        "wte": nrm(k[0], (V, C), std),                  # tied with lm_head
        "wpe": nrm(k[1], (cfg.context_len, C), std),
        "lnf_w": jnp.ones((1, C), jnp.float32),
        "lnf_b": jnp.zeros((1, C), jnp.float32),
        "ln1_w": jnp.ones((L, 1, C), jnp.float32),
        "ln1_b": jnp.zeros((L, 1, C), jnp.float32),
        "wqkv": nrm(k[2], (L, C, 3 * C), std),
        "bqkv": jnp.zeros((L, 1, 3 * C), jnp.float32),
        "wproj": nrm(k[3], (L, C, C), resid_std),       # NORMALIZE_RESIDUAL_GRADIENT_HACK
        "bproj": jnp.zeros((L, 1, C), jnp.float32),
        "ln2_w": jnp.ones((L, 1, C), jnp.float32),
        "ln2_b": jnp.zeros((L, 1, C), jnp.float32),
        "wfc": nrm(k[4], (L, C, 4 * C), std),
        "bfc": jnp.zeros((L, 1, 4 * C), jnp.float32),
        "wp2": nrm(k[5], (L, 4 * C, C), resid_std),     # NORMALIZE_RESIDUAL_GRADIENT_HACK
        "bp2": jnp.zeros((L, 1, C), jnp.float32),
    }


# ----------------------------- main ------------------------------------------
if __name__ == "__main__":
    cfg = GPTConfig()
    key = jax.random.PRNGKey(0)
    pkey, ikey = jax.random.split(key)

    params = init_params(pkey, cfg)

    # B*T = 128 fills the MXU sublane dimension (perf review item); still small.
    B, T = 16, 8
    idx = jax.random.randint(ikey, (B, T), 0, cfg.vocab_size, dtype=jnp.int32)

    logits = gpt_forward(idx, params, cfg)
    logits = jax.block_until_ready(logits)

    # Sanity check against a pure-JAX f32 reference of the same math.
    # Tolerance is loose on purpose: weights are streamed in bf16 and the
    # softmax denominator uses an approximate EUP reciprocal.
    ref = gpt_forward_ref(idx, params, cfg)
    assert logits.shape == (B, T, cfg.vocab_size)
    assert jnp.allclose(logits, ref, atol=2e-2, rtol=2e-2), (
        float(jnp.max(jnp.abs(logits - ref))))

    print("KERNEL_OK")
</pallas_src>

<mosaic_0001>
module attributes {stable_mosaic.version = 11 : i64} {
  func.func @gpt_fused_kernel(%arg0: i32, %arg1: i32, %arg2: memref<64x32xf32, #tpu.memory_space<vmem>>, %arg3: memref<1x8x8xf32, #tpu.memory_space<vmem>>, %arg4: memref<1x1x32xf32, #tpu.memory_space<vmem>>, %arg5: memref<1x1x32xf32, #tpu.memory_space<vmem>>, %arg6: memref<1x32x96xbf16, #tpu.memory_space<vmem>>, %arg7: memref<1x1x96xf32, #tpu.memory_space<vmem>>, %arg8: memref<1x32x32xbf16, #tpu.memory_space<vmem>>, %arg9: memref<1x1x32xf32, #tpu.memory_space<vmem>>, %arg10: memref<1x1x32xf32, #tpu.memory_space<vmem>>, %arg11: memref<1x1x32xf32, #tpu.memory_space<vmem>>, %arg12: memref<1x32x128xbf16, #tpu.memory_space<vmem>>, %arg13: memref<1x1x128xf32, #tpu.memory_space<vmem>>, %arg14: memref<1x128x32xbf16, #tpu.memory_space<vmem>>, %arg15: memref<1x1x32xf32, #tpu.memory_space<vmem>>, %arg16: memref<1x32xf32, #tpu.memory_space<vmem>>, %arg17: memref<1x32xf32, #tpu.memory_space<vmem>>, %arg18: memref<32x128xbf16, #tpu.memory_space<vmem>>, %arg19: memref<64x128xf32, #tpu.memory_space<vmem>>, %arg20: memref<64x32xf32, #tpu.memory_space<vmem>>) attributes {dimension_semantics = [#tpu.dimension_semantics<parallel>, #tpu.dimension_semantics<arbitrary>], iteration_bounds = array<i64: 2, 2>, scalar_prefetch = 0 : i64, scratch_operands = 1 : i64, tpu.core_type = #tpu.core_type<tc>, window_params = [{transform_indices = @transform_0, window_bounds = array<i64: 64, 32>}, {pipeline_mode = #tpu.pipeline_mode<synchronous>, transform_indices = @transform_1, window_bounds = array<i64: 1, 8, 8>}, {transform_indices = @transform_2, window_bounds = array<i64: 1, 1, 32>}, {transform_indices = @transform_3, window_bounds = array<i64: 1, 1, 32>}, {transform_indices = @transform_4, window_bounds = array<i64: 1, 32, 96>}, {transform_indices = @transform_5, window_bounds = array<i64: 1, 1, 96>}, {transform_indices = @transform_6, window_bounds = array<i64: 1, 32, 32>}, {transform_indices = @transform_7, window_bounds = array<i64: 1, 1, 32>}, {transform_indices = @transform_8, window_bounds = array<i64: 1, 1, 32>}, {transform_indices = @transform_9, window_bounds = array<i64: 1, 1, 32>}, {transform_indices = @transform_10, window_bounds = array<i64: 1, 32, 128>}, {transform_indices = @transform_11, window_bounds = array<i64: 1, 1, 128>}, {transform_indices = @transform_12, window_bounds = array<i64: 1, 128, 32>}, {transform_indices = @transform_13, window_bounds = array<i64: 1, 1, 32>}, {pipeline_mode = #tpu.pipeline_mode<synchronous>, transform_indices = @transform_14, window_bounds = array<i64: 1, 32>}, {pipeline_mode = #tpu.pipeline_mode<synchronous>, transform_indices = @transform_15, window_bounds = array<i64: 1, 32>}, {pipeline_mode = #tpu.pipeline_mode<synchronous>, transform_indices = @transform_16, window_bounds = array<i64: 32, 128>}, {transform_indices = @transform_17, window_bounds = array<i64: 64, 128>}]} {
    %c0_i32 = arith.constant 0 : i32
    %0 = arith.cmpi eq, %arg1, %c0_i32 : i32
    %1 = arith.extui %0 : i1 to i32
    %c0_i32_0 = arith.constant 0 : i32
    %2 = arith.cmpi ne, %1, %c0_i32_0 : i32
    scf.if %2 {
      %c0_89 = arith.constant 0 : index
      %c0_90 = arith.constant 0 : index
      %211 = vector.load %arg2[%c0_89, %c0_90] : memref<64x32xf32, #tpu.memory_space<vmem>>, vector<64x32xf32>
      %c0_91 = arith.constant 0 : index
      %c0_92 = arith.constant 0 : index
      %212 = vector.load %arg20[%c0_91, %c0_92] : memref<64x32xf32, #tpu.memory_space<vmem>>, vector<64x32xf32>
      tpu.vector_store %arg20[%c0_91, %c0_92], %211 {strides = array<i32>} : memref<64x32xf32, #tpu.memory_space<vmem>>, vector<64x32xf32>,
    } else {
    }
    %c0 = arith.constant 0 : index
    %c0_1 = arith.constant 0 : index
    %3 = vector.load %arg20[%c0, %c0_1] : memref<64x32xf32, #tpu.memory_space<vmem>>, vector<64x32xf32>
    %c0_2 = arith.constant 0 : index
    %c0_3 = arith.constant 0 : index
    %c0_4 = arith.constant 0 : index
    %4 = vector.load %arg3[%c0_2, %c0_3, %c0_4] : memref<1x8x8xf32, #tpu.memory_space<vmem>>, vector<1x8x8xf32>
    %c0_5 = arith.constant 0 : index
    %c0_6 = arith.constant 0 : index
    %c0_7 = arith.constant 0 : index
    %5 = vector.load %arg4[%c0_5, %c0_6, %c0_7] : memref<1x1x32xf32, #tpu.memory_space<vmem>>, vector<1x1x32xf32>
    %6 = vector.shape_cast %5 : vector<1x1x32xf32> to vector<1x32xf32>
    %c0_8 = arith.constant 0 : index
    %c0_9 = arith.constant 0 : index
    %c0_10 = arith.constant 0 : index
    %7 = vector.load %arg5[%c0_8, %c0_9, %c0_10] : memref<1x1x32xf32, #tpu.memory_space<vmem>>, vector<1x1x32xf32>
    %8 = vector.shape_cast %7 : vector<1x1x32xf32> to vector<1x32xf32>
    %cst = arith.constant dense<0.000000e+00> : vector<64xf32>
    %9 = vector.multi_reduction <add>, %3, %cst [1] : vector<64x32xf32> to vector<64xf32>
    %10 = vector.shape_cast %9 : vector<64xf32> to vector<64x1xf32>
    %cst_11 = arith.constant 3.200000e+01 : f32
    %11 = vector.broadcast %cst_11 : f32 to vector<64x1xf32>
    %12 = arith.divf %10, %11 : vector<64x1xf32>
    %13 = vector.broadcast %12 : vector<64x1xf32> to vector<64x32xf32>
    %14 = arith.subf %3, %13 : vector<64x32xf32>
    %15 = arith.mulf %14, %14 : vector<64x32xf32>
    %cst_12 = arith.constant dense<0.000000e+00> : vector<64xf32>
    %16 = vector.multi_reduction <add>, %15, %cst_12 [1] : vector<64x32xf32> to vector<64xf32>
    %17 = vector.shape_cast %16 : vector<64xf32> to vector<64x1xf32>
    %cst_13 = arith.constant 3.200000e+01 : f32
    %18 = vector.broadcast %cst_13 : f32 to vector<64x1xf32>
    %19 = arith.divf %17, %18 : vector<64x1xf32>
    %20 = vector.broadcast %12 : vector<64x1xf32> to vector<64x32xf32>
    %21 = arith.subf %3, %20 : vector<64x32xf32>
    %cst_14 = arith.constant 9.99999974E-6 : f32
    %22 = vector.broadcast %cst_14 : f32 to vector<64x1xf32>
    %23 = arith.addf %19, %22 : vector<64x1xf32>
    %24 = math.rsqrt %23 : vector<64x1xf32>
    %25 = vector.broadcast %24 : vector<64x1xf32> to vector<64x32xf32>
    %26 = arith.mulf %21, %25 : vector<64x32xf32>
    %27 = vector.broadcast %6 : vector<1x32xf32> to vector<64x32xf32>
    %28 = arith.mulf %26, %27 : vector<64x32xf32>
    %29 = vector.broadcast %8 : vector<1x32xf32> to vector<64x32xf32>
    %30 = arith.addf %28, %29 : vector<64x32xf32>
    %31 = arith.truncf %30 : vector<64x32xf32> to vector<64x32xbf16>
    %c0_15 = arith.constant 0 : index
    %c0_16 = arith.constant 0 : index
    %c0_17 = arith.constant 0 : index
    %32 = vector.load %arg6[%c0_15, %c0_16, %c0_17] : memref<1x32x96xbf16, #tpu.memory_space<vmem>>, vector<1x32x96xbf16>
    %33 = vector.shape_cast %32 : vector<1x32x96xbf16> to vector<32x96xbf16>
    %cst_18 = arith.constant dense<0.000000e+00> : vector<64x96xf32>
    %34 = tpu.matmul %31, %33, %cst_18 {dimension_numbers = #tpu.dot_dimension_numbers<[1], [0], [0], [1], [0, 0, 1, 1], [], []>} : vector<64x32xbf16>, vector<32x96xbf16>, vector<64x96xf32> -> vector<64x96xf32>
    %c0_19 = arith.constant 0 : index
    %c0_20 = arith.constant 0 : index
    %c0_21 = arith.constant 0 : index
    %35 = vector.load %arg7[%c0_19, %c0_20, %c0_21] : memref<1x1x96xf32, #tpu.memory_space<vmem>>, vector<1x1x96xf32>
    %36 = vector.shape_cast %35 : vector<1x1x96xf32> to vector<1x96xf32>
    %37 = vector.broadcast %36 : vector<1x96xf32> to vector<64x96xf32>
    %38 = arith.addf %34, %37 : vector<64x96xf32>
    %39 = vector.extract_strided_slice %38 {offsets = [0, 0], sizes = [64, 32], strides = [1, 1]} : vector<64x96xf32> to vector<64x32xf32>
    %40 = vector.shape_cast %39 : vector<64x32xf32> to vector<8x8x32xf32>
    %41 = arith.truncf %40 : vector<8x8x32xf32> to vector<8x8x32xbf16>
    %42 = vector.extract_strided_slice %38 {offsets = [0, 32], sizes = [64, 32], strides = [1, 1]} : vector<64x96xf32> to vector<64x32xf32>
    %43 = vector.shape_cast %42 : vector<64x32xf32> to vector<8x8x32xf32>
    %44 = arith.truncf %43 : vector<8x8x32xf32> to vector<8x8x32xbf16>
    %45 = vector.extract_strided_slice %38 {offsets = [0, 64], sizes = [64, 32], strides = [1, 1]} : vector<64x96xf32> to vector<64x32xf32>
    %46 = vector.shape_cast %45 : vector<64x32xf32> to vector<8x8x32xf32>
    %47 = arith.truncf %46 : vector<8x8x32xf32> to vector<8x8x32xbf16>
    %48 = vector.extract_strided_slice %41 {offsets = [0, 0, 0], sizes = [8, 8, 8], strides = [1, 1, 1]} : vector<8x8x32xbf16> to vector<8x8x8xbf16>
    %49 = vector.extract_strided_slice %44 {offsets = [0, 0, 0], sizes = [8, 8, 8], strides = [1, 1, 1]} : vector<8x8x32xbf16> to vector<8x8x8xbf16>
    "tpu.trace_start"() <{level = 10 : i32, message = "btd,bsd->bts"}> : () -> ()
    %cst_22 = arith.constant dense<0.000000e+00> : vector<8x8x8xf32>
    %50 = tpu.matmul %48, %49, %cst_22 {dimension_numbers = #tpu.dot_dimension_numbers<[2], [2], [1], [1], [0, 0, 0, 1, 1, 1], [0], [0]>} : vector<8x8x8xbf16>, vector<8x8x8xbf16>, vector<8x8x8xf32> -> vector<8x8x8xf32>
    "tpu.trace_stop"() : () -> ()
    %cst_23 = arith.constant 0.353553385 : f32
    %51 = vector.broadcast %cst_23 : f32 to vector<8x8x8xf32>
    %52 = arith.mulf %50, %51 : vector<8x8x8xf32>
    %53 = vector.broadcast %4 : vector<1x8x8xf32> to vector<8x8x8xf32>
    %54 = arith.addf %52, %53 : vector<8x8x8xf32>
    %cst_24 = arith.constant dense<0xFF800000> : vector<8x8xf32>
    %55 = vector.multi_reduction <maximumf>, %54, %cst_24 [2] : vector<8x8x8xf32> to vector<8x8xf32>
    %56 = vector.shape_cast %55 : vector<8x8xf32> to vector<8x8x1xf32>
    %57 = vector.broadcast %56 : vector<8x8x1xf32> to vector<8x8x8xf32>
    %58 = arith.subf %54, %57 : vector<8x8x8xf32>
    %59 = math.exp %58 : vector<8x8x8xf32>
    %cst_25 = arith.constant dense<0.000000e+00> : vector<8x8xf32>
    %60 = vector.multi_reduction <add>, %59, %cst_25 [2] : vector<8x8x8xf32> to vector<8x8xf32>
    %61 = vector.shape_cast %60 : vector<8x8xf32> to vector<8x8x1xf32>
    %62 = tpu.reciprocal %61 {approx = true} : vector<8x8x1xf32> -> vector<8x8x1xf32>
    %63 = vector.broadcast %62 : vector<8x8x1xf32> to vector<8x8x8xf32>
    %64 = arith.mulf %59, %63 : vector<8x8x8xf32>
    %65 = arith.truncf %64 : vector<8x8x8xf32> to vector<8x8x8xbf16>
    %66 = vector.extract_strided_slice %47 {offsets = [0, 0, 0], sizes = [8, 8, 8], strides = [1, 1, 1]} : vector<8x8x32xbf16> to vector<8x8x8xbf16>
    "tpu.trace_start"() <{level = 10 : i32, message = "bts,bsd->btd"}> : () -> ()
    %cst_26 = arith.constant dense<0.000000e+00> : vector<8x8x8xf32>
    %67 = tpu.matmul %65, %66, %cst_26 {dimension_numbers = #tpu.dot_dimension_numbers<[2], [1], [1], [2], [0, 0, 0, 1, 1, 2], [0], [0]>} : vector<8x8x8xbf16>, vector<8x8x8xbf16>, vector<8x8x8xf32> -> vector<8x8x8xf32>
    "tpu.trace_stop"() : () -> ()
    %68 = vector.shape_cast %67 : vector<8x8x8xf32> to vector<64x8xf32>
    %69 = arith.truncf %68 : vector<64x8xf32> to vector<64x8xbf16>
    %c0_27 = arith.constant 0 : index
    %c0_28 = arith.constant 0 : index
    %c0_29 = arith.constant 0 : index
    %70 = vector.load %arg8[%c0_27, %c0_28, %c0_29] : memref<1x32x32xbf16, #tpu.memory_space<vmem>>, vector<1x8x32xbf16>
    %71 = vector.shape_cast %70 : vector<1x8x32xbf16> to vector<8x32xbf16>
    %cst_30 = arith.constant dense<0.000000e+00> : vector<64x32xf32>
    %72 = tpu.matmul %69, %71, %cst_30 {dimension_numbers = #tpu.dot_dimension_numbers<[1], [0], [0], [1], [0, 0, 1, 1], [], []>} : vector<64x8xbf16>, vector<8x32xbf16>, vector<64x32xf32> -> vector<64x32xf32>
    %73 = vector.extract_strided_slice %41 {offsets = [0, 0, 8], sizes = [8, 8, 8], strides = [1, 1, 1]} : vector<8x8x32xbf16> to vector<8x8x8xbf16>
    %74 = vector.extract_strided_slice %44 {offsets = [0, 0, 8], sizes = [8, 8, 8], strides = [1, 1, 1]} : vector<8x8x32xbf16> to vector<8x8x8xbf16>
    "tpu.trace_start"() <{level = 10 : i32, message = "btd,bsd->bts"}> : () -> ()
    %cst_31 = arith.constant dense<0.000000e+00> : vector<8x8x8xf32>
    %75 = tpu.matmul %73, %74, %cst_31 {dimension_numbers = #tpu.dot_dimension_numbers<[2], [2], [1], [1], [0, 0, 0, 1, 1, 1], [0], [0]>} : vector<8x8x8xbf16>, vector<8x8x8xbf16>, vector<8x8x8xf32> -> vector<8x8x8xf32>
    "tpu.trace_stop"() : () -> ()
    %cst_32 = arith.constant 0.353553385 : f32
    %76 = vector.broadcast %cst_32 : f32 to vector<8x8x8xf32>
    %77 = arith.mulf %75, %76 : vector<8x8x8xf32>
    %78 = vector.broadcast %4 : vector<1x8x8xf32> to vector<8x8x8xf32>
    %79 = arith.addf %77, %78 : vector<8x8x8xf32>
    %cst_33 = arith.constant dense<0xFF800000> : vector<8x8xf32>
    %80 = vector.multi_reduction <maximumf>, %79, %cst_33 [2] : vector<8x8x8xf32> to vector<8x8xf32>
    %81 = vector.shape_cast %80 : vector<8x8xf32> to vector<8x8x1xf32>
    %82 = vector.broadcast %81 : vector<8x8x1xf32> to vector<8x8x8xf32>
    %83 = arith.subf %79, %82 : vector<8x8x8xf32>
    %84 = math.exp %83 : vector<8x8x8xf32>
    %cst_34 = arith.constant dense<0.000000e+00> : vector<8x8xf32>
    %85 = vector.multi_reduction <add>, %84, %cst_34 [2] : vector<8x8x8xf32> to vector<8x8xf32>
    %86 = vector.shape_cast %85 : vector<8x8xf32> to vector<8x8x1xf32>
    %87 = tpu.reciprocal %86 {approx = true} : vector<8x8x1xf32> -> vector<8x8x1xf32>
    %88 = vector.broadcast %87 : vector<8x8x1xf32> to vector<8x8x8xf32>
    %89 = arith.mulf %84, %88 : vector<8x8x8xf32>
    %90 = arith.truncf %89 : vector<8x8x8xf32> to vector<8x8x8xbf16>
    %91 = vector.extract_strided_slice %47 {offsets = [0, 0, 8], sizes = [8, 8, 8], strides = [1, 1, 1]} : vector<8x8x32xbf16> to vector<8x8x8xbf16>
    "tpu.trace_start"() <{level = 10 : i32, message = "bts,bsd->btd"}> : () -> ()
    %cst_35 = arith.constant dense<0.000000e+00> : vector<8x8x8xf32>
    %92 = tpu.matmul %90, %91, %cst_35 {dimension_numbers = #tpu.dot_dimension_numbers<[2], [1], [1], [2], [0, 0, 0, 1, 1, 2], [0], [0]>} : vector<8x8x8xbf16>, vector<8x8x8xbf16>, vector<8x8x8xf32> -> vector<8x8x8xf32>
    "tpu.trace_stop"() : () -> ()
    %93 = vector.shape_cast %92 : vector<8x8x8xf32> to vector<64x8xf32>
    %94 = arith.truncf %93 : vector<64x8xf32> to vector<64x8xbf16>
    %c0_36 = arith.constant 0 : index
    %c8 = arith.constant 8 : index
    %c0_37 = arith.constant 0 : index
    %95 = vector.load %arg8[%c0_36, %c8, %c0_37] : memref<1x32x32xbf16, #tpu.memory_space<vmem>>, vector<1x8x32xbf16>
    %96 = vector.shape_cast %95 : vector<1x8x32xbf16> to vector<8x32xbf16>
    %cst_38 = arith.constant dense<0.000000e+00> : vector<64x32xf32>
    %97 = tpu.matmul %94, %96, %cst_38 {dimension_numbers = #tpu.dot_dimension_numbers<[1], [0], [0], [1], [0, 0, 1, 1], [], []>} : vector<64x8xbf16>, vector<8x32xbf16>, vector<64x32xf32> -> vector<64x32xf32>
    %98 = arith.addf %72, %97 : vector<64x32xf32>
    %99 = vector.extract_strided_slice %41 {offsets = [0, 0, 16], sizes = [8, 8, 8], strides = [1, 1, 1]} : vector<8x8x32xbf16> to vector<8x8x8xbf16>
    %100 = vector.extract_strided_slice %44 {offsets = [0, 0, 16], sizes = [8, 8, 8], strides = [1, 1, 1]} : vector<8x8x32xbf16> to vector<8x8x8xbf16>
    "tpu.trace_start"() <{level = 10 : i32, message = "btd,bsd->bts"}> : () -> ()
    %cst_39 = arith.constant dense<0.000000e+00> : vector<8x8x8xf32>
    %101 = tpu.matmul %99, %100, %cst_39 {dimension_numbers = #tpu.dot_dimension_numbers<[2], [2], [1], [1], [0, 0, 0, 1, 1, 1], [0], [0]>} : vector<8x8x8xbf16>, vector<8x8x8xbf16>, vector<8x8x8xf32> -> vector<8x8x8xf32>
    "tpu.trace_stop"() : () -> ()
    %cst_40 = arith.constant 0.353553385 : f32
    %102 = vector.broadcast %cst_40 : f32 to vector<8x8x8xf32>
    %103 = arith.mulf %101, %102 : vector<8x8x8xf32>
    %104 = vector.broadcast %4 : vector<1x8x8xf32> to vector<8x8x8xf32>
    %105 = arith.addf %103, %104 : vector<8x8x8xf32>
    %cst_41 = arith.constant dense<0xFF800000> : vector<8x8xf32>
    %106 = vector.multi_reduction <maximumf>, %105, %cst_41 [2] : vector<8x8x8xf32> to vector<8x8xf32>
    %107 = vector.shape_cast %106 : vector<8x8xf32> to vector<8x8x1xf32>
    %108 = vector.broadcast %107 : vector<8x8x1xf32> to vector<8x8x8xf32>
    %109 = arith.subf %105, %108 : vector<8x8x8xf32>
    %110 = math.exp %109 : vector<8x8x8xf32>
    %cst_42 = arith.constant dense<0.000000e+00> : vector<8x8xf32>
    %111 = vector.multi_reduction <add>, %110, %cst_42 [2] : vector<8x8x8xf32> to vector<8x8xf32>
    %112 = vector.shape_cast %111 : vector<8x8xf32> to vector<8x8x1xf32>
    %113 = tpu.reciprocal %112 {approx = true} : vector<8x8x1xf32> -> vector<8x8x1xf32>
    %114 = vector.broadcast %113 : vector<8x8x1xf32> to vector<8x8x8xf32>
    %115 = arith.mulf %110, %114 : vector<8x8x8xf32>
    %116 = arith.truncf %115 : vector<8x8x8xf32> to vector<8x8x8xbf16>
    %117 = vector.extract_strided_slice %47 {offsets = [0, 0, 16], sizes = [8, 8, 8], strides = [1, 1, 1]} : vector<8x8x32xbf16> to vector<8x8x8xbf16>
    "tpu.trace_start"() <{level = 10 : i32, message = "bts,bsd->btd"}> : () -> ()
    %cst_43 = arith.constant dense<0.000000e+00> : vector<8x8x8xf32>
    %118 = tpu.matmul %116, %117, %cst_43 {dimension_numbers = #tpu.dot_dimension_numbers<[2], [1], [1], [2], [0, 0, 0, 1, 1, 2], [0], [0]>} : vector<8x8x8xbf16>, vector<8x8x8xbf16>, vector<8x8x8xf32> -> vector<8x8x8xf32>
    "tpu.trace_stop"() : () -> ()
    %119 = vector.shape_cast %118 : vector<8x8x8xf32> to vector<64x8xf32>
    %120 = arith.truncf %119 : vector<64x8xf32> to vector<64x8xbf16>
    %c0_44 = arith.constant 0 : index
    %c16 = arith.constant 16 : index
    %c0_45 = arith.constant 0 : index
    %121 = vector.load %arg8[%c0_44, %c16, %c0_45] : memref<1x32x32xbf16, #tpu.memory_space<vmem>>, vector<1x8x32xbf16>
    %122 = vector.shape_cast %121 : vector<1x8x32xbf16> to vector<8x32xbf16>
    %cst_46 = arith.constant dense<0.000000e+00> : vector<64x32xf32>
    %123 = tpu.matmul %120, %122, %cst_46 {dimension_numbers = #tpu.dot_dimension_numbers<[1], [0], [0], [1], [0, 0, 1, 1], [], []>} : vector<64x8xbf16>, vector<8x32xbf16>, vector<64x32xf32> -> vector<64x32xf32>
    %124 = arith.addf %98, %123 : vector<64x32xf32>
    %125 = vector.extract_strided_slice %41 {offsets = [0, 0, 24], sizes = [8, 8, 8], strides = [1, 1, 1]} : vector<8x8x32xbf16> to vector<8x8x8xbf16>
    %126 = vector.extract_strided_slice %44 {offsets = [0, 0, 24], sizes = [8, 8, 8], strides = [1, 1, 1]} : vector<8x8x32xbf16> to vector<8x8x8xbf16>
    "tpu.trace_start"() <{level = 10 : i32, message = "btd,bsd->bts"}> : () -> ()
    %cst_47 = arith.constant dense<0.000000e+00> : vector<8x8x8xf32>
    %127 = tpu.matmul %125, %126, %cst_47 {dimension_numbers = #tpu.dot_dimension_numbers<[2], [2], [1], [1], [0, 0, 0, 1, 1, 1], [0], [0]>} : vector<8x8x8xbf16>, vector<8x8x8xbf16>, vector<8x8x8xf32> -> vector<8x8x8xf32>
    "tpu.trace_stop"() : () -> ()
    %cst_48 = arith.constant 0.353553385 : f32
    %128 = vector.broadcast %cst_48 : f32 to vector<8x8x8xf32>
    %129 = arith.mulf %127, %128 : vector<8x8x8xf32>
    %130 = vector.broadcast %4 : vector<1x8x8xf32> to vector<8x8x8xf32>
    %131 = arith.addf %129, %130 : vector<8x8x8xf32>
    %cst_49 = arith.constant dense<0xFF800000> : vector<8x8xf32>
    %132 = vector.multi_reduction <maximumf>, %131, %cst_49 [2] : vector<8x8x8xf32> to vector<8x8xf32>
    %133 = vector.shape_cast %132 : vector<8x8xf32> to vector<8x8x1xf32>
    %134 = vector.broadcast %133 : vector<8x8x1xf32> to vector<8x8x8xf32>
    %135 = arith.subf %131, %134 : vector<8x8x8xf32>
    %136 = math.exp %135 : vector<8x8x8xf32>
    %cst_50 = arith.constant dense<0.000000e+00> : vector<8x8xf32>
    %137 = vector.multi_reduction <add>, %136, %cst_50 [2] : vector<8x8x8xf32> to vector<8x8xf32>
    %138 = vector.shape_cast %137 : vector<8x8xf32> to vector<8x8x1xf32>
    %139 = tpu.reciprocal %138 {approx = true} : vector<8x8x1xf32> -> vector<8x8x1xf32>
    %140 = vector.broadcast %139 : vector<8x8x1xf32> to vector<8x8x8xf32>
    %141 = arith.mulf %136, %140 : vector<8x8x8xf32>
    %142 = arith.truncf %141 : vector<8x8x8xf32> to vector<8x8x8xbf16>
    %143 = vector.extract_strided_slice %47 {offsets = [0, 0, 24], sizes = [8, 8, 8], strides = [1, 1, 1]} : vector<8x8x32xbf16> to vector<8x8x8xbf16>
    "tpu.trace_start"() <{level = 10 : i32, message = "bts,bsd->btd"}> : () -> ()
    %cst_51 = arith.constant dense<0.000000e+00> : vector<8x8x8xf32>
    %144 = tpu.matmul %142, %143, %cst_51 {dimension_numbers = #tpu.dot_dimension_numbers<[2], [1], [1], [2], [0, 0, 0, 1, 1, 2], [0], [0]>} : vector<8x8x8xbf16>, vector<8x8x8xbf16>, vector<8x8x8xf32> -> vector<8x8x8xf32>
    "tpu.trace_stop"() : () -> ()
    %145 = vector.shape_cast %144 : vector<8x8x8xf32> to vector<64x8xf32>
    %146 = arith.truncf %145 : vector<64x8xf32> to vector<64x8xbf16>
    %c0_52 = arith.constant 0 : index
    %c24 = arith.constant 24 : index
    %c0_53 = arith.constant 0 : index
    %147 = vector.load %arg8[%c0_52, %c24, %c0_53] : memref<1x32x32xbf16, #tpu.memory_space<vmem>>, vector<1x8x32xbf16>
    %148 = vector.shape_cast %147 : vector<1x8x32xbf16> to vector<8x32xbf16>
    %cst_54 = arith.constant dense<0.000000e+00> : vector<64x32xf32>
    %149 = tpu.matmul %146, %148, %cst_54 {dimension_numbers = #tpu.dot_dimension_numbers<[1], [0], [0], [1], [0, 0, 1, 1], [], []>} : vector<64x8xbf16>, vector<8x32xbf16>, vector<64x32xf32> -> vector<64x32xf32>
    %150 = arith.addf %124, %149 : vector<64x32xf32>
    %151 = arith.addf %3, %150 : vector<64x32xf32>
    %c0_55 = arith.constant 0 : index
    %c0_56 = arith.constant 0 : index
    %c0_57 = arith.constant 0 : index
    %152 = vector.load %arg9[%c0_55, %c0_56, %c0_57] : memref<1x1x32xf32, #tpu.memory_space<vmem>>, vector<1x1x32xf32>
    %153 = vector.shape_cast %152 : vector<1x1x32xf32> to vector<1x32xf32>
    %154 = vector.broadcast %153 : vector<1x32xf32> to vector<64x32xf32>
    %155 = arith.addf %151, %154 : vector<64x32xf32>
    %c0_58 = arith.constant 0 : index
    %c0_59 = arith.constant 0 : index
    %c0_60 = arith.constant 0 : index
    %156 = vector.load %arg10[%c0_58, %c0_59, %c0_60] : memref<1x1x32xf32, #tpu.memory_space<vmem>>, vector<1x1x32xf32>
    %157 = vector.shape_cast %156 : vector<1x1x32xf32> to vector<1x32xf32>
    %c0_61 = arith.constant 0 : index
    %c0_62 = arith.constant 0 : index
    %c0_63 = arith.constant 0 : index
    %158 = vector.load %arg11[%c0_61, %c0_62, %c0_63] : memref<1x1x32xf32, #tpu.memory_space<vmem>>, vector<1x1x32xf32>
    %159 = vector.shape_cast %158 : vector<1x1x32xf32> to vector<1x32xf32>
    %cst_64 = arith.constant dense<0.000000e+00> : vector<64xf32>
    %160 = vector.multi_reduction <add>, %155, %cst_64 [1] : vector<64x32xf32> to vector<64xf32>
    %161 = vector.shape_cast %160 : vector<64xf32> to vector<64x1xf32>
    %cst_65 = arith.constant 3.200000e+01 : f32
    %162 = vector.broadcast %cst_65 : f32 to vector<64x1xf32>
    %163 = arith.divf %161, %162 : vector<64x1xf32>
    %164 = vector.broadcast %163 : vector<64x1xf32> to vector<64x32xf32>
    %165 = arith.subf %155, %164 : vector<64x32xf32>
    %166 = arith.mulf %165, %165 : vector<64x32xf32>
    %cst_66 = arith.constant dense<0.000000e+00> : vector<64xf32>
    %167 = vector.multi_reduction <add>, %166, %cst_66 [1] : vector<64x32xf32> to vector<64xf32>
    %168 = vector.shape_cast %167 : vector<64xf32> to vector<64x1xf32>
    %cst_67 = arith.constant 3.200000e+01 : f32
    %169 = vector.broadcast %cst_67 : f32 to vector<64x1xf32>
    %170 = arith.divf %168, %169 : vector<64x1xf32>
    %171 = vector.broadcast %163 : vector<64x1xf32> to vector<64x32xf32>
    %172 = arith.subf %155, %171 : vector<64x32xf32>
    %cst_68 = arith.constant 9.99999974E-6 : f32
    %173 = vector.broadcast %cst_68 : f32 to vector<64x1xf32>
    %174 = arith.addf %170, %173 : vector<64x1xf32>
    %175 = math.rsqrt %174 : vector<64x1xf32>
    %176 = vector.broadcast %175 : vector<64x1xf32> to vector<64x32xf32>
    %177 = arith.mulf %172, %176 : vector<64x32xf32>
    %178 = vector.broadcast %157 : vector<1x32xf32> to vector<64x32xf32>
    %179 = arith.mulf %177, %178 : vector<64x32xf32>
    %180 = vector.broadcast %159 : vector<1x32xf32> to vector<64x32xf32>
    %181 = arith.addf %179, %180 : vector<64x32xf32>
    %182 = arith.truncf %181 : vector<64x32xf32> to vector<64x32xbf16>
    %c0_69 = arith.constant 0 : index
    %c0_70 = arith.constant 0 : index
    %c0_71 = arith.constant 0 : index
    %183 = vector.load %arg12[%c0_69, %c0_70, %c0_71] : memref<1x32x128xbf16, #tpu.memory_space<vmem>>, vector<1x32x128xbf16>
    %184 = vector.shape_cast %183 : vector<1x32x128xbf16> to vector<32x128xbf16>
    %cst_72 = arith.constant dense<0.000000e+00> : vector<64x128xf32>
    %185 = tpu.matmul %182, %184, %cst_72 {dimension_numbers = #tpu.dot_dimension_numbers<[1], [0], [0], [1], [0, 0, 1, 1], [], []>} : vector<64x32xbf16>, vector<32x128xbf16>, vector<64x128xf32> -> vector<64x128xf32>
    %c0_73 = arith.constant 0 : index
    %c0_74 = arith.constant 0 : index
    %c0_75 = arith.constant 0 : index
    %186 = vector.load %arg13[%c0_73, %c0_74, %c0_75] : memref<1x1x128xf32, #tpu.memory_space<vmem>>, vector<1x1x128xf32>
    %187 = vector.shape_cast %186 : vector<1x1x128xf32> to vector<1x128xf32>
    %188 = vector.broadcast %187 : vector<1x128xf32> to vector<64x128xf32>
    %189 = arith.addf %185, %188 : vector<64x128xf32>
    %cst_76 = arith.constant 5.000000e-01 : f32
    %190 = vector.broadcast %cst_76 : f32 to vector<64x128xf32>
    %191 = arith.mulf %190, %189 : vector<64x128xf32>
    %cst_77 = arith.constant 0.707106769 : f32
    %192 = vector.broadcast %cst_77 : f32 to vector<64x128xf32>
    %193 = arith.mulf %189, %192 : vector<64x128xf32>
    %194 = math.erf %193 : vector<64x128xf32>
    %cst_78 = arith.constant 1.000000e+00 : f32
    %195 = vector.broadcast %cst_78 : f32 to vector<64x128xf32>
    %196 = arith.addf %195, %194 : vector<64x128xf32>
    %197 = arith.mulf %191, %196 : vector<64x128xf32>
    %198 = arith.truncf %197 : vector<64x128xf32> to vector<64x128xbf16>
    %c0_79 = arith.constant 0 : index
    %c0_80 = arith.constant 0 : index
    %c0_81 = arith.constant 0 : index
    %199 = vector.load %arg14[%c0_79, %c0_80, %c0_81] : memref<1x128x32xbf16, #tpu.memory_space<vmem>>, vector<1x128x32xbf16>
    %200 = vector.shape_cast %199 : vector<1x128x32xbf16> to vector<128x32xbf16>
    %cst_82 = arith.constant dense<0.000000e+00> : vector<64x32xf32>
    %201 = tpu.matmul %198, %200, %cst_82 {dimension_numbers = #tpu.dot_dimension_numbers<[1], [0], [0], [1], [0, 0, 1, 1], [], []>} : vector<64x128xbf16>, vector<128x32xbf16>, vector<64x32xf32> -> vector<64x32xf32>
    %202 = arith.addf %155, %201 : vector<64x32xf32>
    %c0_83 = arith.constant 0 : index
    %c0_84 = arith.constant 0 : index
    %c0_85 = arith.constant 0 : index
    %203 = vector.load %arg15[%c0_83, %c0_84, %c0_85] : memref<1x1x32xf32, #tpu.memory_space<vmem>>, vector<1x1x32xf32>
    %204 = vector.shape_cast %203 : vector<1x1x32xf32> to vector<1x32xf32>
    %205 = vector.broadcast %204 : vector<1x32xf32> to vector<64x32xf32>
    %206 = arith.addf %202, %205 : vector<64x32xf32>
    %c0_86 = arith.constant 0 : index
    %c0_87 = arith.constant 0 : index
    %207 = vector.load %arg20[%c0_86, %c0_87] : memref<64x32xf32, #tpu.memory_space<vmem>>, vector<64x32xf32>
    tpu.vector_store %arg20[%c0_86, %c0_87], %206 {strides = array<i32>} : memref<64x32xf32, #tpu.memory_space<vmem>>, vector<64x32xf32>,
    %c1_i32 = arith.constant 1 : i32
    %208 = arith.cmpi eq, %arg1, %c1_i32 : i32
    %209 = arith.extui %208 : i1 to i32
    %c0_i32_88 = arith.constant 0 : i32
    %210 = arith.cmpi ne, %209, %c0_i32_88 : i32
    scf.if %210 {
      %c0_89 = arith.constant 0 : index
      %c0_90 = arith.constant 0 : index
      %211 = vector.load %arg16[%c0_89, %c0_90] : memref<1x32xf32, #tpu.memory_space<vmem>>, vector<1x32xf32>
      %c0_91 = arith.constant 0 : index
      %c0_92 = arith.constant 0 : index
      %212 = vector.load %arg17[%c0_91, %c0_92] : memref<1x32xf32, #tpu.memory_space<vmem>>, vector<1x32xf32>
      %cst_93 = arith.constant dense<0.000000e+00> : vector<64xf32>
      %213 = vector.multi_reduction <add>, %206, %cst_93 [1] : vector<64x32xf32> to vector<64xf32>
      %214 = vector.shape_cast %213 : vector<64xf32> to vector<64x1xf32>
      %cst_94 = arith.constant 3.200000e+01 : f32
      %215 = vector.broadcast %cst_94 : f32 to vector<64x1xf32>
      %216 = arith.divf %214, %215 : vector<64x1xf32>
      %217 = vector.broadcast %216 : vector<64x1xf32> to vector<64x32xf32>
      %218 = arith.subf %206, %217 : vector<64x32xf32>
      %219 = arith.mulf %218, %218 : vector<64x32xf32>
      %cst_95 = arith.constant dense<0.000000e+00> : vector<64xf32>
      %220 = vector.multi_reduction <add>, %219, %cst_95 [1] : vector<64x32xf32> to vector<64xf32>
      %221 = vector.shape_cast %220 : vector<64xf32> to vector<64x1xf32>
      %cst_96 = arith.constant 3.200000e+01 : f32
      %222 = vector.broadcast %cst_96 : f32 to vector<64x1xf32>
      %223 = arith.divf %221, %222 : vector<64x1xf32>
      %224 = vector.broadcast %216 : vector<64x1xf32> to vector<64x32xf32>
      %225 = arith.subf %206, %224 : vector<64x32xf32>
      %cst_97 = arith.constant 9.99999974E-6 : f32
      %226 = vector.broadcast %cst_97 : f32 to vector<64x1xf32>
      %227 = arith.addf %223, %226 : vector<64x1xf32>
      %228 = math.rsqrt %227 : vector<64x1xf32>
      %229 = vector.broadcast %228 : vector<64x1xf32> to vector<64x32xf32>
      %230 = arith.mulf %225, %229 : vector<64x32xf32>
      %231 = vector.broadcast %211 : vector<1x32xf32> to vector<64x32xf32>
      %232 = arith.mulf %230, %231 : vector<64x32xf32>
      %233 = vector.broadcast %212 : vector<1x32xf32> to vector<64x32xf32>
      %234 = arith.addf %232, %233 : vector<64x32xf32>
      %235 = arith.truncf %234 : vector<64x32xf32> to vector<64x32xbf16>
      %c0_98 = arith.constant 0 : index
      %c0_99 = arith.constant 0 : index
      %236 = vector.load %arg18[%c0_98, %c0_99] : memref<32x128xbf16, #tpu.memory_space<vmem>>, vector<32x128xbf16>
      %cst_100 = arith.constant dense<0.000000e+00> : vector<64x128xf32>
      %237 = tpu.matmul %235, %236, %cst_100 {dimension_numbers = #tpu.dot_dimension_numbers<[1], [0], [0], [1], [0, 0, 1, 1], [], []>} : vector<64x32xbf16>, vector<32x128xbf16>, vector<64x128xf32> -> vector<64x128xf32>
      %c0_101 = arith.constant 0 : index
      %c0_102 = arith.constant 0 : index
      %238 = vector.load %arg19[%c0_101, %c0_102] : memref<64x128xf32, #tpu.memory_space<vmem>>, vector<64x128xf32>
      tpu.vector_store %arg19[%c0_101, %c0_102], %237 {strides = array<i32>} : memref<64x128xf32, #tpu.memory_space<vmem>>, vector<64x128xf32>,
    } else {
    }
    return
  }
  func.func @transform_0(%arg0: i32, %arg1: i32) -> (i32, i32) {
    %c0_i32 = arith.constant 0 : i32
    %c0_i32_0 = arith.constant 0 : i32
    return %arg0, %c0_i32 : i32, i32
  }
  func.func @transform_1(%arg0: i32, %arg1: i32) -> (i32, i32, i32) {
    %c0_i32 = arith.constant 0 : i32
    %c0_i32_0 = arith.constant 0 : i32
    %c0_i32_1 = arith.constant 0 : i32
    %c0_i32_2 = arith.constant 0 : i32
    return %c0_i32, %c0_i32_0, %c0_i32_1 : i32, i32, i32
  }
  func.func @transform_2(%arg0: i32, %arg1: i32) -> (i32, i32, i32) {
    %c0_i32 = arith.constant 0 : i32
    %c0_i32_0 = arith.constant 0 : i32
    %c0_i32_1 = arith.constant 0 : i32
    return %arg1, %c0_i32, %c0_i32_0 : i32, i32, i32
  }
  func.func @transform_3(%arg0: i32, %arg1: i32) -> (i32, i32, i32) {
    %c0_i32 = arith.constant 0 : i32
    %c0_i32_0 = arith.constant 0 : i32
    %c0_i32_1 = arith.constant 0 : i32
    return %arg1, %c0_i32, %c0_i32_0 : i32, i32, i32
  }
  func.func @transform_4(%arg0: i32, %arg1: i32) -> (i32, i32, i32) {
    %c0_i32 = arith.constant 0 : i32
    %c0_i32_0 = arith.constant 0 : i32
    %c0_i32_1 = arith.constant 0 : i32
    return %arg1, %c0_i32, %c0_i32_0 : i32, i32, i32
  }
  func.func @transform_5(%arg0: i32, %arg1: i32) -> (i32, i32, i32) {
    %c0_i32 = arith.constant 0 : i32
    %c0_i32_0 = arith.constant 0 : i32
    %c0_i32_1 = arith.constant 0 : i32
    return %arg1, %c0_i32, %c0_i32_0 : i32, i32, i32
  }
  func.func @transform_6(%arg0: i32, %arg1: i32) -> (i32, i32, i32) {
    %c0_i32 = arith.constant 0 : i32
    %c0_i32_0 = arith.constant 0 : i32
    %c0_i32_1 = arith.constant 0 : i32
    return %arg1, %c0_i32, %c0_i32_0 : i32, i32, i32
  }
  func.func @transform_7(%arg0: i32, %arg1: i32) -> (i32, i32, i32) {
    %c0_i32 = arith.constant 0 : i32
    %c0_i32_0 = arith.constant 0 : i32
    %c0_i32_1 = arith.constant 0 : i32
    return %arg1, %c0_i32, %c0_i32_0 : i32, i32, i32
  }
  func.func @transform_8(%arg0: i32, %arg1: i32) -> (i32, i32, i32) {
    %c0_i32 = arith.constant 0 : i32
    %c0_i32_0 = arith.constant 0 : i32
    %c0_i32_1 = arith.constant 0 : i32
    return %arg1, %c0_i32, %c0_i32_0 : i32, i32, i32
  }
  func.func @transform_9(%arg0: i32, %arg1: i32) -> (i32, i32, i32) {
    %c0_i32 = arith.constant 0 : i32
    %c0_i32_0 = arith.constant 0 : i32
    %c0_i32_1 = arith.constant 0 : i32
    return %arg1, %c0_i32, %c0_i32_0 : i32, i32, i32
  }
  func.func @transform_10(%arg0: i32, %arg1: i32) -> (i32, i32, i32) {
    %c0_i32 = arith.constant 0 : i32
    %c0_i32_0 = arith.constant 0 : i32
    %c0_i32_1 = arith.constant 0 : i32
    return %arg1, %c0_i32, %c0_i32_0 : i32, i32, i32
  }
  func.func @transform_11(%arg0: i32, %arg1: i32) -> (i32, i32, i32) {
    %c0_i32 = arith.constant 0 : i32
    %c0_i32_0 = arith.constant 0 : i32
    %c0_i32_1 = arith.constant 0 : i32
    return %arg1, %c0_i32, %c0_i32_0 : i32, i32, i32
  }
  func.func @transform_12(%arg0: i32, %arg1: i32) -> (i32, i32, i32) {
    %c0_i32 = arith.constant 0 : i32
    %c0_i32_0 = arith.constant 0 : i32
    %c0_i32_1 = arith.constant 0 : i32
    return %arg1, %c0_i32, %c0_i32_0 : i32, i32, i32
  }
  func.func @transform_13(%arg0: i32, %arg1: i32) -> (i32, i32, i32) {
    %c0_i32 = arith.constant 0 : i32
    %c0_i32_0 = arith.constant 0 : i32
    %c0_i32_1 = arith.constant 0 : i32
    return %arg1, %c0_i32, %c0_i32_0 : i32, i32, i32
  }
  func.func @transform_14(%arg0: i32, %arg1: i32) -> (i32, i32) {
    %c0_i32 = arith.constant 0 : i32
    %c0_i32_0 = arith.constant 0 : i32
    %c0_i32_1 = arith.constant 0 : i32
    return %c0_i32, %c0_i32_0 : i32, i32
  }
  func.func @transform_15(%arg0: i32, %arg1: i32) -> (i32, i32) {
    %c0_i32 = arith.constant 0 : i32
    %c0_i32_0 = arith.constant 0 : i32
    %c0_i32_1 = arith.constant 0 : i32
    return %c0_i32, %c0_i32_0 : i32, i32
  }
  func.func @transform_16(%arg0: i32, %arg1: i32) -> (i32, i32) {
    %c0_i32 = arith.constant 0 : i32
    %c0_i32_0 = arith.constant 0 : i32
    %c0_i32_1 = arith.constant 0 : i32
    return %c0_i32, %c0_i32_0 : i32, i32
  }
  func.func @transform_17(%arg0: i32, %arg1: i32) -> (i32, i32) {
    %c0_i32 = arith.constant 0 : i32
    %c0_i32_0 = arith.constant 0 : i32
    return %arg0, %c0_i32 : i32, i32
  }
}

</mosaic_0001>

<bundles_post_ra>
// kernel: tpu_custom_call.1
= control target key start
LH: loop header
LB: loop body
LE: loop exit
PB: predicated region body
PF: predicated region fallthrough
CT: control target
= control target key end

     0   :  { %s8580_s0 = inlined_call_operand.vmem [shape: f32[128,32], index: 0, kind: input, shape index: {}]   ;;  %s8581_s1 = inlined_call_operand.vmem [shape: f32[1,8,8], index: 1, kind: input, shape index: {}]   ;;  %s8582_s2 = inlined_call_operand.vmem [shape: f32[2,1,32], index: 2, kind: input, shape index: {}]   ;;  %s8583_s3 = inlined_call_operand.vmem [shape: f32[2,1,32], index: 3, kind: input, shape index: {}]   ;;  %s8584_s4 = inlined_call_operand.vmem [shape: bf16[2,32,96], index: 4, kind: input, shape index: {}]   ;;  %s8585_s5 = inlined_call_operand.vmem [shape: f32[2,1,96], index: 5, kind: input, shape index: {}]   ;;  %s8586_s6 = inlined_call_operand.vmem [shape: bf16[2,32,32], index: 6, kind: input, shape index: {}]   ;;  %s8587_s7 = inlined_call_operand.vmem [shape: f32[2,1,32], index: 7, kind: input, shape index: {}]   ;;  %s8588_s8 = inlined_call_operand.vmem [shape: f32[2,1,32], index: 8, kind: input, shape index: {}]   ;;  %s8589_s9 = inlined_call_operand.vmem [shape: f32[2,1,32], index: 9, kind: input, shape index: {}]   ;;  %s8590_s10 = inlined_call_operand.vmem [shape: bf16[2,32,128], index: 10, kind: input, shape index: {}]   ;;  %s8591_s11 = inlined_call_operand.vmem [shape: f32[2,1,128], index: 11, kind: input, shape index: {}]   ;;  %s8592_s12 = inlined_call_operand.vmem [shape: bf16[2,128,32], index: 12, kind: input, shape index: {}]   ;;  %s8593_s13 = inlined_call_operand.vmem [shape: f32[2,1,32], index: 13, kind: input, shape index: {}]   ;;  %s8594_s14 = inlined_call_operand.vmem [shape: f32[1,32], index: 14, kind: input, shape index: {}]   ;;  %s8595_s15 = inlined_call_operand.vmem [shape: f32[1,32], index: 15, kind: input, shape index: {}]   ;;  %s8596_s16 = inlined_call_operand.vmem [shape: bf16[32,128], index: 16, kind: input, shape index: {}]   ;;  %s8597_s17 = inlined_call_operand.hbm [shape: f32[128,128], index: 17, kind: output, shape index: {}]  }
   0x1   :  { %8615 = sst [smem:[#allocation19_spill]] %s8580_s0 }
   0x2   :  { %8616 = sst [smem:[#allocation20_spill]] %s8581_s1 }
   0x3   :  { %8617 = sst [smem:[#allocation21_spill]] %s8583_s3 }
   0x4   :  { %8618 = sst [smem:[#allocation22_spill]] %s8584_s4 }
   0x5   :  { %8619 = sst [smem:[#allocation23_spill]] %s8586_s6 }
   0x6   :  { %8620 = sst [smem:[#allocation24_spill]] %s8594_s14 }
   0x7   :  { %8621 = sst [smem:[#allocation25_spill]] %s8595_s15 }
   0x8   :  { %8622 = sst [smem:[#allocation26_spill]] %s8596_s16 }
   0x9   :  { %8623 = sst [smem:[#allocation27_spill]] %s8597_s17 }
   0xa   :  { %22 = vsyncpa [#allocation4], 0 }
   0xb   :  { %24 = vsyncpa [#allocation4 + $0x1], 0  ;;  %s7223_s24 = smov 0   ;;  %s7225_s25 = smov 0  }
   0xc   :  { %s7227_s26 = smov 0   ;;  %s7229_s27 = smov 0  }
   0xd   :  { %s7231_s28 = smov 0   ;;  %s7233_s29 = smov 0  }
   0xe   :  { %s7235_s0 = smov 0   ;;  %s7237_s30 = smov 0  }
   0xf LB: > { %8624 = sst [smem:[#allocation6_spill]] %s7087_s24  ;;  %s5882_s18 = sadd.s32 4294967295, %s7115_s30   ;;  %s7115_s30 = sphi %s7237_s30, %s30_s30   ;;  %s7111_s0 = sphi %s7235_s0, %s8670_s0   ;;  %s7107_s29 = sphi %s7233_s29, %s8669_s29   ;;  %s7103_s28 = sphi %s7231_s28, %s8668_s28   ;;  %s7099_s27 = sphi %s7229_s27, %s8667_s27   ;;  %s7095_s26 = sphi %s7227_s26, %s8666_s26   ;;  %s7091_s25 = sphi %s7225_s25, %s8665_s25   ;;  %s7087_s24 = sphi %s7223_s24, %s8664_s24  }
  0x10   : > { %8625 = sst [smem:[#allocation7_spill]] %s7091_s25  ;;  %s5883_s19 = sadd.s32 4294967294, %s7115_s30  }
  0x11   : > { %8626 = sst [smem:[#allocation8_spill]] %s7095_s26  ;;  %s39_s1 = sadd.s32 1, %s7107_s29 }
  0x12   : > { %8627 = sst [smem:[#allocation9_spill]] %s7099_s27  ;;  %p40_p0 = scmp.ge.s32.totalorder %s39_s1, 2 }
  0x13   : > { %8628 = sst [smem:[#allocation10_spill]] %s7103_s28  ;;  %s42_s20 = sadd.s32 1, %s7111_s0 }
  0x14   : > { %8629 = sst [smem:[#allocation11_spill]] %s7107_s29  ;;  %p481_p1 = scmp.ne.s32.totalorder %s7095_s26, %s7091_s25 }
  0x15   : > { %8630 = sst [smem:[#allocation12_spill]] %s7111_s0  ;;  %p482_p2 = scmp.eq.s32.totalorder %s5882_s18, 3 }
  0x16   : > { %8631 = sst [smem:[#allocation13_spill]] %s7115_s30  ;;  %s8672_s1 = smov (%p40_p0, %s39_s1), 0 }
  0x17   : > { %8632 = sst [smem:[#allocation14_spill]] %s8672_s1  ;;  %s8674_s20 = smov (!%p40_p0, %s42_s20), %s7111_s0 }
  0x18   : > { %p7272_p3 = por %p482_p2, %p481_p1  ;;  %p487_p4 = scmp.ne.s32.totalorder %s7091_s25, %s7087_s24 }
  0x19   : > { %p44_p5 = scmp.ge.s32.totalorder %s8674_s20, 2  ;;  %p488_p6 = scmp.eq.s32.totalorder %s5883_s19, 3 }
  0x1a   : > { %s8633_s21 = scalar_select %p7272_p3, 1, 0 }
  0x1b   : > { %p5886_p7 = scmp.ge.s32.totalorder %s7115_s30, 1  ;;  %p607_p8 = scmp.lt.s32.totalorder %s7115_s30, 5 }
  0x1c   : > { %8634 = sst [smem:[#allocation15_spill]] %s8633_s21  ;;  %s8676_s20 = smov (%p44_p5, %s8674_s20), 0 }
  0x1d   : > { %8635 = sst [smem:[#allocation16_spill]] %s8676_s20  ;;  %p7282_p9 = por %p488_p6, %p487_p4 }
  0x1e   : > { %p608_p10 = pnand %p5886_p7, %p607_p8  ;;  %s468_s23 = ssub.s32 %s7111_s0, %s8676_s20 }
  0x1f   : > { %s8636_s22 = scalar_select %p7282_p9, 1, 0 }
  0x20   : > { %s471_s18 = sadd.s32 1, %s7095_s26  ;;  %p469_p11 = scmp.eq.s32.totalorder %s468_s23, 0 }
  0x21   : > { %8637 = sst [smem:[#allocation17_spill]] %s8636_s22  ;;  %611 = sbr.rel (%p608_p10) target bundleno = 5352 (0x14e8), region = 88 }
  0x22   : > { %s7290_s1 = scalar_select %p469_p11, %s7095_s26, %s471_s18  }
  0x23   : > { %s8604_s19 = sand.u32 (!%p608_p10), 1, %s7091_s25   ;;  %s5888_s29 = sshll.u32 (!%p608_p10), %s7103_s28, 3 }
  0x24   : > { %8638 = sst [smem:[#allocation18_spill]] %s7290_s1  ;;  %s5887_s24 = sshll.u32 (!%p608_p10), %s8604_s19, 6 }
  0x25   : > { %p704_p12 = scmp.lt.s32.totalorder (!%p608_p10), %s5888_s29, 15  ;;  %p709_p13 = scmp.lt.s32.totalorder (!%p608_p10), %s7099_s27, 1 }
  0x26   : > { %s8639_s0 = sld [smem:[#allocation19_spill]] (!%p608_p10)  ;;  %s8641_s4 = sld [smem:[#allocation22_spill]] (!%p608_p10) }
  0x27   : > { %s8642_s6 = sld [smem:[#allocation23_spill]] (!%p608_p10)  ;;  %s7359_s14 = scalar_lea.vmem (!%p608_p10), [#allocation3], %s5887_s24 }
  0x28   : > { %s8678_s29 = smov (!%p704_p12, %s5888_s29), 15  ;;  %s8643_s15 = sld [smem:[#allocation9_spill]] }
  0x29   : > { %s7298_s22 = scalar_select %p709_p13, %s7099_s27, 1 }
  0x2a   : > { %s5889_s23 = sshll.u32 %s8678_s29, 3 }
  0x2b   : > { %s6021_s28 = sshll.u32 %s7298_s22, 4  ;;  %s744_s20 = scalar_lea.vmem %s8591_s11, %s7298_s22 }
  0x2c   : > { %s7303_s19 = scalar_lea.vmem %s8639_s0, %s5889_s23  ;;  %s7317_s16 = scalar_lea.vmem %s8641_s4, %s6021_s28 }
  0x2d   : > { %s7326_s18 = scalar_lea.vmem %s8642_s6, %s6021_s28  ;;  %s736_s4 = scalar_lea.vmem %s8589_s9, %s7298_s22 }
  0x2e   : > { %s7343_s29 = scalar_lea.vmem %s8590_s10, %s6021_s28  ;;  %s6024_s6 = sshll.u32 %s7298_s22, 6 }
  0x2f   : > { %s752_s17 = scalar_lea.vmem %s8593_s13, %s7298_s22  ;;  %s7357_s30 = scalar_lea.vmem %s8592_s12, %s6024_s6 }
  0x30   : > { %p5898_p0 = scmp.ne.s32.totalorder %s8643_s15, 0 }
  0x31   : > { %v759_v0 = vld [vmem:[%s7303_s19] sm:$0xff] (!%p5898_p0)  ;;  %vm767_vm0 = vcmask (!%p5898_p0), 261120   ;;  %v760_v1 = vld [vmem:[%s7303_s19 + $0x8] sm:$0xff] (!%p5898_p0)  ;;  %v761_v2 = vld [vmem:[%s7303_s19 + $0x10] sm:$0xff] (!%p5898_p0) }
  0x32   : > { %758 = sbr.rel (%p5898_p0) target bundleno = 57 (0x39), region = 92  ;;  %768 = vst.msk [vmem:[#allocation2] sm:$0xff] (!%p5898_p0), %vm767_vm0, %v759_v0  ;;  %769 = vst.msk [vmem:[#allocation2 + $0x8] sm:$0xff] (!%p5898_p0), %vm767_vm0, %v760_v1  ;;  %v762_v3 = vld [vmem:[%s7303_s19 + $0x18] sm:$0xff] (!%p5898_p0)  ;;  %v763_v4 = vld [vmem:[%s7303_s19 + $0x20] sm:$0xff] (!%p5898_p0) }
  0x33   : > { %770 = vst.msk [vmem:[#allocation2 + $0x10] sm:$0xff] (!%p5898_p0), %vm767_vm0, %v761_v2  ;;  %v764_v5 = vld [vmem:[%s7303_s19 + $0x28] sm:$0xff] (!%p5898_p0)  ;;  %771 = vst.msk [vmem:[#allocation2 + $0x18] sm:$0xff] (!%p5898_p0), %vm767_vm0, %v762_v3  ;;  %v765_v6 = vld [vmem:[%s7303_s19 + $0x30] sm:$0xff] (!%p5898_p0) }
  0x34   : > { %772 = vst.msk [vmem:[#allocation2 + $0x20] sm:$0xff] (!%p5898_p0), %vm767_vm0, %v763_v4  ;;  %773 = vst.msk [vmem:[#allocation2 + $0x28] sm:$0xff] (!%p5898_p0), %vm767_vm0, %v764_v5  ;;  %v766_v7 = vld [vmem:[%s7303_s19 + $0x38] sm:$0xff] (!%p5898_p0) }
  0x35   : > { %774 = vst.msk [vmem:[#allocation2 + $0x30] sm:$0xff] (!%p5898_p0), %vm767_vm0, %v765_v6  ;;  %775 = vst.msk [vmem:[#allocation2 + $0x38] sm:$0xff] (!%p5898_p0), %vm767_vm0, %v766_v7 }
  0x39 PF: > { %v776_v8 = vld [vmem:[#allocation2] sm:$0xff]  ;;  %vm787_vm1 = vcmask 261120   ;;  %v777_v10 = vld [vmem:[#allocation2 + $0x8] sm:$0xff]  ;;  %s8645_s19 = sld [smem:[#allocation21_spill]]  ;;  %s8647_s26 = scalar_lea.vmem %s8585_s5, %s7298_s22  ;;  %vm7118_vm2 = vmmov 0   ;;  %vm1036_vm3 = vcmask 64512  }
  0x3a   : > { %v778_v9 = vld [vmem:[#allocation2 + $0x10] sm:$0xff]  ;;  %v788_v11 = vsel %vm787_vm1, %v776_v8, 0.0  ;;  %v779_v13 = vld [vmem:[#allocation2 + $0x18] sm:$0xff]  ;;  %v791_v16 = vsel %vm787_vm1, %v777_v10, 0.0  ;;  %v6806_v0 = vld [vmem:[%s7317_s16] sm:$0xff]   ;;  %s7119_s1 = smov 96   ;;  %s8649_s15 = scalar_lea.vmem %s8587_s7, %s7298_s22 }
  0x3b   : > { %v794_v12 = vsel %vm787_vm1, %v778_v9, 0.0  ;;  %v780_v14 = vld [vmem:[#allocation2 + $0x20] sm:$0xff]  ;;  %v781_v15 = vld [vmem:[#allocation2 + $0x28] sm:$0xff]  ;;  %789 = vadd.xlane.f32.xlu0 %v788_v11  ;;  %v797_v17 = vsel %vm787_vm1, %v779_v13, 0.0  ;;  %6204 = vmatprep.subr.bf16.mxu1 %v6806_v0  ;;  %s7120_s25 = smov 64   ;;  %vm1543_vm4 = vcmask 1043456  }
  0x3c   : > { %795 = vadd.xlane.f32.xlu1 %v794_v12  ;;  %v800_v18 = vsel %vm787_vm1, %v780_v14, 0.0  ;;  %v803_v19 = vsel %vm787_vm1, %v781_v15, 0.0  ;;  %v782_v20 = vld [vmem:[#allocation2 + $0x30] sm:$0xff]  ;;  %v783_v21 = vld [vmem:[#allocation2 + $0x38] sm:$0xff]  ;;  %v6807_v1 = vld [vmem:[%s7317_s16 + $0x8] sm:$0xff]   ;;  %6205 = vmatpush3.bf16.msra.mxu1 %v6806_v0  ;;  %s8644_s16 = scalar_lea.vmem %s8582_s2, %s7298_s22  ;;  %s8648_s3 = sld [smem:[#allocation20_spill]] }
  0x3d   : > { %v806_v22 = vsel %vm787_vm1, %v782_v20, 0.0  ;;  %v809_v23 = vsel %vm787_vm1, %v783_v21, 0.0  ;;  %6206 = vmatprep.subr.bf16.mxu1 %v6807_v1  ;;  %s7121_s6 = smov 88   ;;  %s7123_s24 = smov 56  }
  0x3e   : > { %s7124_s28 = smov 80   ;;  %s7126_s23 = smov 48  }
  0x3f   : > { %792 = vadd.xlane.f32.xlu0 %v791_v16  ;;  %s8646_s27 = scalar_lea.vmem %s8645_s19, %s7298_s22  ;;  %s7125_s19 = smov 112  }
  0x40   : > { %798 = vadd.xlane.f32.xlu1 %v797_v17  ;;  %6207 = vmatpush3.bf16.msra.mxu1 %v6807_v1 }
  0x43   : > { %801 = vadd.xlane.f32.xlu0 %v800_v18 }
  0x44   : > { %804 = vadd.xlane.f32.xlu1 %v803_v19 }
  0x47   : > { %807 = vadd.xlane.f32.xlu0 %v806_v22 }
  0x48   : > { %810 = vadd.xlane.f32.xlu1 %v809_v23 }
  0xc8   : > { %v790_v24 = vpop.xlane.xlu0 %789 }
  0xc9   : > { %v796_v25 = vpop.xlane.xlu1 %795  ;;  %v813_v26 = vmul.f32 0.03125, %v790_v24 }
  0xca   : > { %v815_v27 = vmul.f32 0.03125, %v796_v25 }
  0xcb   : > { %v7378_v28 = vsub.f32 %v776_v8, %v813_v26 }
  0xcc   : > { %v7380_v29 = vsub.f32 %v778_v9, %v815_v27  ;;  %v793_v30 = vpop.xlane.xlu0 %792  ;;  %v5899_v27 = vld [vmem:[%s8644_s16] ss:$0 sm:$0xff]  ;;  %s7122_s16 = smov 120  }
  0xcd   : > { %v799_v31 = vpop.xlane.xlu1 %798  ;;  %v814_v32 = vmul.f32 0.03125, %v793_v30  ;;  %v829_v34 = vmul.f32 %v7378_v28, %v7378_v28 }
  0xce   : > { %v816_v33 = vmul.f32 0.03125, %v799_v31  ;;  %v831_v35 = vmul.f32 %v7380_v29, %v7380_v29 }
  0xcf   : > { %v7386_v36 = vsub.f32 %v777_v10, %v814_v32  ;;  %v837_v38 = vsel %vm787_vm1, %v829_v34, 0.0 }
  0xd0   : > { %v7388_v37 = vsub.f32 %v779_v13, %v816_v33  ;;  %838 = vadd.xlane.f32.xlu0 %v837_v38  ;;  %v802_v39 = vpop.xlane.xlu0 %801  ;;  %v843_v41 = vsel %vm787_vm1, %v831_v35, 0.0 }
  0xd1   : > { %v805_v40 = vpop.xlane.xlu1 %804  ;;  %v817_v42 = vmul.f32 0.03125, %v802_v39  ;;  %v830_v44 = vmul.f32 %v7386_v36, %v7386_v36 }
  0xd2   : > { %v818_v43 = vmul.f32 0.03125, %v805_v40  ;;  %v832_v45 = vmul.f32 %v7388_v37, %v7388_v37 }
  0xd3   : > { %v7396_v46 = vsub.f32 %v780_v14, %v817_v42  ;;  %v840_v48 = vsel %vm787_vm1, %v830_v44, 0.0 }
  0xd4   : > { %v7398_v47 = vsub.f32 %v781_v15, %v818_v43  ;;  %844 = vadd.xlane.f32.xlu0 %v843_v41  ;;  %841 = vadd.xlane.f32.xlu1 %v840_v48  ;;  %v808_v49 = vpop.xlane.xlu0 %807  ;;  %v846_v51 = vsel %vm787_vm1, %v832_v45, 0.0 }
  0xd5   : > { %v811_v50 = vpop.xlane.xlu1 %810  ;;  %v819_v52 = vmul.f32 0.03125, %v808_v49  ;;  %v833_v54 = vmul.f32 %v7396_v46, %v7396_v46 }
  0xd6   : > { %v820_v53 = vmul.f32 0.03125, %v811_v50  ;;  %v834_v55 = vmul.f32 %v7398_v47, %v7398_v47 }
  0xd7   : > { %v7406_v56 = vsub.f32 %v782_v20, %v819_v52  ;;  %v849_v58 = vsel %vm787_vm1, %v833_v54, 0.0 }
  0xd8   : > { %v7408_v57 = vsub.f32 %v783_v21, %v820_v53  ;;  %847 = vadd.xlane.f32.xlu1 %v846_v51  ;;  %850 = vadd.xlane.f32.xlu0 %v849_v58  ;;  %v852_v59 = vsel %vm787_vm1, %v834_v55, 0.0 }
  0xd9   : > { %v835_v60 = vmul.f32 %v7406_v56, %v7406_v56 }
  0xda   : > { %v836_v61 = vmul.f32 %v7408_v57, %v7408_v57 }
  0xdb   : > { %v855_v62 = vsel %vm787_vm1, %v835_v60, 0.0 }
  0xdc   : > { %853 = vadd.xlane.f32.xlu1 %v852_v59  ;;  %856 = vadd.xlane.f32.xlu0 %v855_v62  ;;  %v858_v63 = vsel %vm787_vm1, %v836_v61, 0.0 }
  0xe0   : > { %859 = vadd.xlane.f32.xlu1 %v858_v63 }
 0x15d   : > { %v839_v2 = vpop.xlane.xlu0 %838 }
 0x15e   : > { %v861_v3 = vmul.f32 0.03125, %v839_v2 }
 0x160   : > { %v869_v4 = vadd.f32 1e-05, %v861_v3 }
 0x161   : > { %v842_v5 = vpop.xlane.xlu1 %841  ;;  %v845_v6 = vpop.xlane.xlu0 %844 }
 0x162   : > { %6818 = vrsqrt.f32 %v869_v4  ;;  %v862_v7 = vmul.f32 0.03125, %v842_v5  ;;  %v863_v8 = vmul.f32 0.03125, %v845_v6 }
 0x164   : > { %v870_v9 = vadd.f32 1e-05, %v862_v7  ;;  %v871_v10 = vadd.f32 1e-05, %v863_v8 }
 0x165   : > { %v848_v11 = vpop.xlane.xlu1 %847  ;;  %v851_v12 = vpop.xlane.xlu0 %850 }
 0x166   : > { %6820 = vrsqrt.f32 %v870_v9  ;;  %v864_v13 = vmul.f32 0.03125, %v848_v11  ;;  %v865_v14 = vmul.f32 0.03125, %v851_v12 }
 0x167   : > { %6822 = vrsqrt.f32 %v871_v10 }
 0x168   : > { %v872_v15 = vadd.f32 1e-05, %v864_v13  ;;  %v873_v16 = vadd.f32 1e-05, %v865_v14 }
 0x169   : > { %v854_v17 = vpop.xlane.xlu1 %853  ;;  %v857_v18 = vpop.xlane.xlu0 %856 }
 0x16a   : > { %6824 = vrsqrt.f32 %v872_v15  ;;  %v866_v19 = vmul.f32 0.03125, %v854_v17  ;;  %v867_v20 = vmul.f32 0.03125, %v857_v18 }
 0x16b   : > { %6826 = vrsqrt.f32 %v873_v16 }
 0x16c   : > { %v6819_v21 = vpop.eup %6818  ;;  %v874_v22 = vadd.f32 1e-05, %v866_v19  ;;  %v875_v23 = vadd.f32 1e-05, %v867_v20 }
 0x16d   : > { %v860_v24 = vpop.xlane.xlu1 %859  ;;  %v885_v25 = vmul.f32 %v6819_v21, %v7378_v28  ;;  %v5900_v28 = vld [vmem:[%s8646_s27] ss:$0 sm:$0xff] }
 0x16e   : > { %6828 = vrsqrt.f32 %v874_v22  ;;  %v868_v26 = vmul.f32 0.03125, %v860_v24 }
 0x16f   : > { %6830 = vrsqrt.f32 %v875_v23  ;;  %v899_v34 = vmul.f32 %v5899_v27, %v885_v25 }
 0x170   : > { %v6821_v30 = vpop.eup %6820  ;;  %v876_v31 = vadd.f32 1e-05, %v868_v26 }
 0x171   : > { %v6823_v32 = vpop.eup %6822  ;;  %v886_v33 = vmul.f32 %v6821_v30, %v7386_v36  ;;  %v913_v41 = vadd.f32 %v5900_v28, %v899_v34 }
 0x172   : > { %6832 = vrsqrt.f32 %v876_v31  ;;  %v887_v35 = vmul.f32 %v6823_v32, %v7380_v29 }
 0x173   : > { %v900_v38 = vmul.f32 %v5899_v27, %v886_v33 }
 0x174   : > { %v6825_v39 = vpop.eup %6824  ;;  %v901_v44 = vmul.f32 %v5899_v27, %v887_v35 }
 0x175   : > { %v6827_v40 = vpop.eup %6826  ;;  %v914_v42 = vadd.f32 %v5900_v28, %v900_v38  ;;  %v888_v43 = vmul.f32 %v6825_v39, %v7388_v37 }
 0x176   : > { %v889_v45 = vmul.f32 %v6827_v40, %v7396_v46  ;;  %v915_v51 = vadd.f32 %v5900_v28, %v901_v44 }
 0x177   : > { %v921_v36 = vpack.c.bf16 %v914_v42, %v913_v41  ;;  %v902_v48 = vmul.f32 %v5899_v27, %v888_v43 }
 0x178   : > { %v6829_v49 = vpop.eup %6828  ;;  %v903_v53 = vmul.f32 %v5899_v27, %v889_v45 }
 0x179   : > { %v6831_v50 = vpop.eup %6830  ;;  %6208 = vmatprep.mubr.msk.bf16.mxu1 %vm787_vm1, %v921_v36  ;;  %v916_v52 = vadd.f32 %v5900_v28, %v902_v48  ;;  %v890_v29 = vmul.f32 %v6829_v49, %v7398_v47 }
 0x17a   : > { %v891_v54 = vmul.f32 %v6831_v50, %v7406_v56  ;;  %v917_v37 = vadd.f32 %v5900_v28, %v903_v53  ;;  %v7117_v56 = vmov 0.0  }
 0x17b   : > { %v922_v55 = vpack.c.bf16 %v916_v52, %v915_v51  ;;  %v904_v58 = vmul.f32 %v5899_v27, %v890_v29  ;;  %6216 = vmatprep.subr.bf16.mxu1 %v7117_v56  ;;  %6228 = vmatprep.subr.bf16.mxu0 %v7117_v56 }
 0x17c   : > { %v6833_v59 = vpop.eup %6832  ;;  %v905_v61 = vmul.f32 %v5899_v27, %v891_v54  ;;  %6230 = vmatprep.mubr.msk.bf16.mxu0 %vm7118_vm2, %v7117_v56 }
 0x17d   : > { %6209 = vmatmul.mubr.msk.bf16.vlgmr.msra.gmra.mrb[0].mxu1 %vm787_vm1, %v922_v55  ;;  %v918_v46 = vadd.f32 %v5900_v28, %v904_v58  ;;  %v892_v60 = vmul.f32 %v6833_v59, %v7408_v57  ;;  %v5901_v57 = vld [vmem:[%s8647_s26] ss:$0 sm:$0xff]  ;;  %s7127_s26 = smov 104  }
 0x17e   : > { %v919_v0 = vadd.f32 %v5900_v28, %v905_v61 }
 0x17f   : > { %v923_v62 = vpack.c.bf16 %v918_v46, %v917_v37  ;;  %v906_v63 = vmul.f32 %v5899_v27, %v892_v60  ;;  %v7540_v46 = vld [vmem:[%s8648_s3] sm:$0xff] }
 0x181   : > { %6212 = vmatprep.mubr.msk.bf16.mxu1 %vm787_vm1, %v923_v62  ;;  %v920_v47 = vadd.f32 %v5900_v28, %v906_v63 }
 0x183   : > { %v924_v1 = vpack.c.bf16 %v920_v47, %v919_v0 }
 0x185   : > { %6213 = vmatmul.mubr.msk.bf16.gmra.mrb[4].mxu1 %vm787_vm1, %v924_v1 }
 0x186   : > { %6218 = vmatprep.mubr.msk.bf16.mxu1 %vm7118_vm2, %v7117_v56 }
 0x250   : > { %v6210_v2 = vpop.f32.mrb[0].mxu1 }
 0x251   : > { %v994_v3 = vpop.f32.mrb[1].mxu1  ;;  %v1003_v9 = vadd.f32 %v6210_v2, %v5901_v57 }
 0x252   : > { %v995_v4 = vadd.f32 %v5901_v57, %v994_v3  ;;  %v6211_v5 = vpop.f32.mrb[2].mxu1 }
 0x253   : > { %v997_v6 = vpop.f32.mrb[3].mxu1  ;;  %v7459_v13 = vpack.c.bf16 %v1003_v9, %v1003_v9  ;;  %v1006_v14 = vadd.f32 %v6211_v5, %v5901_v57 }
 0x254   : > { %v7453_v7 = vpack.c.bf16 %v995_v4, %v995_v4  ;;  %v998_v8 = vadd.f32 %v5901_v57, %v997_v6 }
 0x255   : > { %v7464_v20 = vpack.c.bf16 %v1006_v14, %v1006_v14 }
 0x256   : > { %v7455_v10 = vpack.c.bf16 %v998_v8, %v998_v8  ;;  %1034 = vrot.lane.b32.xlu0 %v7453_v7, %s7119_s1 }
 0x258   : > { %1084 = vrot.lane.b32.xlu1 %v7455_v10, %s7119_s1  ;;  %v6214_v11 = vpop.f32.mrb[4].mxu1 }
 0x259   : > { %v1010_v12 = vpop.f32.mrb[5].mxu1  ;;  %v1019_v18 = vadd.f32 %v6214_v11, %v5901_v57 }
 0x25a   : > { %v1011_v15 = vadd.f32 %v5901_v57, %v1010_v12  ;;  %v6215_v16 = vpop.f32.mrb[6].mxu1 }
 0x25b   : > { %v1013_v17 = vpop.f32.mrb[7].mxu1  ;;  %v7467_v22 = vpack.c.bf16 %v1019_v18, %v1019_v18  ;;  %v1022_v23 = vadd.f32 %v6215_v16, %v5901_v57 }
 0x25c   : > { %v7461_v19 = vpack.c.bf16 %v1011_v15, %v1011_v15  ;;  %1133 = vrot.lane.b32.xlu1 %v7459_v13, %s7119_s1  ;;  %v1014_v21 = vadd.f32 %v5901_v57, %v1013_v17 }
 0x25d   : > { %v7474_v25 = vpack.c.bf16 %v1022_v23, %v1022_v23 }
 0x25e   : > { %1231 = vrot.lane.b32.xlu0 %v7461_v19, %s7119_s1  ;;  %v7470_v24 = vpack.c.bf16 %v1014_v21, %v1014_v21 }
 0x260   : > { %1182 = vrot.lane.b32.xlu1 %v7464_v20, %s7119_s1 }
 0x262   : > { %1329 = vrot.lane.b32.xlu0 %v7467_v22, %s7119_s1 }
 0x264   : > { %1280 = vrot.lane.b32.xlu1 %v7470_v24, %s7119_s1 }
 0x266   : > { %1538 = vrot.lane.b32.xlu0 %v7453_v7, %s7120_s25 }
 0x268   : > { %1378 = vrot.lane.b32.xlu1 %v7474_v25, %s7119_s1  ;;  %s7128_s1 = smov 72  }
 0x26c   : > { %1587 = vrot.lane.b32.xlu1 %v7455_v10, %s7120_s25 }
 0x270   : > { %1635 = vrot.lane.b32.xlu1 %v7459_v13, %s7120_s25 }
 0x274   : > { %1683 = vrot.lane.b32.xlu1 %v7464_v20, %s7120_s25 }
 0x2c8   : > { %v1035_v26 = vpop.permute.xlu0 %1034 }
 0x2c9   : > { %v1041_v27 = vsel %vm1036_vm3, %v1035_v26, 0 }
 0x2ca   : > { %v1085_v30 = vpop.permute.xlu1 %1084  ;;  %6217 = vmatpush3.bf16.xpose.msra.mxu1 %v1041_v27 }
 0x2cb   : > { %6222 = vmatprep.subr.bf16.mxu1 %v7117_v56  ;;  %v1090_v33 = vsel %vm1036_vm3, %v1085_v30, 0 }
 0x2ce   : > { %v1134_v31 = vpop.permute.xlu1 %1133 }
 0x2cf   : > { %v1139_v32 = vsel %vm1036_vm3, %v1134_v31, 0 }
 0x2d0   : > { %6229 = vmatpush3.bf16.xpose.msra.mxu0 %v1139_v32  ;;  %v1232_v34 = vpop.permute.xlu0 %1231 }
 0x2d1   : > { %6219 = vmatmul.mubr.msk.bf16.vlgmr.msra.gmra.mrb[8].mxu1 %vm1036_vm3, %v7453_v7  ;;  %6240 = vmatprep.subr.bf16.mxu0 %v7117_v56  ;;  %v1237_v35 = vsel %vm1036_vm3, %v1232_v34, 0 }
 0x2d2   : > { %6223 = vmatpush3.bf16.xpose.msra.mxu1 %v1090_v33  ;;  %6224 = vmatprep.mubr.msk.bf16.mxu1 %vm7118_vm2, %v7117_v56  ;;  %v1183_v28 = vpop.permute.xlu1 %1182 }
 0x2d3   : > { %6234 = vmatprep.subr.bf16.mxu1 %v7117_v56  ;;  %v1188_v38 = vsel %vm1036_vm3, %v1183_v28, 0 }
 0x2d4   : > { %v1330_v39 = vpop.permute.xlu0 %1329 }
 0x2d5   : > { %v1335_v41 = vsel %vm1036_vm3, %v1330_v39, 0 }
 0x2d6   : > { %v1281_v40 = vpop.permute.xlu1 %1280 }
 0x2d7   : > { %6231 = vmatmul.mubr.msk.bf16.vlgmr.msra.gmra.mrb[0].mxu0 %vm1036_vm3, %v7459_v13  ;;  %v1286_v42 = vsel %vm1036_vm3, %v1281_v40, 0 }
 0x2d8   : > { %6241 = vmatpush3.bf16.xpose.msra.mxu0 %v1237_v35  ;;  %6242 = vmatprep.mubr.msk.bf16.mxu0 %vm7118_vm2, %v7117_v56  ;;  %v1539_v43 = vpop.permute.xlu0 %1538 }
 0x2d9   : > { %6225 = vmatmul.mubr.msk.bf16.vlgmr.msra.gmra.mrb[12].mxu1 %vm1036_vm3, %v7455_v10  ;;  %6252 = vmatprep.subr.bf16.mxu0 %v7117_v56  ;;  %v1545_v45 = vsel %vm1543_vm4, %v1539_v43, 0 }
 0x2da   : > { %6235 = vmatpush3.bf16.xpose.msra.mxu1 %v1188_v38  ;;  %6236 = vmatprep.mubr.msk.bf16.mxu1 %vm7118_vm2, %v7117_v56  ;;  %v1379_v44 = vpop.permute.xlu1 %1378 }
 0x2db   : > { %6246 = vmatprep.subr.bf16.mxu1 %v7117_v56  ;;  %v1384_v36 = vsel %vm1036_vm3, %v1379_v44, 0 }
 0x2de   : > { %v1588_v48 = vpop.permute.xlu1 %1587 }
 0x2df   : > { %6243 = vmatmul.mubr.msk.bf16.vlgmr.msra.gmra.mrb[4].mxu0 %vm1036_vm3, %v7461_v19  ;;  %v1593_v49 = vsel %vm1543_vm4, %v1588_v48, 0 }
 0x2e0   : > { %6253 = vmatpush3.bf16.xpose.msra.mxu0 %v1335_v41  ;;  %6254 = vmatprep.mubr.msk.bf16.mxu0 %vm7118_vm2, %v7117_v56 }
 0x2e1   : > { %6237 = vmatmul.mubr.msk.bf16.vlgmr.msra.gmra.mrb[16].mxu1 %vm1036_vm3, %v7464_v20  ;;  %6264 = vmatprep.subr.bf16.mxu0 %v7117_v56 }
 0x2e2   : > { %6247 = vmatpush3.bf16.xpose.msra.mxu1 %v1286_v42  ;;  %6248 = vmatprep.mubr.msk.bf16.mxu1 %vm7118_vm2, %v7117_v56 }
 0x2e3   : > { %6258 = vmatprep.subr.bf16.mxu1 %v7117_v56 }
 0x2e7   : > { %6255 = vmatmul.mubr.msk.bf16.vlgmr.msra.gmra.mrb[8].mxu0 %vm1036_vm3, %v7467_v22 }
 0x2e8   : > { %6265 = vmatpush3.bf16.msra.mxu0 %v1545_v45  ;;  %6266 = vmatprep.mubr.msk.bf16.mxu0 %vm7118_vm2, %v7117_v56 }
 0x2e9   : > { %6249 = vmatmul.mubr.msk.bf16.vlgmr.msra.gmra.mrb[20].mxu1 %vm1036_vm3, %v7470_v24  ;;  %6276 = vmatprep.subr.bf16.mxu0 %v7117_v56 }
 0x2ea   : > { %6259 = vmatpush3.bf16.xpose.msra.mxu1 %v1384_v36  ;;  %6260 = vmatprep.mubr.msk.bf16.mxu1 %vm7118_vm2, %v7117_v56 }
 0x2eb   : > { %6270 = vmatprep.subr.bf16.mxu1 %v7117_v56 }
 0x2f1   : > { %6261 = vmatmul.mubr.msk.bf16.vlgmr.msra.gmra.mrb[24].mxu1 %vm1036_vm3, %v7474_v25 }
 0x2f2   : > { %6271 = vmatpush3.bf16.msra.mxu1 %v1593_v49  ;;  %6272 = vmatprep.mubr.msk.bf16.mxu1 %vm7118_vm2, %v7117_v56 }
 0x2f3   : > { %6282 = vmatprep.subr.bf16.mxu1 %v7117_v56 }
 0x3a4   : > { %v1077_v50 = vpop.f32.mrb[8].mxu1 }
 0x3a5   : > { %v6220_v51 = vpop.f32.mrb[9].mxu1  ;;  %v1426_v54 = vmul.f32 0.35355338, %v1077_v50 }
 0x3a6   : > { %v1080_v52 = vpop.f32.mrb[10].mxu1 }
 0x3a7   : > { %v6221_v29 = vpop.f32.mrb[11].mxu1  ;;  %v1434_v2 = vadd.f32 %v1426_v54, %v7540_v46  ;;  %v7568_v52 = vpop.permute.xlu1 %1635 }
 0x3a9   : > { %v1442_v8 = vsel %vm1036_vm3, %v1434_v2, -inf }
 0x3aa   : > { %v1175_v53 = vpop.f32.mrb[0].mxu0 }
 0x3ab   : > { %v1428_v55 = vmul.f32 0.35355338, %v1175_v53  ;;  %v6232_v58 = vpop.f32.mrb[1].mxu0  ;;  %v7570_v29 = vpop.permute.xlu1 %1683 }
 0x3ac   : > { %v1126_v59 = vpop.f32.mrb[12].mxu1  ;;  %v1178_v37 = vpop.f32.mrb[2].mxu0 }
 0x3ad   : > { %v1427_v60 = vmul.f32 0.35355338, %v1126_v59  ;;  %v6226_v61 = vpop.f32.mrb[13].mxu1  ;;  %v6233_v62 = vpop.f32.mrb[3].mxu0  ;;  %v1436_v63 = vadd.f32 %v1428_v55, %v7540_v46 }
 0x3ae   : > { %v1129_v0 = vpop.f32.mrb[14].mxu1 }
 0x3af   : > { %v6227_v47 = vpop.f32.mrb[15].mxu1  ;;  %v1448_v1 = vsel %vm1036_vm3, %v1436_v63, -inf  ;;  %v1435_v57 = vadd.f32 %v1427_v60, %v7540_v46 }
 0x3b0   : > { %1449 = vmax.xlane.f32.xlu0 %v1448_v1 }
 0x3b1   : > { %v1445_v3 = vsel %vm1036_vm3, %v1435_v57, -inf }
 0x3b2   : > { %1446 = vmax.xlane.f32.xlu1 %v1445_v3  ;;  %v1273_v4 = vpop.f32.mrb[4].mxu0 }
 0x3b3   : > { %v1430_v5 = vmul.f32 0.35355338, %v1273_v4  ;;  %v6244_v6 = vpop.f32.mrb[5].mxu0 }
 0x3b4   : > { %1443 = vmax.xlane.f32.xlu0 %v1442_v8  ;;  %v1224_v9 = vpop.f32.mrb[16].mxu1  ;;  %v1276_v11 = vpop.f32.mrb[6].mxu0 }
 0x3b5   : > { %v1429_v12 = vmul.f32 0.35355338, %v1224_v9  ;;  %v6238_v14 = vpop.f32.mrb[17].mxu1  ;;  %v6245_v15 = vpop.f32.mrb[7].mxu0  ;;  %v1438_v16 = vadd.f32 %v1430_v5, %v7540_v46 }
 0x3b6   : > { %v1227_v17 = vpop.f32.mrb[18].mxu1 }
 0x3b7   : > { %v6239_v18 = vpop.f32.mrb[19].mxu1  ;;  %v1454_v21 = vsel %vm1036_vm3, %v1438_v16, -inf  ;;  %v7551_v23 = vadd.f32 %v1429_v12, %v7540_v46 }
 0x3b8   : > { %1455 = vmax.xlane.f32.xlu0 %v1454_v21 }
 0x3b9   : > { %v1451_v31 = vsel %vm1036_vm3, %v7551_v23, -inf }
 0x3ba   : > { %v1371_v26 = vpop.f32.mrb[8].mxu0 }
 0x3bb   : > { %v1432_v27 = vmul.f32 0.35355338, %v1371_v26  ;;  %v6256_v30 = vpop.f32.mrb[9].mxu0 }
 0x3bc   : > { %v1322_v32 = vpop.f32.mrb[20].mxu1  ;;  %1452 = vmax.xlane.f32.xlu0 %v1451_v31  ;;  %v1374_v33 = vpop.f32.mrb[10].mxu0 }
 0x3bd   : > { %v6250_v34 = vpop.f32.mrb[21].mxu1  ;;  %v6257_v28 = vpop.f32.mrb[11].mxu0  ;;  %v1440_v35 = vadd.f32 %v1432_v27, %v7540_v46  ;;  %v1431_v45 = vmul.f32 0.35355338, %v1322_v32 }
 0x3be   : > { %v1325_v38 = vpop.f32.mrb[22].mxu1 }
 0x3bf   : > { %v6251_v39 = vpop.f32.mrb[23].mxu1  ;;  %v1460_v40 = vsel %vm1036_vm3, %v1440_v35, -inf  ;;  %v1439_v48 = vadd.f32 %v1431_v45, %v7540_v46 }
 0x3c0   : > { %1461 = vmax.xlane.f32.xlu0 %v1460_v40 }
 0x3c1   : > { %v1457_v49 = vsel %vm1036_vm3, %v1439_v48, -inf }
 0x3c3   : > { %1779 = vrot.lane.b32.xlu1 %v7470_v24, %s7120_s25 }
 0x3c4   : > { %v1420_v41 = vpop.f32.mrb[24].mxu1 }
 0x3c5   : > { %v6262_v42 = vpop.f32.mrb[25].mxu1  ;;  %v1433_v36 = vmul.f32 0.35355338, %v1420_v41 }
 0x3c6   : > { %v1423_v43 = vpop.f32.mrb[26].mxu1 }
 0x3c7   : > { %v6263_v44 = vpop.f32.mrb[27].mxu1  ;;  %v7564_v50 = vadd.f32 %v1433_v36, %v7540_v46 }
 0x3c9   : > { %v1463_v51 = vsel %vm1036_vm3, %v7564_v50, -inf }
 0x3d6   : > { %1731 = vrot.lane.b32.xlu0 %v7461_v19, %s7120_s25 }
 0x3e7   : > { %1458 = vmax.xlane.f32.xlu1 %v1457_v49 }
 0x3eb   : > { %1464 = vmax.xlane.f32.xlu1 %v1463_v51  ;;  %v1689_v51 = vsel %vm1543_vm4, %v7570_v29, 0 }
 0x43d   : > { %v1450_v53 = vpop.xlane.xlu0 %1449 }
 0x43e   : > { %v1468_v54 = vsub.f32 %v1436_v63, %v1450_v53 }
 0x43f   : > { %v1447_v55 = vpop.xlane.xlu1 %1446 }
 0x440   : > { %v1478_v58 = vmul.f32 1.442695, %v1468_v54  ;;  %v1467_v59 = vsub.f32 %v1435_v57, %v1447_v55  ;;  %v1641_v55 = vsel %vm1543_vm4, %v7568_v52, 0 }
 0x441   : > { %v1444_v37 = vpop.xlane.xlu0 %1443 }
 0x442   : > { %6834 = vpow2.f32 %v1478_v58  ;;  %v1476_v60 = vmul.f32 1.442695, %v1467_v59  ;;  %v1466_v61 = vsub.f32 %v1434_v2, %v1444_v37 }
 0x443   : > { %v7593_v12 = vpop.permute.xlu1 %1779 }
 0x444   : > { %6836 = vpow2.f32 %v1476_v60  ;;  %v1474_v62 = vmul.f32 1.442695, %v1466_v61 }
 0x445   : > { %v1456_v0 = vpop.xlane.xlu0 %1455 }
 0x446   : > { %6838 = vpow2.f32 %v1474_v62  ;;  %v1470_v47 = vsub.f32 %v1438_v16, %v1456_v0 }
 0x448   : > { %v1482_v1 = vmul.f32 1.442695, %v1470_v47 }
 0x449   : > { %v1453_v9 = vpop.xlane.xlu0 %1452 }
 0x44a   : > { %6840 = vpow2.f32 %v1482_v1  ;;  %v1469_v11 = vsub.f32 %v7551_v23, %v1453_v9 }
 0x44c   : > { %v7572_v3 = vpop.eup %6834  ;;  %v1480_v15 = vmul.f32 1.442695, %v1469_v11 }
 0x44d   : > { %v1496_v4 = vsel %vm1036_vm3, %v7572_v3, 0.0  ;;  %v1462_v14 = vpop.xlane.xlu0 %1461 }
 0x44e   : > { %v7576_v63 = vpop.eup %6836  ;;  %1497 = vadd.xlane.f32.xlu0 %v1496_v4  ;;  %v1472_v17 = vsub.f32 %v1440_v35, %v1462_v14  ;;  %6842 = vpow2.f32 %v1480_v15 }
 0x44f   : > { %v1493_v57 = vsel %vm1036_vm3, %v7576_v63, 0.0 }
 0x450   : > { %v7580_v5 = vpop.eup %6838  ;;  %1494 = vadd.xlane.f32.xlu1 %v1493_v57  ;;  %v1486_v26 = vmul.f32 1.442695, %v1472_v17 }
 0x451   : > { %v1490_v2 = vsel %vm1036_vm3, %v7580_v5, 0.0  ;;  %v1732_v40 = vpop.permute.xlu0 %1731 }
 0x452   : > { %1491 = vadd.xlane.f32.xlu0 %v1490_v2  ;;  %v1737_v37 = vsel %vm1543_vm4, %v1732_v40, 0 }
 0x454   : > { %v7584_v6 = vpop.eup %6840 }
 0x455   : > { %v1502_v8 = vsel %vm1036_vm3, %v7584_v6, 0.0 }
 0x456   : > { %1503 = vadd.xlane.f32.xlu0 %v1502_v8  ;;  %v1785_v8 = vsel %vm1543_vm4, %v7593_v12, 0 }
 0x458   : > { %v7595_v27 = vpop.eup %6842 }
 0x459   : > { %v1499_v30 = vsel %vm1036_vm3, %v7595_v27, 0.0 }
 0x461   : > { %1875 = vrot.lane.b32.xlu1 %v7474_v25, %s7120_s25 }
 0x46c   : > { %1827 = vrot.lane.b32.xlu0 %v7467_v22, %s7120_s25  ;;  %s7129_s25 = smov 40  }
 0x474   : > { %v1459_v16 = vpop.xlane.xlu1 %1458 }
 0x475   : > { %v1471_v18 = vsub.f32 %v1439_v48, %v1459_v16 }
 0x477   : > { %v1484_v21 = vmul.f32 1.442695, %v1471_v18 }
 0x478   : > { %v1465_v34 = vpop.xlane.xlu1 %1464 }
 0x479   : > { %6844 = vpow2.f32 %v1484_v21  ;;  %v1473_v28 = vsub.f32 %v7564_v50, %v1465_v34 }
 0x47a   : > { %6846 = vpow2.f32 %v1486_v26 }
 0x47b   : > { %v1488_v35 = vmul.f32 1.442695, %v1473_v28 }
 0x47d   : > { %6848 = vpow2.f32 %v1488_v35 }
 0x483   : > { %v7599_v31 = vpop.eup %6844 }
 0x484   : > { %v7601_v23 = vpop.eup %6846  ;;  %v1505_v32 = vsel %vm1036_vm3, %v7599_v31, 0.0 }
 0x485   : > { %1500 = vadd.xlane.f32.xlu1 %v1499_v30  ;;  %v1508_v33 = vsel %vm1036_vm3, %v7601_v23, 0.0 }
 0x487   : > { %v7616_v38 = vpop.eup %6848 }
 0x488   : > { %v1511_v39 = vsel %vm1036_vm3, %v7616_v38, 0.0 }
 0x489   : > { %1506 = vadd.xlane.f32.xlu1 %v1505_v32 }
 0x48b   : > { %1509 = vadd.xlane.f32.xlu0 %v1508_v33 }
 0x49a   : > { %1980 = vrot.lane.b32.xlu1 %v7455_v10, %s7121_s6 }
 0x4a1   : > { %1930 = vrot.lane.b32.xlu0 %v7453_v7, %s7121_s6 }
 0x4a5   : > { %1928 = vrot.lane.b32.xlu0 %v7453_v7, %s7122_s16 }
 0x4a9   : > { %2030 = vrot.lane.b32.xlu0 %v7459_v13, %s7121_s6 }
 0x4ad   : > { %2028 = vrot.lane.b32.xlu0 %v7459_v13, %s7122_s16 }
 0x4b1   : > { %2130 = vrot.lane.b32.xlu0 %v7461_v19, %s7121_s6 }
 0x4b5   : > { %2128 = vrot.lane.b32.xlu0 %v7461_v19, %s7122_s16 }
 0x4b9   : > { %2230 = vrot.lane.b32.xlu0 %v7467_v22, %s7121_s6 }
 0x4bd   : > { %2228 = vrot.lane.b32.xlu0 %v7467_v22, %s7122_s16 }
 0x4be   : > { %1512 = vadd.xlane.f32.xlu1 %v1511_v39 }
 0x4cf   : > { %1978 = vrot.lane.b32.xlu1 %v7455_v10, %s7122_s16 }
 0x4d3   : > { %2080 = vrot.lane.b32.xlu1 %v7464_v20, %s7121_s6 }
 0x4d7   : > { %2078 = vrot.lane.b32.xlu1 %v7464_v20, %s7122_s16 }
 0x4db   : > { %2180 = vrot.lane.b32.xlu1 %v7470_v24, %s7121_s6  ;;  %v1498_v41 = vpop.xlane.xlu0 %1497 }
 0x4dd   : > { %v1495_v42 = vpop.xlane.xlu1 %1494 }
 0x4de   : > { %6850 = vrcp.f32 %v1495_v42 }
 0x4df   : > { %2178 = vrot.lane.b32.xlu1 %v7470_v24, %s7122_s16  ;;  %v1492_v43 = vpop.xlane.xlu0 %1491 }
 0x4e0   : > { %6852 = vrcp.f32 %v1492_v43 }
 0x4e1   : > { %6854 = vrcp.f32 %v1498_v41  ;;  %v1876_v0 = vpop.permute.xlu1 %1875 }
 0x4e2   : > { %v1881_v18 = vsel %vm1543_vm4, %v1876_v0, 0 }
 0x4e3   : > { %2280 = vrot.lane.b32.xlu1 %v7474_v25, %s7121_s6  ;;  %v1504_v45 = vpop.xlane.xlu0 %1503 }
 0x4e4   : > { %6856 = vrcp.f32 %v1504_v45 }
 0x4e7   : > { %2278 = vrot.lane.b32.xlu1 %v7474_v25, %s7122_s16  ;;  %v1828_v60 = vpop.permute.xlu0 %1827  ;;  %s8650_s16 = scalar_lea.vmem %s8588_s8, %s7298_s22  ;;  %s8651_s22 = sld [smem:[#allocation9_spill]] }
 0x4e8   : > { %v6851_v44 = vpop.eup %6850  ;;  %v1833_v62 = vsel %vm1543_vm4, %v1828_v60, 0 }
 0x4e9   : > { %v1523_v36 = vmul.f32 %v6851_v44, %v7576_v63 }
 0x4ea   : > { %v6853_v48 = vpop.eup %6852 }
 0x4eb   : > { %v1531_v49 = vpack.c.bf16 %v1523_v36, %v1523_v36  ;;  %v1522_v50 = vmul.f32 %v6853_v48, %v7580_v5  ;;  %v6855_v54 = vpop.eup %6854 }
 0x4ec   : > { %v1524_v29 = vmul.f32 %v6855_v54, %v7572_v3 }
 0x4ed   : > { %6273 = vmatmul.mubr.msk.bf16.vlgmr.msra.gmra.mrb[28].mxu1 %vm1036_vm3, %v1531_v49  ;;  %v1530_v53 = vpack.c.bf16 %v1522_v50, %v1522_v50  ;;  %p6007_p1 = scmp.ne.s32.totalorder %s8651_s22, 1 }
 0x4ee   : > { %6283 = vmatpush3.bf16.msra.mxu1 %v1689_v51  ;;  %6284 = vmatprep.mubr.msk.bf16.mxu1 %vm7118_vm2, %v7117_v56  ;;  %v1532_v58 = vpack.c.bf16 %v1524_v29, %v1524_v29  ;;  %v6857_v59 = vpop.eup %6856  ;;  %s8652_s0 = sld [smem:[#allocation26_spill]] (!%p6007_p1)  ;;  %s8654_s21 = sld [smem:[#allocation24_spill]] (!%p6007_p1) }
 0x4ef   : > { %6267 = vmatmul.mubr.msk.bf16.vlgmr.msra.gmra.mrb[12].mxu0 %vm1036_vm3, %v1530_v53  ;;  %6294 = vmatprep.subr.bf16.mxu1 %v7117_v56  ;;  %v1526_v52 = vmul.f32 %v6857_v59, %v7584_v6  ;;  %s8655_s6 = sld [smem:[#allocation25_spill]] (!%p6007_p1) }
 0x4f0   : > { %6277 = vmatpush3.bf16.msra.mxu0 %v1641_v55  ;;  %6278 = vmatprep.mubr.msk.bf16.mxu0 %vm7118_vm2, %v7117_v56 }
 0x4f1   : > { %6288 = vmatprep.subr.bf16.mxu0 %v7117_v56  ;;  %v1534_v61 = vpack.c.bf16 %v1526_v52, %v1526_v52 }
 0x4f7   : > { %6279 = vmatmul.mubr.msk.bf16.vlgmr.msra.gmra.mrb[16].mxu0 %vm1036_vm3, %v1532_v58 }
 0x4f8   : > { %6289 = vmatpush3.bf16.msra.mxu0 %v1737_v37  ;;  %6290 = vmatprep.mubr.msk.bf16.mxu0 %vm7118_vm2, %v7117_v56 }
 0x4f9   : > { %6300 = vmatprep.subr.bf16.mxu0 %v7117_v56 }
 0x4ff   : > { %6291 = vmatmul.mubr.msk.bf16.vlgmr.msra.gmra.mrb[20].mxu0 %vm1036_vm3, %v1534_v61 }
 0x500   : > { %6301 = vmatpush3.bf16.msra.mxu0 %v1833_v62  ;;  %6302 = vmatprep.mubr.msk.bf16.mxu0 %vm7118_vm2, %v7117_v56 }
 0x501   : > { %6312 = vmatprep.subr.bf16.mxu0 %v7117_v56 }
 0x512   : > { %v1501_v47 = vpop.xlane.xlu1 %1500 }
 0x513   : > { %6858 = vrcp.f32 %v1501_v47 }
 0x516   : > { %v1507_v1 = vpop.xlane.xlu1 %1506 }
 0x517   : > { %6860 = vrcp.f32 %v1507_v1 }
 0x518   : > { %v1510_v3 = vpop.xlane.xlu0 %1509 }
 0x519   : > { %6862 = vrcp.f32 %v1510_v3 }
 0x51a   : > { %v1981_v33 = vpop.permute.xlu1 %1980 }
 0x51b   : > { %v1986_v43 = vsel %vm1036_vm3, %v1981_v33, 0 }
 0x51c   : > { %v1931_v4 = vpop.permute.xlu0 %1930 }
 0x51d   : > { %v6859_v63 = vpop.eup %6858  ;;  %v1936_v17 = vsel %vm1036_vm3, %v1931_v4, 0 }
 0x51e   : > { %v1525_v57 = vmul.f32 %v6859_v63, %v7595_v27 }
 0x520   : > { %v1929_v5 = vpop.permute.xlu0 %1928  ;;  %v1533_v2 = vpack.c.bf16 %v1525_v57, %v1525_v57 }
 0x521   : > { %v6861_v6 = vpop.eup %6860 }
 0x522   : > { %6285 = vmatmul.mubr.msk.bf16.vlgmr.msra.gmra.mrb[32].mxu1 %vm1036_vm3, %v1533_v2  ;;  %v1527_v14 = vmul.f32 %v6861_v6, %v7599_v31 }
 0x523   : > { %v6863_v9 = vpop.eup %6862  ;;  %6295 = vmatpush3.bf16.msra.mxu1 %v1785_v8  ;;  %6296 = vmatprep.mubr.msk.bf16.mxu1 %vm7118_vm2, %v7117_v56 }
 0x524   : > { %v1528_v11 = vmul.f32 %v6863_v9, %v7601_v23  ;;  %6306 = vmatprep.subr.bf16.mxu1 %v7117_v56  ;;  %v2031_v15 = vpop.permute.xlu0 %2030  ;;  %v1535_v12 = vpack.c.bf16 %v1527_v14, %v1527_v14 }
 0x525   : > { %v2036_v26 = vsel %vm1036_vm3, %v2031_v15, 0 }
 0x526   : > { %v1536_v16 = vpack.c.bf16 %v1528_v11, %v1528_v11 }
 0x528   : > { %6303 = vmatmul.mubr.msk.bf16.vlgmr.msra.gmra.mrb[24].mxu0 %vm1036_vm3, %v1536_v16  ;;  %v2029_v21 = vpop.permute.xlu0 %2028 }
 0x529   : > { %6313 = vmatpush3.bf16.xpose.msra.mxu0 %v1936_v17  ;;  %6314 = vmatprep.mubr.msk.bf16.mxu0 %vm7118_vm2, %v7117_v56 }
 0x52a   : > { %6297 = vmatmul.mubr.msk.bf16.vlgmr.msra.gmra.mrb[36].mxu1 %vm1036_vm3, %v1535_v12  ;;  %6324 = vmatprep.subr.bf16.mxu0 %v7117_v56 }
 0x52b   : > { %6307 = vmatpush3.bf16.msra.mxu1 %v1881_v18  ;;  %6308 = vmatprep.mubr.msk.bf16.mxu1 %vm7118_vm2, %v7117_v56 }
 0x52c   : > { %6318 = vmatprep.subr.bf16.mxu1 %v7117_v56  ;;  %v2131_v27 = vpop.permute.xlu0 %2130 }
 0x52d   : > { %v2136_v31 = vsel %vm1036_vm3, %v2131_v27, 0 }
 0x530   : > { %6315 = vmatmul.mubr.msk.bf16.vlgmr.msra.gmra.mrb[28].mxu0 %vm1036_vm3, %v1929_v5  ;;  %v2129_v30 = vpop.permute.xlu0 %2128 }
 0x531   : > { %6325 = vmatpush3.bf16.xpose.msra.mxu0 %v2036_v26  ;;  %6326 = vmatprep.mubr.msk.bf16.mxu0 %vm7118_vm2, %v7117_v56 }
 0x532   : > { %6336 = vmatprep.subr.bf16.mxu0 %v7117_v56 }
 0x534   : > { %v2231_v23 = vpop.permute.xlu0 %2230 }
 0x535   : > { %v2236_v32 = vsel %vm1036_vm3, %v2231_v23, 0 }
 0x538   : > { %6327 = vmatmul.mubr.msk.bf16.vlgmr.msra.gmra.mrb[32].mxu0 %vm1036_vm3, %v2029_v21  ;;  %v2229_v34 = vpop.permute.xlu0 %2228 }
 0x539   : > { %6337 = vmatpush3.bf16.xpose.msra.mxu0 %v2136_v31  ;;  %6338 = vmatprep.mubr.msk.bf16.mxu0 %vm7118_vm2, %v7117_v56 }
 0x53a   : > { %6348 = vmatprep.subr.bf16.mxu0 %v7117_v56 }
 0x540   : > { %6339 = vmatmul.mubr.msk.bf16.vlgmr.msra.gmra.mrb[36].mxu0 %vm1036_vm3, %v2129_v30 }
 0x541   : > { %6349 = vmatpush3.bf16.xpose.msra.mxu0 %v2236_v32  ;;  %6350 = vmatprep.mubr.msk.bf16.mxu0 %vm7118_vm2, %v7117_v56 }
 0x542   : > { %6360 = vmatprep.subr.bf16.mxu0 %v7117_v56 }
 0x548   : > { %6351 = vmatmul.mubr.msk.bf16.vlgmr.msra.gmra.mrb[40].mxu0 %vm1036_vm3, %v2229_v34 }
 0x549   : > { %6362 = vmatprep.mubr.msk.bf16.mxu0 %vm7118_vm2, %v7117_v56 }
 0x54b   : > { %v1513_v28 = vpop.xlane.xlu1 %1512 }
 0x54c   : > { %6864 = vrcp.f32 %v1513_v28 }
 0x54f   : > { %v1979_v35 = vpop.permute.xlu1 %1978 }
 0x553   : > { %v2081_v41 = vpop.permute.xlu1 %2080 }
 0x554   : > { %v2086_v45 = vsel %vm1036_vm3, %v2081_v41, 0 }
 0x556   : > { %v6865_v39 = vpop.eup %6864 }
 0x557   : > { %v1529_v40 = vmul.f32 %v6865_v39, %v7616_v38  ;;  %v2079_v44 = vpop.permute.xlu1 %2078 }
 0x559   : > { %v1537_v42 = vpack.c.bf16 %v1529_v40, %v1529_v40 }
 0x55b   : > { %6309 = vmatmul.mubr.msk.bf16.vlgmr.msra.gmra.mrb[40].mxu1 %vm1036_vm3, %v1537_v42  ;;  %v2181_v36 = vpop.permute.xlu1 %2180 }
 0x55c   : > { %6319 = vmatpush3.bf16.xpose.msra.mxu1 %v1986_v43  ;;  %6320 = vmatprep.mubr.msk.bf16.mxu1 %vm7118_vm2, %v7117_v56  ;;  %v2186_v48 = vsel %vm1036_vm3, %v2181_v36, 0 }
 0x55d   : > { %6330 = vmatprep.subr.bf16.mxu1 %v7117_v56 }
 0x55f   : > { %v2179_v38 = vpop.permute.xlu1 %2178 }
 0x563   : > { %6321 = vmatmul.mubr.msk.bf16.vlgmr.msra.gmra.mrb[44].mxu1 %vm1036_vm3, %v1979_v35  ;;  %v2281_v49 = vpop.permute.xlu1 %2280 }
 0x564   : > { %6331 = vmatpush3.bf16.xpose.msra.mxu1 %v2086_v45  ;;  %6332 = vmatprep.mubr.msk.bf16.mxu1 %vm7118_vm2, %v7117_v56  ;;  %v2286_v50 = vsel %vm1036_vm3, %v2281_v49, 0 }
 0x565   : > { %6342 = vmatprep.subr.bf16.mxu1 %v7117_v56 }
 0x567   : > { %v2279_v51 = vpop.permute.xlu1 %2278 }
 0x56b   : > { %6333 = vmatmul.mubr.msk.bf16.vlgmr.msra.gmra.mrb[48].mxu1 %vm1036_vm3, %v2079_v44 }
 0x56c   : > { %6343 = vmatpush3.bf16.xpose.msra.mxu1 %v2186_v48  ;;  %6344 = vmatprep.mubr.msk.bf16.mxu1 %vm7118_vm2, %v7117_v56 }
 0x56d   : > { %6354 = vmatprep.subr.bf16.mxu1 %v7117_v56 }
 0x573   : > { %6345 = vmatmul.mubr.msk.bf16.vlgmr.msra.gmra.mrb[52].mxu1 %vm1036_vm3, %v2179_v38 }
 0x574   : > { %6355 = vmatpush3.bf16.xpose.msra.mxu1 %v2286_v50  ;;  %6356 = vmatprep.mubr.msk.bf16.mxu1 %vm7118_vm2, %v7117_v56 }
 0x575   : > { %6366 = vmatprep.subr.bf16.mxu1 %v7117_v56 }
 0x57b   : > { %6357 = vmatmul.mubr.msk.bf16.vlgmr.msra.gmra.mrb[56].mxu1 %vm1036_vm3, %v2279_v51 }
 0x57c   : > { %6368 = vmatprep.mubr.msk.bf16.mxu1 %vm7118_vm2, %v7117_v56 }
 0x5c0   : > { %v7715_v53 = vpop.f32.mrb[28].mxu1 }
 0x5c1   : > { %v6274_v54 = vpop.f32.mrb[29].mxu1 }
 0x5c2   : > { %v7717_v55 = vpop.f32.mrb[12].mxu0  ;;  %v1632_v29 = vpop.f32.mrb[30].mxu1 }
 0x5c3   : > { %v1923_v58 = vpack.c.bf16 %v7715_v53, %v7717_v55  ;;  %v6268_v59 = vpop.f32.mrb[13].mxu0  ;;  %v6275_v37 = vpop.f32.mrb[31].mxu1 }
 0x5c4   : > { %v1584_v52 = vpop.f32.mrb[14].mxu0 }
 0x5c5   : > { %v6269_v60 = vpop.f32.mrb[15].mxu0 }
 0x5ca   : > { %v7721_v61 = vpop.f32.mrb[16].mxu0 }
 0x5cb   : > { %v6280_v62 = vpop.f32.mrb[17].mxu0 }
 0x5cc   : > { %v1680_v0 = vpop.f32.mrb[18].mxu0 }
 0x5cd   : > { %v6281_v47 = vpop.f32.mrb[19].mxu0 }
 0x5d2   : > { %v7723_v1 = vpop.f32.mrb[20].mxu0 }
 0x5d3   : > { %v6292_v3 = vpop.f32.mrb[21].mxu0 }
 0x5d4   : > { %v1776_v4 = vpop.f32.mrb[22].mxu0 }
 0x5d5   : > { %v6293_v63 = vpop.f32.mrb[23].mxu0 }
 0x5f5   : > { %v7725_v57 = vpop.f32.mrb[32].mxu1 }
 0x5f6   : > { %v1924_v5 = vpack.c.bf16 %v7725_v57, %v7721_v61  ;;  %v6286_v2 = vpop.f32.mrb[33].mxu1 }
 0x5f7   : > { %v1728_v6 = vpop.f32.mrb[34].mxu1 }
 0x5f8   : > { %v6287_v8 = vpop.f32.mrb[35].mxu1 }
 0x5fb   : > { %v7729_v9 = vpop.f32.mrb[24].mxu0 }
 0x5fc   : > { %v6304_v11 = vpop.f32.mrb[25].mxu0 }
 0x5fd   : > { %v7731_v14 = vpop.f32.mrb[36].mxu1  ;;  %v1872_v15 = vpop.f32.mrb[26].mxu0 }
 0x5fe   : > { %v1925_v16 = vpack.c.bf16 %v7731_v14, %v7723_v1  ;;  %v6298_v17 = vpop.f32.mrb[37].mxu1  ;;  %v6305_v12 = vpop.f32.mrb[27].mxu0 }
 0x5ff   : > { %v1824_v18 = vpop.f32.mrb[38].mxu1 }
 0x600   : > { %v6299_v21 = vpop.f32.mrb[39].mxu1 }
 0x603   : > { %v1972_v26 = vpop.f32.mrb[28].mxu0 }
 0x604   : > { %v2328_v27 = vmul.f32 0.35355338, %v1972_v26  ;;  %v6316_v30 = vpop.f32.mrb[29].mxu0 }
 0x605   : > { %v1975_v31 = vpop.f32.mrb[30].mxu0 }
 0x606   : > { %v6317_v23 = vpop.f32.mrb[31].mxu0  ;;  %v7736_v32 = vadd.f32 %v2328_v27, %v7540_v46 }
 0x608   : > { %v2344_v33 = vsel %vm1036_vm3, %v7736_v32, -inf }
 0x609   : > { %2345 = vmax.xlane.f32.xlu0 %v2344_v33 }
 0x60b   : > { %v2072_v34 = vpop.f32.mrb[32].mxu0 }
 0x60c   : > { %v2330_v28 = vmul.f32 0.35355338, %v2072_v34  ;;  %v6328_v35 = vpop.f32.mrb[33].mxu0 }
 0x60d   : > { %v2075_v39 = vpop.f32.mrb[34].mxu0 }
 0x60e   : > { %v6329_v40 = vpop.f32.mrb[35].mxu0  ;;  %v7741_v41 = vadd.f32 %v2330_v28, %v7540_v46 }
 0x610   : > { %v2350_v42 = vsel %vm1036_vm3, %v7741_v41, -inf }
 0x611   : > { %2351 = vmax.xlane.f32.xlu0 %v2350_v42 }
 0x613   : > { %v2172_v43 = vpop.f32.mrb[36].mxu0 }
 0x614   : > { %v6340_v44 = vpop.f32.mrb[37].mxu0  ;;  %v2332_v2 = vmul.f32 0.35355338, %v2172_v43 }
 0x615   : > { %v2175_v45 = vpop.f32.mrb[38].mxu0 }
 0x616   : > { %v6341_v36 = vpop.f32.mrb[39].mxu0  ;;  %v2340_v21 = vadd.f32 %v2332_v2, %v7540_v46 }
 0x618   : > { %v2356_v31 = vsel %vm1036_vm3, %v2340_v21, -inf }
 0x61b   : > { %v2272_v38 = vpop.f32.mrb[40].mxu0 }
 0x61c   : > { %v6352_v48 = vpop.f32.mrb[41].mxu0  ;;  %v2334_v12 = vmul.f32 0.35355338, %v2272_v38 }
 0x61d   : > { %v2275_v49 = vpop.f32.mrb[42].mxu0 }
 0x61e   : > { %v6353_v50 = vpop.f32.mrb[43].mxu0  ;;  %v2342_v23 = vadd.f32 %v2334_v12, %v7540_v46 }
 0x620   : > { %v2362_v39 = vsel %vm1036_vm3, %v2342_v23, -inf }
 0x62e   : > { %v7745_v51 = vpop.f32.mrb[40].mxu1 }
 0x62f   : > { %v1926_v54 = vpack.c.bf16 %v7745_v51, %v7729_v9  ;;  %v6310_v29 = vpop.f32.mrb[41].mxu1 }
 0x630   : > { %v1920_v59 = vpop.f32.mrb[42].mxu1 }
 0x631   : > { %v6311_v37 = vpop.f32.mrb[43].mxu1 }
 0x636   : > { %v2022_v52 = vpop.f32.mrb[44].mxu1 }
 0x637   : > { %v2329_v60 = vmul.f32 0.35355338, %v2022_v52  ;;  %v6322_v62 = vpop.f32.mrb[45].mxu1 }
 0x638   : > { %v2025_v0 = vpop.f32.mrb[46].mxu1 }
 0x639   : > { %v6323_v47 = vpop.f32.mrb[47].mxu1  ;;  %v2337_v3 = vadd.f32 %v2329_v60, %v7540_v46 }
 0x63b   : > { %v2347_v4 = vsel %vm1036_vm3, %v2337_v3, -inf }
 0x63c   : > { %2348 = vmax.xlane.f32.xlu1 %v2347_v4 }
 0x63e   : > { %v2122_v63 = vpop.f32.mrb[48].mxu1 }
 0x63f   : > { %v2331_v6 = vmul.f32 0.35355338, %v2122_v63  ;;  %v6334_v8 = vpop.f32.mrb[49].mxu1 }
 0x640   : > { %v2125_v11 = vpop.f32.mrb[50].mxu1 }
 0x641   : > { %v6335_v15 = vpop.f32.mrb[51].mxu1  ;;  %v7752_v17 = vadd.f32 %v2331_v6, %v7540_v46 }
 0x643   : > { %v2353_v18 = vsel %vm1036_vm3, %v7752_v17, -inf }
 0x644   : > { %2354 = vmax.xlane.f32.xlu0 %v2353_v18 }
 0x646   : > { %v2222_v26 = vpop.f32.mrb[52].mxu1 }
 0x647   : > { %v2333_v27 = vmul.f32 0.35355338, %v2222_v26  ;;  %v6346_v30 = vpop.f32.mrb[53].mxu1 }
 0x648   : > { %v2225_v33 = vpop.f32.mrb[54].mxu1  ;;  %2357 = vmax.xlane.f32.xlu0 %v2356_v31 }
 0x649   : > { %v6347_v34 = vpop.f32.mrb[55].mxu1  ;;  %v7760_v28 = vadd.f32 %v2333_v27, %v7540_v46 }
 0x64b   : > { %v2359_v35 = vsel %vm1036_vm3, %v7760_v28, -inf }
 0x64c   : > { %2360 = vmax.xlane.f32.xlu1 %v2359_v35  ;;  %2363 = vmax.xlane.f32.xlu0 %v2362_v39 }
 0x64e   : > { %v2322_v40 = vpop.f32.mrb[56].mxu1 }
 0x64f   : > { %v6358_v42 = vpop.f32.mrb[57].mxu1  ;;  %v2335_v45 = vmul.f32 0.35355338, %v2322_v40 }
 0x650   : > { %v2325_v43 = vpop.f32.mrb[58].mxu1 }
 0x651   : > { %v6359_v44 = vpop.f32.mrb[59].mxu1  ;;  %v7772_v36 = vadd.f32 %v2335_v45, %v7540_v46 }
 0x653   : > { %v2365_v38 = vsel %vm1036_vm3, %v7772_v36, -inf }
 0x65d   : > { %2488 = vrot.lane.b32.xlu1 %v7455_v10, %s7123_s24 }
 0x661   : > { %2536 = vrot.lane.b32.xlu1 %v7459_v13, %s7123_s24 }
 0x662   : > { %2440 = vrot.lane.b32.xlu0 %v7453_v7, %s7123_s24 }
 0x685   : > { %2366 = vmax.xlane.f32.xlu1 %v2365_v38 }
 0x696   : > { %2584 = vrot.lane.b32.xlu1 %v7464_v20, %s7123_s24  ;;  %v2346_v48 = vpop.xlane.xlu0 %2345 }
 0x697   : > { %v2368_v49 = vsub.f32 %v7736_v32, %v2346_v48 }
 0x699   : > { %v2376_v50 = vmul.f32 1.442695, %v2368_v49 }
 0x69b   : > { %6866 = vpow2.f32 %v2376_v50 }
 0x69e   : > { %v2352_v29 = vpop.xlane.xlu0 %2351 }
 0x69f   : > { %v2370_v59 = vsub.f32 %v7741_v41, %v2352_v29 }
 0x6a1   : > { %v2380_v37 = vmul.f32 1.442695, %v2370_v59 }
 0x6a3   : > { %6868 = vpow2.f32 %v2380_v37 }
 0x6a5   : > { %v7780_v52 = vpop.eup %6866 }
 0x6a6   : > { %v2392_v46 = vsel %vm1036_vm3, %v7780_v52, 0.0 }
 0x6a7   : > { %2393 = vadd.xlane.f32.xlu0 %v2392_v46 }
 0x6ad   : > { %v7784_v60 = vpop.eup %6868 }
 0x6ae   : > { %v2398_v62 = vsel %vm1036_vm3, %v7784_v60, 0.0 }
 0x6af   : > { %2399 = vadd.xlane.f32.xlu0 %v2398_v62 }
 0x6c5   : > { %2632 = vrot.lane.b32.xlu0 %v7461_v19, %s7123_s24 }
 0x6c9   : > { %v2349_v32 = vpop.xlane.xlu1 %2348 }
 0x6ca   : > { %v2369_v0 = vsub.f32 %v2337_v3, %v2349_v32 }
 0x6cc   : > { %v2378_v41 = vmul.f32 1.442695, %v2369_v0 }
 0x6ce   : > { %6870 = vpow2.f32 %v2378_v41 }
 0x6d1   : > { %v2355_v47 = vpop.xlane.xlu0 %2354 }
 0x6d2   : > { %v2371_v34 = vsub.f32 %v7752_v17, %v2355_v47 }
 0x6d4   : > { %v2382_v35 = vmul.f32 1.442695, %v2371_v34 }
 0x6d5   : > { %v2358_v4 = vpop.xlane.xlu0 %2357 }
 0x6d6   : > { %v2372_v63 = vsub.f32 %v2340_v21, %v2358_v4 }
 0x6d8   : > { %v7790_v2 = vpop.eup %6870  ;;  %v2384_v6 = vmul.f32 1.442695, %v2372_v63 }
 0x6d9   : > { %v2361_v8 = vpop.xlane.xlu1 %2360  ;;  %v2364_v11 = vpop.xlane.xlu0 %2363  ;;  %v2395_v15 = vsel %vm1036_vm3, %v7790_v2, 0.0 }
 0x6da   : > { %6872 = vpow2.f32 %v2384_v6  ;;  %v2374_v12 = vsub.f32 %v2342_v23, %v2364_v11  ;;  %2396 = vadd.xlane.f32.xlu1 %v2395_v15  ;;  %v2373_v39 = vsub.f32 %v7760_v28, %v2361_v8 }
 0x6dc   : > { %v2388_v18 = vmul.f32 1.442695, %v2374_v12  ;;  %v2386_v40 = vmul.f32 1.442695, %v2373_v39 }
 0x6dd   : > { %v2489_v26 = vpop.permute.xlu1 %2488  ;;  %v2441_v27 = vpop.permute.xlu0 %2440 }
 0x6de   : > { %v2494_v3 = vsel %vm1543_vm4, %v2489_v26, 0  ;;  %v2446_v30 = vsel %vm1543_vm4, %v2441_v27, 0  ;;  %6874 = vpow2.f32 %v2388_v18 }
 0x6df   : > { %6361 = vmatpush3.bf16.msra.mxu0 %v2446_v30  ;;  %6367 = vmatpush3.bf16.msra.mxu1 %v2494_v3  ;;  %6876 = vpow2.f32 %v2382_v35 }
 0x6e0   : > { %6372 = vmatprep.subr.bf16.mxu0 %v7117_v56  ;;  %6378 = vmatprep.subr.bf16.mxu1 %v7117_v56  ;;  %6878 = vpow2.f32 %v2386_v40 }
 0x6e1   : > { %v2537_v17 = vpop.permute.xlu1 %2536 }
 0x6e2   : > { %v2542_v62 = vsel %vm1543_vm4, %v2537_v17, 0 }
 0x6e4   : > { %v7798_v21 = vpop.eup %6872 }
 0x6e5   : > { %v2404_v31 = vsel %vm1036_vm3, %v7798_v21, 0.0 }
 0x6e6   : > { %2405 = vadd.xlane.f32.xlu0 %v2404_v31 }
 0x6e8   : > { %v7802_v23 = vpop.eup %6874 }
 0x6e9   : > { %v2410_v33 = vsel %vm1036_vm3, %v7802_v23, 0.0  ;;  %v7816_v42 = vpop.eup %6876 }
 0x6ea   : > { %2411 = vadd.xlane.f32.xlu0 %v2410_v33  ;;  %v2401_v28 = vsel %vm1036_vm3, %v7816_v42, 0.0  ;;  %v7822_v43 = vpop.eup %6878 }
 0x6eb   : > { %2680 = vrot.lane.b32.xlu1 %v7470_v24, %s7123_s24  ;;  %v2407_v45 = vsel %vm1036_vm3, %v7822_v43, 0.0 }
 0x700   : > { %2728 = vrot.lane.b32.xlu0 %v7467_v22, %s7123_s24 }
 0x704   : > { %2991 = vrot.lane.b32.xlu0 %v7453_v7, %s7124_s28 }
 0x708   : > { %3041 = vrot.lane.b32.xlu0 %v7455_v10, %s7124_s28 }
 0x70c   : > { %3091 = vrot.lane.b32.xlu0 %v7459_v13, %s7124_s28 }
 0x70f   : > { %2402 = vadd.xlane.f32.xlu1 %v2401_v28 }
 0x710   : > { %3141 = vrot.lane.b32.xlu0 %v7464_v20, %s7124_s28 }
 0x712   : > { %v2367_v44 = vpop.xlane.xlu1 %2366 }
 0x713   : > { %v2375_v38 = vsub.f32 %v7772_v36, %v2367_v44  ;;  %2408 = vadd.xlane.f32.xlu1 %v2407_v45 }
 0x714   : > { %3191 = vrot.lane.b32.xlu0 %v7461_v19, %s7124_s28 }
 0x715   : > { %v2390_v48 = vmul.f32 1.442695, %v2375_v38 }
 0x717   : > { %6880 = vpow2.f32 %v2390_v48 }
 0x718   : > { %3189 = vrot.lane.b32.xlu0 %v7461_v19, %s7125_s19 }
 0x71c   : > { %3291 = vrot.lane.b32.xlu0 %v7467_v22, %s7124_s28 }
 0x720   : > { %3289 = vrot.lane.b32.xlu0 %v7467_v22, %s7125_s19 }
 0x721   : > { %v7835_v49 = vpop.eup %6880 }
 0x722   : > { %v2413_v36 = vsel %vm1036_vm3, %v7835_v49, 0.0 }
 0x723   : > { %2414 = vadd.xlane.f32.xlu1 %v2413_v36 }
 0x734   : > { %2776 = vrot.lane.b32.xlu1 %v7474_v25, %s7123_s24  ;;  %v2394_v50 = vpop.xlane.xlu0 %2393 }
 0x735   : > { %6882 = vrcp.f32 %v2394_v50 }
 0x738   : > { %2989 = vrot.lane.b32.xlu1 %v7453_v7, %s7125_s19 }
 0x73c   : > { %3039 = vrot.lane.b32.xlu1 %v7455_v10, %s7125_s19  ;;  %v2400_v29 = vpop.xlane.xlu0 %2399 }
 0x73d   : > { %6884 = vrcp.f32 %v2400_v29 }
 0x73f   : > { %v6883_v59 = vpop.eup %6882 }
 0x740   : > { %3089 = vrot.lane.b32.xlu1 %v7459_v13, %s7125_s19  ;;  %v2424_v37 = vmul.f32 %v6883_v59, %v7780_v52  ;;  %v2633_v0 = vpop.permute.xlu0 %2632 }
 0x741   : > { %v2638_v47 = vsel %vm1543_vm4, %v2633_v0, 0 }
 0x742   : > { %v2432_v46 = vpack.c.bf16 %v2424_v37, %v2424_v37 }
 0x744   : > { %3139 = vrot.lane.b32.xlu1 %v7464_v20, %s7125_s19  ;;  %6363 = vmatmul.mubr.msk.bf16.vlgmr.msra.gmra.mrb[44].mxu0 %vm1036_vm3, %v2432_v46 }
 0x745   : > { %6373 = vmatpush3.bf16.msra.mxu0 %v2542_v62  ;;  %6374 = vmatprep.mubr.msk.bf16.mxu0 %vm7118_vm2, %v7117_v56 }
 0x746   : > { %6384 = vmatprep.subr.bf16.mxu0 %v7117_v56 }
 0x747   : > { %v6885_v32 = vpop.eup %6884 }
 0x748   : > { %3241 = vrot.lane.b32.xlu1 %v7470_v24, %s7124_s28  ;;  %v2426_v52 = vmul.f32 %v6885_v32, %v7784_v60  ;;  %v2585_v60 = vpop.permute.xlu1 %2584 }
 0x749   : > { %v2590_v15 = vsel %vm1543_vm4, %v2585_v60, 0 }
 0x74a   : > { %v2434_v41 = vpack.c.bf16 %v2426_v52, %v2426_v52 }
 0x74c   : > { %3239 = vrot.lane.b32.xlu1 %v7470_v24, %s7125_s19  ;;  %6375 = vmatmul.mubr.msk.bf16.vlgmr.msra.gmra.mrb[48].mxu0 %vm1036_vm3, %v2434_v41 }
 0x74d   : > { %6385 = vmatpush3.bf16.msra.mxu0 %v2638_v47  ;;  %6386 = vmatprep.mubr.msk.bf16.mxu0 %vm7118_vm2, %v7117_v56 }
 0x74e   : > { %6396 = vmatprep.subr.bf16.mxu0 %v7117_v56 }
 0x750   : > { %3341 = vrot.lane.b32.xlu1 %v7474_v25, %s7124_s28 }
 0x754   : > { %3339 = vrot.lane.b32.xlu1 %v7474_v25, %s7125_s19 }
 0x767   : > { %v2397_v4 = vpop.xlane.xlu1 %2396 }
 0x768   : > { %6886 = vrcp.f32 %v2397_v4 }
 0x76b   : > { %v2681_v34 = vpop.permute.xlu1 %2680 }
 0x76c   : > { %v2686_v44 = vsel %vm1543_vm4, %v2681_v34, 0 }
 0x772   : > { %v6887_v63 = vpop.eup %6886 }
 0x773   : > { %v2406_v6 = vpop.xlane.xlu0 %2405  ;;  %v2425_v8 = vmul.f32 %v6887_v63, %v7790_v2 }
 0x774   : > { %6888 = vrcp.f32 %v2406_v6 }
 0x775   : > { %v2433_v11 = vpack.c.bf16 %v2425_v8, %v2425_v8  ;;  %v2828_v8 = vld [vmem:[%s7326_s18 + $0x4] sm:$0xf] }
 0x777   : > { %6369 = vmatmul.mubr.msk.bf16.vlgmr.msra.gmra.mrb[60].mxu1 %vm1036_vm3, %v2433_v11  ;;  %v2412_v12 = vpop.xlane.xlu0 %2411 }
 0x778   : > { %6379 = vmatpush3.bf16.msra.mxu1 %v2590_v15  ;;  %6380 = vmatprep.mubr.msk.bf16.mxu1 %vm7118_vm2, %v7117_v56  ;;  %6890 = vrcp.f32 %v2412_v12 }
 0x779   : > { %6390 = vmatprep.subr.bf16.mxu1 %v7117_v56 }
 0x77b   : > { %v2729_v27 = vpop.permute.xlu0 %2728 }
 0x77c   : > { %v2734_v30 = vsel %vm1543_vm4, %v2729_v27, 0 }
 0x77e   : > { %v6889_v18 = vpop.eup %6888 }
 0x77f   : > { %v2428_v26 = vmul.f32 %v6889_v18, %v7798_v21  ;;  %v2842_v18 = vsel %vm1543_vm4, %v2828_v8, 0 }
 0x781   : > { %v2436_v3 = vpack.c.bf16 %v2428_v26, %v2428_v26  ;;  %v1927_v26 = vld [vmem:[%s7326_s18] sm:$0xf] }
 0x782   : > { %v6891_v2 = vpop.eup %6890 }
 0x783   : > { %6387 = vmatmul.mubr.msk.bf16.vlgmr.msra.gmra.mrb[52].mxu0 %vm1036_vm3, %v2436_v3  ;;  %v2430_v31 = vmul.f32 %v6891_v2, %v7802_v23 }
 0x784   : > { %6397 = vmatpush3.bf16.msra.mxu0 %v2734_v30  ;;  %6398 = vmatprep.mubr.msk.bf16.mxu0 %vm7118_vm2, %v7117_v56 }
 0x785   : > { %v2438_v33 = vpack.c.bf16 %v2430_v31, %v2430_v31  ;;  %6716 = vmatprep.subr.msk.bf16.mxu0 %vm1543_vm4, %v2828_v8 }
 0x78b   : > { %6399 = vmatmul.mubr.msk.bf16.vlgmr.msra.gmra.mrb[56].mxu0 %vm1036_vm3, %v2438_v33 }
 0x78c   : > { %6409 = vmatpush3.bf16.msra.mxu0 %v2842_v18 }
 0x78d   : > { %6717 = vmatprep.subr.msk.bf16.mxu0 %vm1543_vm4, %v1927_v26 }
 0x79c   : > { %v2403_v35 = vpop.xlane.xlu1 %2402 }
 0x79d   : > { %6892 = vrcp.f32 %v2403_v35 }
 0x7a0   : > { %v2409_v21 = vpop.xlane.xlu1 %2408 }
 0x7a1   : > { %6894 = vrcp.f32 %v2409_v21 }
 0x7a7   : > { %v6893_v39 = vpop.eup %6892 }
 0x7a8   : > { %v2427_v40 = vmul.f32 %v6893_v39, %v7816_v42 }
 0x7aa   : > { %v2435_v17 = vpack.c.bf16 %v2427_v40, %v2427_v40 }
 0x7ab   : > { %v6895_v28 = vpop.eup %6894 }
 0x7ac   : > { %6381 = vmatmul.mubr.msk.bf16.vlgmr.msra.gmra.mrb[64].mxu1 %vm1036_vm3, %v2435_v17  ;;  %v2429_v23 = vmul.f32 %v6895_v28, %v7822_v43  ;;  %v2992_v43 = vpop.permute.xlu0 %2991 }
 0x7ad   : > { %6391 = vmatpush3.bf16.msra.mxu1 %v2686_v44  ;;  %6392 = vmatprep.mubr.msk.bf16.mxu1 %vm7118_vm2, %v7117_v56  ;;  %v2997_v59 = vsel %vm1036_vm3, %v2992_v43, 0 }
 0x7ae   : > { %6402 = vmatprep.subr.bf16.mxu1 %v7117_v56  ;;  %v2437_v38 = vpack.c.bf16 %v2429_v23, %v2429_v23 }
 0x7b0   : > { %v2415_v45 = vpop.xlane.xlu1 %2414  ;;  %v3042_v46 = vpop.permute.xlu0 %3041 }
 0x7b1   : > { %6896 = vrcp.f32 %v2415_v45  ;;  %v3047_v32 = vsel %vm1036_vm3, %v3042_v46, 0 }
 0x7b4   : > { %6393 = vmatmul.mubr.msk.bf16.vlgmr.msra.gmra.mrb[68].mxu1 %vm1036_vm3, %v2437_v38  ;;  %v2777_v42 = vpop.permute.xlu1 %2776 }
 0x7b5   : > { %v2782_v48 = vsel %vm1543_vm4, %v2777_v42, 0  ;;  %6404 = vmatprep.mubr.msk.bf16.mxu1 %vm7118_vm2, %v7117_v56 }
 0x7b6   : > { %6403 = vmatpush3.bf16.msra.mxu1 %v2782_v48 }
 0x7b7   : > { %6428 = vmatprep.subr.bf16.mxu1 %v7117_v56 }
 0x7b8   : > { %v2990_v37 = vpop.permute.xlu1 %2989 }
 0x7bb   : > { %v6897_v36 = vpop.eup %6896 }
 0x7bc   : > { %v2431_v50 = vmul.f32 %v6897_v36, %v7835_v49  ;;  %v3040_v62 = vpop.permute.xlu1 %3039  ;;  %v3092_v49 = vpop.permute.xlu0 %3091 }
 0x7bd   : > { %v3097_v0 = vsel %vm1036_vm3, %v3092_v49, 0 }
 0x7be   : > { %v2439_v29 = vpack.c.bf16 %v2431_v50, %v2431_v50 }
 0x7c0   : > { %6405 = vmatmul.mubr.msk.bf16.vlgmr.msra.gmra.mrb[72].mxu1 %vm1036_vm3, %v2439_v29  ;;  %v3090_v52 = vpop.permute.xlu1 %3089  ;;  %v3142_v47 = vpop.permute.xlu0 %3141 }
 0x7c1   : > { %6429 = vmatpush3.bf16.xpose.msra.mxu1 %v2997_v59  ;;  %6430 = vmatprep.mubr.msk.bf16.mxu1 %vm7118_vm2, %v7117_v56  ;;  %v3147_v60 = vsel %vm1036_vm3, %v3142_v47, 0 }
 0x7c2   : > { %6434 = vmatprep.subr.bf16.mxu1 %v7117_v56 }
 0x7c4   : > { %v3140_v41 = vpop.permute.xlu1 %3139  ;;  %v3192_v8 = vpop.permute.xlu0 %3191 }
 0x7c8   : > { %6431 = vmatmul.mubr.msk.bf16.vlgmr.msra.gmra.mrb[76].mxu1 %vm1036_vm3, %v2990_v37  ;;  %v3242_v4 = vpop.permute.xlu1 %3241  ;;  %v2922_v37 = vsel %vm1543_vm4, %v1927_v26, 0  ;;  %v3197_v26 = vsel %vm1036_vm3, %v3192_v8, 0 }
 0x7c9   : > { %6435 = vmatpush3.bf16.xpose.msra.mxu1 %v3047_v32  ;;  %6436 = vmatprep.mubr.msk.bf16.mxu1 %vm7118_vm2, %v7117_v56  ;;  %v3247_v6 = vsel %vm1036_vm3, %v3242_v4, 0 }
 0x7ca   : > { %6440 = vmatprep.subr.bf16.mxu1 %v7117_v56 }
 0x7cc   : > { %v3240_v63 = vpop.permute.xlu1 %3239 }
 0x7d0   : > { %6437 = vmatmul.mubr.msk.bf16.vlgmr.msra.gmra.mrb[80].mxu1 %vm1036_vm3, %v3040_v62  ;;  %v3342_v11 = vpop.permute.xlu1 %3341 }
 0x7d1   : > { %6441 = vmatpush3.bf16.xpose.msra.mxu1 %v3097_v0  ;;  %6442 = vmatprep.mubr.msk.bf16.mxu1 %vm7118_vm2, %v7117_v56  ;;  %v3347_v15 = vsel %vm1036_vm3, %v3342_v11, 0 }
 0x7d2   : > { %6446 = vmatprep.subr.bf16.mxu1 %v7117_v56 }
 0x7d4   : > { %v3340_v12 = vpop.permute.xlu1 %3339 }
 0x7d8   : > { %6443 = vmatmul.mubr.msk.bf16.vlgmr.msra.gmra.mrb[84].mxu1 %vm1036_vm3, %v3090_v52 }
 0x7d9   : > { %6447 = vmatpush3.bf16.xpose.msra.mxu1 %v3147_v60  ;;  %6448 = vmatprep.mubr.msk.bf16.mxu1 %vm7118_vm2, %v7117_v56 }
 0x7da   : > { %6458 = vmatprep.subr.bf16.mxu1 %v7117_v56 }
 0x7e0   : > { %6449 = vmatmul.mubr.msk.bf16.vlgmr.msra.gmra.mrb[88].mxu1 %vm1036_vm3, %v3140_v41 }
 0x7e1   : > { %6459 = vmatpush3.bf16.xpose.msra.mxu1 %v3247_v6  ;;  %6460 = vmatprep.mubr.msk.bf16.mxu1 %vm7118_vm2, %v7117_v56 }
 0x7e2   : > { %6470 = vmatprep.subr.bf16.mxu1 %v7117_v56 }
 0x7e8   : > { %6461 = vmatmul.mubr.msk.bf16.vlgmr.msra.gmra.mrb[92].mxu1 %vm1036_vm3, %v3240_v63 }
 0x7e9   : > { %6471 = vmatpush3.bf16.xpose.msra.mxu1 %v3347_v15  ;;  %6472 = vmatprep.mubr.msk.bf16.mxu1 %vm7118_vm2, %v7117_v56 }
 0x7ea   : > { %6482 = vmatprep.subr.bf16.mxu1 %v7117_v56 }
 0x7f0   : > { %6473 = vmatmul.mubr.msk.bf16.vlgmr.msra.gmra.mrb[96].mxu1 %vm1036_vm3, %v3340_v12 }
 0x7f1   : > { %6484 = vmatprep.mubr.msk.bf16.mxu1 %vm7118_vm2, %v7117_v56 }
 0x817   : > { %v2482_v27 = vpop.f32.mrb[44].mxu0 }
 0x818   : > { %v6364_v3 = vpop.f32.mrb[45].mxu0 }
 0x819   : > { %v2485_v2 = vpop.f32.mrb[46].mxu0 }
 0x81a   : > { %v6365_v30 = vpop.f32.mrb[47].mxu0 }
 0x81f   : > { %v2578_v31 = vpop.f32.mrb[48].mxu0 }
 0x820   : > { %v6376_v33 = vpop.f32.mrb[49].mxu0 }
 0x821   : > { %v2581_v34 = vpop.f32.mrb[50].mxu0 }
 0x822   : > { %v6377_v35 = vpop.f32.mrb[51].mxu0 }
 0x84a   : > { %v2530_v21 = vpop.f32.mrb[60].mxu1 }
 0x84b   : > { %v2824_v39 = vpack.c.bf16 %v2530_v21, %v2482_v27  ;;  %v6370_v40 = vpop.f32.mrb[61].mxu1  ;;  %v7949_v27 = vld [vmem:[%s8648_s3] sm:$0xff] }
 0x84c   : > { %v2533_v17 = vpop.f32.mrb[62].mxu1 }
 0x84d   : > { %v6371_v28 = vpop.f32.mrb[63].mxu1  ;;  %6410 = vmatprep.mubr.msk.bf16.mxu0 %vm1036_vm3, %v2824_v39 }
 0x856   : > { %v2674_v44 = vpop.f32.mrb[52].mxu0 }
 0x857   : > { %v6388_v23 = vpop.f32.mrb[53].mxu0 }
 0x858   : > { %v2677_v45 = vpop.f32.mrb[54].mxu0 }
 0x859   : > { %v6389_v38 = vpop.f32.mrb[55].mxu0 }
 0x85e   : > { %v2770_v42 = vpop.f32.mrb[56].mxu0 }
 0x85f   : > { %v6400_v48 = vpop.f32.mrb[57].mxu0 }
 0x860   : > { %v2773_v36 = vpop.f32.mrb[58].mxu0 }
 0x861   : > { %v6401_v50 = vpop.f32.mrb[59].mxu0 }
 0x87f   : > { %v2626_v43 = vpop.f32.mrb[64].mxu1 }
 0x880   : > { %v2825_v29 = vpack.c.bf16 %v2626_v43, %v2578_v31  ;;  %v6382_v59 = vpop.f32.mrb[65].mxu1  ;;  %v3190_v31 = vpop.permute.xlu0 %3189 }
 0x881   : > { %v2629_v46 = vpop.f32.mrb[66].mxu1 }
 0x882   : > { %v6383_v62 = vpop.f32.mrb[67].mxu1  ;;  %6411 = vmatmul.mubr.msk.bf16.vlgmr.msra.gmra.mrb[60].mxu0 %vm1036_vm3, %v2825_v29 }
 0x883   : > { %6419 = vmatpush3.bf16.msra.mxu0 %v2922_v37 }
 0x884   : > { %6452 = vmatprep.subr.bf16.mxu0 %v7117_v56  ;;  %v3292_v14 = vpop.permute.xlu0 %3291 }
 0x885   : > { %v3297_v21 = vsel %vm1036_vm3, %v3292_v14, 0 }
 0x887   : > { %v2722_v32 = vpop.f32.mrb[68].mxu1 }
 0x888   : > { %v2826_v49 = vpack.c.bf16 %v2722_v32, %v2674_v44  ;;  %v6394_v52 = vpop.f32.mrb[69].mxu1  ;;  %v3290_v28 = vpop.permute.xlu0 %3289 }
 0x889   : > { %v2725_v0 = vpop.f32.mrb[70].mxu1 }
 0x88a   : > { %v6395_v41 = vpop.f32.mrb[71].mxu1  ;;  %6414 = vmatprep.mubr.msk.bf16.mxu0 %vm1036_vm3, %v2826_v49 }
 0x893   : > { %v2818_v47 = vpop.f32.mrb[72].mxu1 }
 0x894   : > { %v2827_v60 = vpack.c.bf16 %v2818_v47, %v2770_v42  ;;  %v6406_v4 = vpop.f32.mrb[73].mxu1 }
 0x895   : > { %v2821_v63 = vpop.f32.mrb[74].mxu1 }
 0x896   : > { %v6407_v6 = vpop.f32.mrb[75].mxu1  ;;  %6415 = vmatmul.mubr.msk.bf16.gmra.mrb[64].mxu0 %vm1036_vm3, %v2827_v60 }
 0x897   : > { %6420 = vmatprep.mubr.msk.bf16.mxu0 %vm1036_vm3, %v1923_v58 }
 0x89b   : > { %v3033_v11 = vpop.f32.mrb[76].mxu1 }
 0x89c   : > { %v3389_v15 = vmul.f32 0.35355338, %v3033_v11  ;;  %v6432_v12 = vpop.f32.mrb[77].mxu1 }
 0x89d   : > { %v3036_v18 = vpop.f32.mrb[78].mxu1 }
 0x89e   : > { %v7952_v3 = vadd.f32 %v7949_v27, %v3389_v15  ;;  %6421 = vmatmul.mubr.msk.bf16.vlgmr.msra.gmra.mrb[60].mxu0 %vm1036_vm3, %v1924_v5  ;;  %v6433_v53 = vpop.f32.mrb[79].mxu1 }
 0x89f   : > { %6453 = vmatpush3.bf16.xpose.msra.mxu0 %v3197_v26  ;;  %6424 = vmatprep.mubr.msk.bf16.mxu0 %vm1036_vm3, %v1925_v16 }
 0x8a0   : > { %v3405_v55 = vsel %vm1036_vm3, %v7952_v3, -inf  ;;  %6464 = vmatprep.subr.bf16.mxu0 %v7117_v56 }
 0x8a1   : > { %3406 = vmax.xlane.f32.xlu0 %v3405_v55 }
 0x8a3   : > { %v3083_v58 = vpop.f32.mrb[80].mxu1 }
 0x8a4   : > { %v3390_v2 = vmul.f32 0.35355338, %v3083_v58  ;;  %v6438_v30 = vpop.f32.mrb[81].mxu1 }
 0x8a5   : > { %v3086_v61 = vpop.f32.mrb[82].mxu1 }
 0x8a6   : > { %v3398_v57 = vadd.f32 %v7949_v27, %v3390_v2  ;;  %6425 = vmatmul.mubr.msk.bf16.gmra.mrb[64].mxu0 %vm1036_vm3, %v1926_v54  ;;  %v6439_v1 = vpop.f32.mrb[83].mxu1 }
 0x8a7   : > { %6454 = vmatprep.mubr.msk.bf16.mxu0 %vm7118_vm2, %v7117_v56 }
 0x8a8   : > { %v3408_v5 = vsel %vm1036_vm3, %v3398_v57, -inf }
 0x8a9   : > { %3409 = vmax.xlane.f32.xlu1 %v3408_v5 }
 0x8ab   : > { %v3133_v16 = vpop.f32.mrb[84].mxu1 }
 0x8ac   : > { %v3391_v33 = vmul.f32 0.35355338, %v3133_v16  ;;  %v6444_v34 = vpop.f32.mrb[85].mxu1 }
 0x8ad   : > { %v3136_v35 = vpop.f32.mrb[86].mxu1 }
 0x8ae   : > { %v7975_v39 = vadd.f32 %v7949_v27, %v3391_v33  ;;  %v6445_v9 = vpop.f32.mrb[87].mxu1  ;;  %6455 = vmatmul.mubr.msk.bf16.vlgmr.msra.gmra.mrb[68].mxu0 %vm1036_vm3, %v3190_v31 }
 0x8af   : > { %6465 = vmatpush3.bf16.xpose.msra.mxu0 %v3297_v21  ;;  %6466 = vmatprep.mubr.msk.bf16.mxu0 %vm7118_vm2, %v7117_v56 }
 0x8b0   : > { %v3411_v51 = vsel %vm1036_vm3, %v7975_v39, -inf  ;;  %6476 = vmatprep.subr.bf16.mxu0 %v7117_v56 }
 0x8b1   : > { %3412 = vmax.xlane.f32.xlu0 %v3411_v51 }
 0x8b3   : > { %v3183_v54 = vpop.f32.mrb[88].mxu1 }
 0x8b4   : > { %v3392_v40 = vmul.f32 0.35355338, %v3183_v54  ;;  %v6450_v17 = vpop.f32.mrb[89].mxu1 }
 0x8b5   : > { %v3186_v44 = vpop.f32.mrb[90].mxu1 }
 0x8b6   : > { %v3400_v23 = vadd.f32 %v7949_v27, %v3392_v40  ;;  %v6451_v45 = vpop.f32.mrb[91].mxu1  ;;  %6467 = vmatmul.mubr.msk.bf16.vlgmr.msra.gmra.mrb[72].mxu0 %vm1036_vm3, %v3290_v28 }
 0x8b7   : > { %6478 = vmatprep.mubr.msk.bf16.mxu0 %vm7118_vm2, %v7117_v56 }
 0x8b8   : > { %v3414_v38 = vsel %vm1036_vm3, %v3400_v23, -inf }
 0x8b9   : > { %3415 = vmax.xlane.f32.xlu0 %v3414_v38 }
 0x8bb   : > { %v3283_v42 = vpop.f32.mrb[92].mxu1 }
 0x8bc   : > { %v3394_v48 = vmul.f32 0.35355338, %v3283_v42  ;;  %v6462_v36 = vpop.f32.mrb[93].mxu1 }
 0x8bd   : > { %v3286_v50 = vpop.f32.mrb[94].mxu1 }
 0x8be   : > { %v3402_v43 = vadd.f32 %v7949_v27, %v3394_v48  ;;  %v6463_v29 = vpop.f32.mrb[95].mxu1 }
 0x8c0   : > { %v3420_v59 = vsel %vm1036_vm3, %v3402_v43, -inf }
 0x8c1   : > { %3421 = vmax.xlane.f32.xlu1 %v3420_v59 }
 0x8c3   : > { %v3383_v37 = vpop.f32.mrb[96].mxu1 }
 0x8c4   : > { %v3396_v46 = vmul.f32 0.35355338, %v3383_v37  ;;  %v6474_v62 = vpop.f32.mrb[97].mxu1 }
 0x8c5   : > { %v3386_v32 = vpop.f32.mrb[98].mxu1 }
 0x8c6   : > { %v3404_v49 = vadd.f32 %v7949_v27, %v3396_v46  ;;  %v6475_v52 = vpop.f32.mrb[99].mxu1 }
 0x8c8   : > { %v3426_v0 = vsel %vm1036_vm3, %v3404_v49, -inf }
 0x8c9   : > { %3427 = vmax.xlane.f32.xlu1 %v3426_v0 }
 0x92e   : > { %v3407_v4 = vpop.xlane.xlu0 %3406 }
 0x92f   : > { %v3429_v14 = vsub.f32 %v7952_v3, %v3407_v4 }
 0x931   : > { %v3437_v16 = vmul.f32 1.442695, %v3429_v14 }
 0x936   : > { %v3410_v41 = vpop.xlane.xlu1 %3409 }
 0x937   : > { %v3430_v47 = vsub.f32 %v3398_v57, %v3410_v41 }
 0x939   : > { %v3439_v60 = vmul.f32 1.442695, %v3430_v47 }
 0x93b   : > { %6898 = vpow2.f32 %v3439_v60 }
 0x93e   : > { %v3413_v63 = vpop.xlane.xlu0 %3412 }
 0x93f   : > { %v3431_v33 = vsub.f32 %v7975_v39, %v3413_v63 }
 0x941   : > { %v3441_v40 = vmul.f32 1.442695, %v3431_v33 }
 0x945   : > { %v7992_v6 = vpop.eup %6898 }
 0x946   : > { %v3416_v8 = vpop.xlane.xlu0 %3415  ;;  %v3456_v11 = vsel %vm1036_vm3, %v7992_v6, 0.0 }
 0x947   : > { %v3432_v15 = vsub.f32 %v3400_v23, %v3416_v8  ;;  %3457 = vadd.xlane.f32.xlu1 %v3456_v11 }
 0x949   : > { %v3443_v12 = vmul.f32 1.442695, %v3432_v15 }
 0x94b   : > { %6900 = vpow2.f32 %v3443_v12 }
 0x94e   : > { %v3422_v18 = vpop.xlane.xlu1 %3421 }
 0x94f   : > { %v3434_v26 = vsub.f32 %v3402_v43, %v3422_v18 }
 0x951   : > { %v3447_v53 = vmul.f32 1.442695, %v3434_v26 }
 0x953   : > { %6902 = vpow2.f32 %v3447_v53 }
 0x955   : > { %v7996_v55 = vpop.eup %6900 }
 0x956   : > { %v3428_v58 = vpop.xlane.xlu1 %3427  ;;  %v3462_v2 = vsel %vm1036_vm3, %v7996_v55, 0.0 }
 0x957   : > { %v3436_v30 = vsub.f32 %v3404_v49, %v3428_v58  ;;  %3463 = vadd.xlane.f32.xlu1 %v3462_v2 }
 0x959   : > { %v3451_v31 = vmul.f32 1.442695, %v3436_v30 }
 0x95b   : > { %6904 = vpow2.f32 %v3451_v31 }
 0x95c   : > { %6906 = vpow2.f32 %v3437_v16 }
 0x95d   : > { %v8000_v61 = vpop.eup %6902  ;;  %6908 = vpow2.f32 %v3441_v40 }
 0x95e   : > { %v3468_v57 = vsel %vm1036_vm3, %v8000_v61, 0.0 }
 0x95f   : > { %3469 = vadd.xlane.f32.xlu1 %v3468_v57 }
 0x965   : > { %v8004_v1 = vpop.eup %6904 }
 0x966   : > { %v3474_v5 = vsel %vm1036_vm3, %v8004_v1, 0.0  ;;  %v8032_v42 = vpop.eup %6906 }
 0x967   : > { %3475 = vadd.xlane.f32.xlu1 %v3474_v5  ;;  %v3453_v48 = vsel %vm1036_vm3, %v8032_v42, 0.0  ;;  %v8038_v36 = vpop.eup %6908 }
 0x968   : > { %v3459_v50 = vsel %vm1036_vm3, %v8038_v36, 0.0 }
 0x978   : > { %3549 = vrot.lane.b32.xlu1 %v7455_v10, %s7126_s23 }
 0x97c   : > { %3597 = vrot.lane.b32.xlu1 %v7459_v13, %s7126_s23 }
 0x980   : > { %3645 = vrot.lane.b32.xlu1 %v7464_v20, %s7126_s23 }
 0x981   : > { %v3233_v34 = vpop.f32.mrb[68].mxu0 }
 0x982   : > { %v3393_v35 = vmul.f32 0.35355338, %v3233_v34  ;;  %v6456_v21 = vpop.f32.mrb[69].mxu0 }
 0x983   : > { %v3236_v9 = vpop.f32.mrb[70].mxu0 }
 0x984   : > { %v8017_v51 = vadd.f32 %v7949_v27, %v3393_v35  ;;  %v6457_v54 = vpop.f32.mrb[71].mxu0  ;;  %3741 = vrot.lane.b32.xlu1 %v7470_v24, %s7126_s23 }
 0x986   : > { %v3417_v3 = vsel %vm1036_vm3, %v8017_v51, -inf }
 0x987   : > { %3418 = vmax.xlane.f32.xlu0 %v3417_v3 }
 0x988   : > { %3837 = vrot.lane.b32.xlu1 %v7474_v25, %s7126_s23 }
 0x989   : > { %v3333_v39 = vpop.f32.mrb[72].mxu0 }
 0x98a   : > { %v3395_v17 = vmul.f32 0.35355338, %v3333_v39  ;;  %v6468_v28 = vpop.f32.mrb[73].mxu0 }
 0x98b   : > { %v3336_v44 = vpop.f32.mrb[74].mxu0 }
 0x98c   : > { %v8026_v23 = vadd.f32 %v7949_v27, %v3395_v17  ;;  %v6469_v45 = vpop.f32.mrb[75].mxu0  ;;  %3978 = vrot.lane.b32.xlu1 %v7453_v7, %s7127_s26 }
 0x98e   : > { %v3423_v38 = vsel %vm1036_vm3, %v8026_v23, -inf }
 0x98f   : > { %3424 = vmax.xlane.f32.xlu0 %v3423_v38 }
 0x990   : > { %4028 = vrot.lane.b32.xlu1 %v7455_v10, %s7127_s26 }
 0x993   : > { %3454 = vadd.xlane.f32.xlu0 %v3453_v48 }
 0x994   : > { %4130 = vrot.lane.b32.xlu1 %v7464_v20, %s7128_s1 }
 0x997   : > { %3460 = vadd.xlane.f32.xlu0 %v3459_v50 }
 0x998   : > { %4128 = vrot.lane.b32.xlu1 %v7464_v20, %s7127_s26 }
 0x99c   : > { %4230 = vrot.lane.b32.xlu1 %v7470_v24, %s7128_s1 }
 0x9a0   : > { %4228 = vrot.lane.b32.xlu1 %v7470_v24, %s7127_s26 }
 0x9a4   : > { %4330 = vrot.lane.b32.xlu1 %v7474_v25, %s7128_s1 }
 0x9a8   : > { %4328 = vrot.lane.b32.xlu1 %v7474_v25, %s7127_s26 }
 0x9ad   : > { %3501 = vrot.lane.b32.xlu0 %v7453_v7, %s7126_s23 }
 0x9b1   : > { %3693 = vrot.lane.b32.xlu0 %v7461_v19, %s7126_s23 }
 0x9d4   : > { %v3458_v43 = vpop.xlane.xlu1 %3457 }
 0x9d5   : > { %6910 = vrcp.f32 %v3458_v43 }
 0x9df   : > { %v6911_v37 = vpop.eup %6910 }
 0x9e0   : > { %v3486_v62 = vmul.f32 %v6911_v37, %v7992_v6 }
 0x9e2   : > { %v3494_v52 = vpack.c.bf16 %v3486_v62, %v3486_v62 }
 0x9e4   : > { %v3464_v29 = vpop.xlane.xlu1 %3463 }
 0x9e5   : > { %6912 = vrcp.f32 %v3464_v29  ;;  %v3889_v29 = vld [vmem:[%s7326_s18 + $0x8] sm:$0xf] }
 0x9ec   : > { %v3470_v59 = vpop.xlane.xlu1 %3469 }
 0x9ed   : > { %6914 = vrcp.f32 %v3470_v59 }
 0x9ef   : > { %v6913_v0 = vpop.eup %6912 }
 0x9f0   : > { %v3488_v47 = vmul.f32 %v6913_v0, %v7996_v55 }
 0x9f2   : > { %v3496_v63 = vpack.c.bf16 %v3488_v47, %v3488_v47  ;;  %v3903_v47 = vsel %vm1543_vm4, %v3889_v29, 0 }
 0x9f4   : > { %v3476_v46 = vpop.xlane.xlu1 %3475 }
 0x9f5   : > { %6916 = vrcp.f32 %v3476_v46 }
 0x9f7   : > { %v6915_v6 = vpop.eup %6914 }
 0x9f8   : > { %v3550_v32 = vpop.permute.xlu1 %3549  ;;  %v3490_v15 = vmul.f32 %v6915_v6, %v8000_v61 }
 0x9f9   : > { %v3555_v49 = vsel %vm1543_vm4, %v3550_v32, 0 }
 0x9fa   : > { %6483 = vmatpush3.bf16.msra.mxu1 %v3555_v49  ;;  %v3498_v18 = vpack.c.bf16 %v3490_v15, %v3490_v15 }
 0x9fb   : > { %6494 = vmatprep.subr.bf16.mxu1 %v7117_v56 }
 0x9fc   : > { %v3598_v41 = vpop.permute.xlu1 %3597 }
 0x9fd   : > { %6485 = vmatmul.mubr.msk.bf16.vlgmr.msra.gmra.mrb[100].mxu1 %vm1036_vm3, %v3494_v52  ;;  %v3603_v39 = vsel %vm1543_vm4, %v3598_v41, 0 }
 0x9fe   : > { %6496 = vmatprep.mubr.msk.bf16.mxu1 %vm7118_vm2, %v7117_v56 }
 0x9ff   : > { %v6917_v26 = vpop.eup %6916 }
 0xa00   : > { %v3646_v60 = vpop.permute.xlu1 %3645  ;;  %v3492_v55 = vmul.f32 %v6917_v26, %v8004_v1 }
 0xa01   : > { %v3651_v4 = vsel %vm1543_vm4, %v3646_v60, 0 }
 0xa02   : > { %6495 = vmatpush3.bf16.msra.mxu1 %v3651_v4  ;;  %v3500_v58 = vpack.c.bf16 %v3492_v55, %v3492_v55 }
 0xa03   : > { %6506 = vmatprep.subr.bf16.mxu1 %v7117_v56 }
 0xa04   : > { %v3742_v8 = vpop.permute.xlu1 %3741 }
 0xa05   : > { %v3747_v11 = vsel %vm1543_vm4, %v3742_v8, 0  ;;  %6497 = vmatmul.mubr.msk.bf16.vlgmr.msra.gmra.mrb[104].mxu1 %vm1036_vm3, %v3496_v63 }
 0xa06   : > { %6507 = vmatpush3.bf16.msra.mxu1 %v3747_v11  ;;  %6508 = vmatprep.mubr.msk.bf16.mxu1 %vm7118_vm2, %v7117_v56 }
 0xa07   : > { %6518 = vmatprep.subr.bf16.mxu1 %v7117_v56 }
 0xa08   : > { %v3838_v12 = vpop.permute.xlu1 %3837 }
 0xa09   : > { %v3843_v53 = vsel %vm1543_vm4, %v3838_v12, 0 }
 0xa0d   : > { %6509 = vmatmul.mubr.msk.bf16.vlgmr.msra.gmra.mrb[108].mxu1 %vm1036_vm3, %v3498_v18 }
 0xa0e   : > { %6519 = vmatpush3.bf16.msra.mxu1 %v3843_v53  ;;  %6520 = vmatprep.mubr.msk.bf16.mxu1 %vm7118_vm2, %v7117_v56 }
 0xa0f   : > { %6534 = vmatprep.subr.bf16.mxu1 %v7117_v56 }
 0xa14   : > { %v3419_v2 = vpop.xlane.xlu0 %3418 }
 0xa15   : > { %v3433_v30 = vsub.f32 %v8017_v51, %v3419_v2  ;;  %6521 = vmatmul.mubr.msk.bf16.vlgmr.msra.gmra.mrb[112].mxu1 %vm1036_vm3, %v3500_v58 }
 0xa16   : > { %6536 = vmatprep.mubr.msk.bf16.mxu1 %vm7118_vm2, %v7117_v56 }
 0xa17   : > { %v3445_v31 = vmul.f32 1.442695, %v3433_v30 }
 0xa19   : > { %6918 = vpow2.f32 %v3445_v31 }
 0xa1c   : > { %v3425_v61 = vpop.xlane.xlu0 %3424 }
 0xa1d   : > { %v3435_v57 = vsub.f32 %v8026_v23, %v3425_v61 }
 0xa1f   : > { %v3449_v5 = vmul.f32 1.442695, %v3435_v57 }
 0xa20   : > { %v3455_v14 = vpop.xlane.xlu0 %3454 }
 0xa21   : > { %6920 = vpow2.f32 %v3449_v5 }
 0xa22   : > { %6922 = vrcp.f32 %v3455_v14 }
 0xa23   : > { %v6919_v1 = vpop.eup %6918 }
 0xa24   : > { %v3461_v16 = vpop.xlane.xlu0 %3460  ;;  %v3465_v33 = vsel %vm1036_vm3, %v6919_v1, 0.0 }
 0xa25   : > { %3466 = vadd.xlane.f32.xlu0 %v3465_v33  ;;  %6924 = vrcp.f32 %v3461_v16 }
 0xa28   : > { %v3502_v34 = vpop.permute.xlu0 %3501 }
 0xa29   : > { %v3507_v35 = vsel %vm1543_vm4, %v3502_v34, 0 }
 0xa2a   : > { %6477 = vmatpush3.bf16.msra.mxu0 %v3507_v35 }
 0xa2b   : > { %v6921_v21 = vpop.eup %6920  ;;  %6488 = vmatprep.subr.bf16.mxu0 %v7117_v56 }
 0xa2c   : > { %v6923_v9 = vpop.eup %6922  ;;  %v3471_v51 = vsel %vm1036_vm3, %v6921_v21, 0.0  ;;  %v3694_v28 = vpop.permute.xlu0 %3693 }
 0xa2d   : > { %v3485_v54 = vmul.f32 %v6923_v9, %v8032_v42  ;;  %3472 = vadd.xlane.f32.xlu0 %v3471_v51  ;;  %v3699_v23 = vsel %vm1543_vm4, %v3694_v28, 0  ;;  %v3979_v42 = vpop.permute.xlu1 %3978 }
 0xa2f   : > { %v3493_v40 = vpack.c.bf16 %v3485_v54, %v3485_v54  ;;  %v6925_v3 = vpop.eup %6924 }
 0xa30   : > { %v3487_v17 = vmul.f32 %v6925_v3, %v8038_v36 }
 0xa31   : > { %6479 = vmatmul.mubr.msk.bf16.vlgmr.msra.gmra.mrb[76].mxu0 %vm1036_vm3, %v3493_v40  ;;  %v4029_v59 = vpop.permute.xlu1 %4028 }
 0xa32   : > { %6489 = vmatpush3.bf16.msra.mxu0 %v3603_v39  ;;  %6490 = vmatprep.mubr.msk.bf16.mxu0 %vm7118_vm2, %v7117_v56  ;;  %v3495_v44 = vpack.c.bf16 %v3487_v17, %v3487_v17 }
 0xa33   : > { %6500 = vmatprep.subr.bf16.mxu0 %v7117_v56 }
 0xa35   : > { %v4131_v52 = vpop.permute.xlu1 %4130 }
 0xa36   : > { %v4136_v11 = vsel %vm1036_vm3, %v4131_v52, 0 }
 0xa39   : > { %6491 = vmatmul.mubr.msk.bf16.vlgmr.msra.gmra.mrb[80].mxu0 %vm1036_vm3, %v3495_v44  ;;  %v4129_v4 = vpop.permute.xlu1 %4128 }
 0xa3a   : > { %6501 = vmatpush3.bf16.msra.mxu0 %v3699_v23  ;;  %6502 = vmatprep.mubr.msk.bf16.mxu0 %vm7118_vm2, %v7117_v56 }
 0xa3b   : > { %6512 = vmatprep.subr.bf16.mxu0 %v7117_v56 }
 0xa3d   : > { %v4231_v12 = vpop.permute.xlu1 %4230 }
 0xa3e   : > { %v4236_v58 = vsel %vm1036_vm3, %v4231_v12, 0 }
 0xa41   : > { %v4229_v53 = vpop.permute.xlu1 %4228 }
 0xa43   : > { %3789 = vrot.lane.b32.xlu0 %v7467_v22, %s7126_s23  ;;  %s8653_s23 = smov (!%p6007_p1), %s8652_s0 }
 0xa45   : > { %v4331_v30 = vpop.permute.xlu1 %4330 }
 0xa46   : > { %v4336_v5 = vsel %vm1036_vm3, %v4331_v30, 0 }
 0xa47   : > { %3980 = vrot.lane.b32.xlu0 %v7453_v7, %s7128_s1 }
 0xa49   : > { %v4329_v33 = vpop.permute.xlu1 %4328 }
 0xa4b   : > { %4030 = vrot.lane.b32.xlu0 %v7455_v10, %s7128_s1 }
 0xa4f   : > { %4080 = vrot.lane.b32.xlu0 %v7459_v13, %s7128_s1 }
 0xa53   : > { %4078 = vrot.lane.b32.xlu0 %v7459_v13, %s7127_s26 }
 0xa57   : > { %4180 = vrot.lane.b32.xlu0 %v7461_v19, %s7128_s1 }
 0xa5b   : > { %4178 = vrot.lane.b32.xlu0 %v7461_v19, %s7127_s26 }
 0xa5f   : > { %4280 = vrot.lane.b32.xlu0 %v7467_v22, %s7128_s1 }
 0xa63   : > { %4278 = vrot.lane.b32.xlu0 %v7467_v22, %s7127_s26 }
 0xab2   : > { %v3467_v45 = vpop.xlane.xlu0 %3466 }
 0xab3   : > { %6926 = vrcp.f32 %v3467_v45 }
 0xaba   : > { %v3473_v38 = vpop.xlane.xlu0 %3472 }
 0xabb   : > { %6928 = vrcp.f32 %v3473_v38 }
 0xabd   : > { %v6927_v48 = vpop.eup %6926 }
 0xabe   : > { %v3489_v36 = vmul.f32 %v6927_v48, %v6919_v1  ;;  %v3790_v50 = vpop.permute.xlu0 %3789 }
 0xabf   : > { %v3795_v37 = vsel %vm1543_vm4, %v3790_v50, 0 }
 0xac0   : > { %v3497_v43 = vpack.c.bf16 %v3489_v36, %v3489_v36 }
 0xac2   : > { %6503 = vmatmul.mubr.msk.bf16.vlgmr.msra.gmra.mrb[84].mxu0 %vm1036_vm3, %v3497_v43  ;;  %v3981_v46 = vpop.permute.xlu0 %3980 }
 0xac3   : > { %6513 = vmatpush3.bf16.msra.mxu0 %v3795_v37  ;;  %v3986_v62 = vsel %vm1036_vm3, %v3981_v46, 0  ;;  %6514 = vmatprep.mubr.msk.bf16.mxu0 %vm7118_vm2, %v7117_v56 }
 0xac4   : > { %6535 = vmatpush3.bf16.xpose.msra.mxu1 %v3986_v62  ;;  %6718 = vmatprep.subr.msk.bf16.mxu0 %vm1543_vm4, %v3889_v29 }
 0xac5   : > { %v6929_v32 = vpop.eup %6928  ;;  %6540 = vmatprep.subr.bf16.mxu1 %v7117_v56 }
 0xac6   : > { %v3491_v49 = vmul.f32 %v6929_v32, %v6921_v21  ;;  %v4031_v0 = vpop.permute.xlu0 %4030 }
 0xac7   : > { %v4036_v60 = vsel %vm1036_vm3, %v4031_v0, 0 }
 0xac8   : > { %v3499_v41 = vpack.c.bf16 %v3491_v49, %v3491_v49 }
 0xaca   : > { %6515 = vmatmul.mubr.msk.bf16.vlgmr.msra.gmra.mrb[88].mxu0 %vm1036_vm3, %v3499_v41  ;;  %v4081_v3 = vpop.permute.xlu0 %4080 }
 0xacb   : > { %6537 = vmatmul.mubr.msk.bf16.vlgmr.msra.gmra.mrb[116].mxu1 %vm1036_vm3, %v3979_v42  ;;  %6525 = vmatpush3.bf16.msra.mxu0 %v3903_v47  ;;  %v4086_v23 = vsel %vm1036_vm3, %v4081_v3, 0 }
 0xacc   : > { %6541 = vmatpush3.bf16.xpose.msra.mxu1 %v4036_v60  ;;  %6542 = vmatprep.mubr.msk.bf16.mxu1 %vm7118_vm2, %v7117_v56 }
 0xacd   : > { %6552 = vmatprep.subr.bf16.mxu1 %v7117_v56  ;;  %6546 = vmatprep.subr.bf16.mxu0 %v7117_v56 }
 0xace   : > { %v4079_v43 = vpop.permute.xlu0 %4078 }
 0xad0   : > { %v3591_v63 = vpop.f32.mrb[100].mxu1 }
 0xad1   : > { %v6486_v6 = vpop.f32.mrb[101].mxu1 }
 0xad2   : > { %v3594_v8 = vpop.f32.mrb[102].mxu1  ;;  %v4181_v41 = vpop.permute.xlu0 %4180 }
 0xad3   : > { %v6487_v15 = vpop.f32.mrb[103].mxu1  ;;  %6543 = vmatmul.mubr.msk.bf16.vlgmr.msra.gmra.mrb[120].mxu1 %vm1036_vm3, %v4029_v59 }
 0xad4   : > { %6553 = vmatpush3.bf16.xpose.msra.mxu1 %v4136_v11  ;;  %6554 = vmatprep.mubr.msk.bf16.mxu1 %vm7118_vm2, %v7117_v56  ;;  %v4186_v15 = vsel %vm1036_vm3, %v4181_v41, 0 }
 0xad5   : > { %6564 = vmatprep.subr.bf16.mxu1 %v7117_v56 }
 0xad6   : > { %v4179_v6 = vpop.permute.xlu0 %4178 }
 0xad8   : > { %v3687_v18 = vpop.f32.mrb[104].mxu1 }
 0xad9   : > { %v6498_v26 = vpop.f32.mrb[105].mxu1 }
 0xada   : > { %v3690_v55 = vpop.f32.mrb[106].mxu1 }
 0xadb   : > { %v6499_v2 = vpop.f32.mrb[107].mxu1  ;;  %6555 = vmatmul.mubr.msk.bf16.vlgmr.msra.gmra.mrb[124].mxu1 %vm1036_vm3, %v4129_v4  ;;  %v4281_v55 = vpop.permute.xlu0 %4280 }
 0xadc   : > { %6565 = vmatpush3.bf16.xpose.msra.mxu1 %v4236_v58  ;;  %6566 = vmatprep.mubr.msk.bf16.mxu1 %vm7118_vm2, %v7117_v56 }
 0xadd   : > { %6576 = vmatprep.subr.bf16.mxu1 %v7117_v56 }
 0xae0   : > { %v3783_v31 = vpop.f32.mrb[108].mxu1 }
 0xae1   : > { %v6510_v61 = vpop.f32.mrb[109].mxu1 }
 0xae2   : > { %v3786_v57 = vpop.f32.mrb[110].mxu1 }
 0xae3   : > { %v6511_v14 = vpop.f32.mrb[111].mxu1  ;;  %6567 = vmatmul.mubr.msk.bf16.vlgmr.msra.gmra.mrb[128].mxu1 %vm1036_vm3, %v4229_v53 }
 0xae4   : > { %6577 = vmatpush3.bf16.xpose.msra.mxu1 %v4336_v5  ;;  %6578 = vmatprep.mubr.msk.bf16.mxu1 %vm7118_vm2, %v7117_v56 }
 0xae5   : > { %6588 = vmatprep.subr.bf16.mxu1 %v7117_v56 }
 0xae8   : > { %v3879_v1 = vpop.f32.mrb[112].mxu1 }
 0xae9   : > { %v6522_v16 = vpop.f32.mrb[113].mxu1 }
 0xaea   : > { %v3882_v34 = vpop.f32.mrb[114].mxu1  ;;  %v4279_v16 = vpop.permute.xlu0 %4278 }
 0xaeb   : > { %v6523_v35 = vpop.f32.mrb[115].mxu1  ;;  %6579 = vmatmul.mubr.msk.bf16.vlgmr.msra.gmra.mrb[132].mxu1 %vm1036_vm3, %v4329_v33 }
 0xaec   : > { %6590 = vmatprep.mubr.msk.bf16.mxu1 %vm7118_vm2, %v7117_v56 }
 0xb04   : > { %v3543_v21 = vpop.f32.mrb[76].mxu0 }
 0xb05   : > { %v3885_v9 = vpack.c.bf16 %v3591_v63, %v3543_v21  ;;  %v6480_v51 = vpop.f32.mrb[77].mxu0 }
 0xb06   : > { %v3546_v54 = vpop.f32.mrb[78].mxu0 }
 0xb07   : > { %v6481_v40 = vpop.f32.mrb[79].mxu0  ;;  %6526 = vmatprep.mubr.msk.bf16.mxu0 %vm1036_vm3, %v3885_v9 }
 0xb0c   : > { %v3639_v39 = vpop.f32.mrb[80].mxu0 }
 0xb0d   : > { %v3886_v17 = vpack.c.bf16 %v3687_v18, %v3639_v39  ;;  %v6492_v28 = vpop.f32.mrb[81].mxu0 }
 0xb0e   : > { %v3642_v44 = vpop.f32.mrb[82].mxu0 }
 0xb0f   : > { %v6493_v45 = vpop.f32.mrb[83].mxu0  ;;  %6527 = vmatmul.mubr.msk.bf16.vlgmr.msra.gmra.mrb[60].mxu0 %vm1036_vm3, %v3886_v17 }
 0xb10   : > { %6547 = vmatpush3.bf16.xpose.msra.mxu0 %v4086_v23 }
 0xb11   : > { %6558 = vmatprep.subr.bf16.mxu0 %v7117_v56 }
 0xb95   : > { %v3735_v38 = vpop.f32.mrb[84].mxu0 }
 0xb96   : > { %v3887_v42 = vpack.c.bf16 %v3783_v31, %v3735_v38  ;;  %v6504_v48 = vpop.f32.mrb[85].mxu0  ;;  %v4286_v31 = vsel %vm1036_vm3, %v4281_v55, 0 }
 0xb97   : > { %v3738_v36 = vpop.f32.mrb[86].mxu0 }
 0xb98   : > { %v6505_v50 = vpop.f32.mrb[87].mxu0  ;;  %6530 = vmatprep.mubr.msk.bf16.mxu0 %vm1036_vm3, %v3887_v42 }
 0xb9d   : > { %v3831_v29 = vpop.f32.mrb[88].mxu0 }
 0xb9e   : > { %v3888_v59 = vpack.c.bf16 %v3879_v1, %v3831_v29  ;;  %v6516_v37 = vpop.f32.mrb[89].mxu0  ;;  %v4022_v46 = vpop.f32.mrb[116].mxu1 }
 0xb9f   : > { %v4378_v62 = vmul.f32 0.35355338, %v4022_v46  ;;  %v3834_v32 = vpop.f32.mrb[90].mxu0  ;;  %v6538_v49 = vpop.f32.mrb[117].mxu1 }
 0xba0   : > { %v6517_v52 = vpop.f32.mrb[91].mxu0  ;;  %6531 = vmatmul.mubr.msk.bf16.gmra.mrb[64].mxu0 %vm1036_vm3, %v3888_v59  ;;  %v4025_v0 = vpop.f32.mrb[118].mxu1 }
 0xba1   : > { %v4386_v47 = vadd.f32 %v7949_v27, %v4378_v62  ;;  %v6539_v60 = vpop.f32.mrb[119].mxu1  ;;  %6548 = vmatprep.mubr.msk.bf16.mxu0 %vm7118_vm2, %v7117_v56 }
 0xba3   : > { %v4394_v4 = vsel %vm1036_vm3, %v4386_v47, -inf }
 0xba4   : > { %4395 = vmax.xlane.f32.xlu0 %v4394_v4 }
 0xba6   : > { %v4072_v63 = vpop.f32.mrb[120].mxu1 }
 0xba7   : > { %v4379_v8 = vmul.f32 0.35355338, %v4072_v63  ;;  %v6544_v11 = vpop.f32.mrb[121].mxu1 }
 0xba8   : > { %v4075_v12 = vpop.f32.mrb[122].mxu1  ;;  %6549 = vmatmul.mubr.msk.bf16.vlgmr.msra.gmra.mrb[92].mxu0 %vm1036_vm3, %v4079_v43 }
 0xba9   : > { %v4387_v18 = vadd.f32 %v7949_v27, %v4379_v8  ;;  %6559 = vmatpush3.bf16.xpose.msra.mxu0 %v4186_v15  ;;  %v6545_v26 = vpop.f32.mrb[123].mxu1  ;;  %6560 = vmatprep.mubr.msk.bf16.mxu0 %vm7118_vm2, %v7117_v56 }
 0xbaa   : > { %6570 = vmatprep.subr.bf16.mxu0 %v7117_v56 }
 0xbab   : > { %v4397_v53 = vsel %vm1036_vm3, %v4387_v18, -inf }
 0xbac   : > { %4398 = vmax.xlane.f32.xlu1 %v4397_v53 }
 0xbae   : > { %v4172_v58 = vpop.f32.mrb[124].mxu1 }
 0xbaf   : > { %v4381_v2 = vmul.f32 0.35355338, %v4172_v58  ;;  %v6556_v30 = vpop.f32.mrb[125].mxu1 }
 0xbb0   : > { %v4175_v61 = vpop.f32.mrb[126].mxu1  ;;  %6561 = vmatmul.mubr.msk.bf16.vlgmr.msra.gmra.mrb[96].mxu0 %vm1036_vm3, %v4179_v6 }
 0xbb1   : > { %v4389_v57 = vadd.f32 %v7949_v27, %v4381_v2  ;;  %6571 = vmatpush3.bf16.xpose.msra.mxu0 %v4286_v31  ;;  %v6557_v5 = vpop.f32.mrb[127].mxu1  ;;  %6572 = vmatprep.mubr.msk.bf16.mxu0 %vm7118_vm2, %v7117_v56 }
 0xbb2   : > { %6582 = vmatprep.subr.bf16.mxu0 %v7117_v56 }
 0xbb3   : > { %v4403_v14 = vsel %vm1036_vm3, %v4389_v57, -inf }
 0xbb4   : > { %4404 = vmax.xlane.f32.xlu0 %v4403_v14 }
 0xbb6   : > { %v4272_v1 = vpop.f32.mrb[128].mxu1 }
 0xbb7   : > { %v4383_v33 = vmul.f32 0.35355338, %v4272_v1  ;;  %v6568_v34 = vpop.f32.mrb[129].mxu1 }
 0xbb8   : > { %v4275_v35 = vpop.f32.mrb[130].mxu1  ;;  %6573 = vmatmul.mubr.msk.bf16.vlgmr.msra.gmra.mrb[100].mxu0 %vm1036_vm3, %v4279_v16 }
 0xbb9   : > { %v4391_v21 = vadd.f32 %v7949_v27, %v4383_v33  ;;  %v6569_v9 = vpop.f32.mrb[131].mxu1  ;;  %6584 = vmatprep.mubr.msk.bf16.mxu0 %vm7118_vm2, %v7117_v56 }
 0xbbb   : > { %v4409_v51 = vsel %vm1036_vm3, %v4391_v21, -inf }
 0xbbc   : > { %4410 = vmax.xlane.f32.xlu1 %v4409_v51 }
 0xbbe   : > { %v4372_v54 = vpop.f32.mrb[132].mxu1 }
 0xbbf   : > { %v4385_v40 = vmul.f32 0.35355338, %v4372_v54  ;;  %v6580_v3 = vpop.f32.mrb[133].mxu1 }
 0xbc0   : > { %v4375_v39 = vpop.f32.mrb[134].mxu1 }
 0xbc1   : > { %v4393_v17 = vadd.f32 %v7949_v27, %v4385_v40  ;;  %v6581_v28 = vpop.f32.mrb[135].mxu1 }
 0xbc3   : > { %v4415_v44 = vsel %vm1036_vm3, %v4393_v17, -inf }
 0xbc4   : > { %4416 = vmax.xlane.f32.xlu1 %v4415_v44 }
 0xc31   : > { %v4396_v23 = vpop.xlane.xlu0 %4395 }
 0xc32   : > { %v4418_v45 = vsub.f32 %v4386_v47, %v4396_v23 }
 0xc34   : > { %v4426_v38 = vmul.f32 1.442695, %v4418_v45 }
 0xc36   : > { %6930 = vpow2.f32 %v4426_v38 }
 0xc39   : > { %v4399_v42 = vpop.xlane.xlu1 %4398 }
 0xc3a   : > { %v4419_v48 = vsub.f32 %v4387_v18, %v4399_v42 }
 0xc3c   : > { %v4428_v36 = vmul.f32 1.442695, %v4419_v48 }
 0xc3e   : > { %6932 = vpow2.f32 %v4428_v36 }
 0xc40   : > { %v8183_v50 = vpop.eup %6930 }
 0xc41   : > { %v4405_v43 = vpop.xlane.xlu0 %4404  ;;  %v4442_v29 = vsel %vm1036_vm3, %v8183_v50, 0.0 }
 0xc42   : > { %v4421_v59 = vsub.f32 %v4389_v57, %v4405_v43  ;;  %4443 = vadd.xlane.f32.xlu0 %v4442_v29 }
 0xc44   : > { %v4432_v37 = vmul.f32 1.442695, %v4421_v59 }
 0xc46   : > { %6934 = vpow2.f32 %v4432_v37 }
 0xc48   : > { %v6933_v46 = vpop.eup %6932 }
 0xc49   : > { %v4411_v62 = vpop.xlane.xlu1 %4410  ;;  %v4445_v32 = vsel %vm1036_vm3, %v6933_v46, 0.0 }
 0xc4a   : > { %v4423_v49 = vsub.f32 %v4391_v21, %v4411_v62  ;;  %4446 = vadd.xlane.f32.xlu1 %v4445_v32 }
 0xc4c   : > { %v4436_v52 = vmul.f32 1.442695, %v4423_v49 }
 0xc4e   : > { %6936 = vpow2.f32 %v4436_v52 }
 0xc50   : > { %v6935_v0 = vpop.eup %6934 }
 0xc51   : > { %v4417_v41 = vpop.xlane.xlu1 %4416  ;;  %v4451_v47 = vsel %vm1036_vm3, %v6935_v0, 0.0 }
 0xc52   : > { %v4425_v60 = vsub.f32 %v4393_v17, %v4417_v41  ;;  %4452 = vadd.xlane.f32.xlu1 %v4451_v47 }
 0xc54   : > { %v4440_v4 = vmul.f32 1.442695, %v4425_v60 }
 0xc56   : > { %6938 = vpow2.f32 %v4440_v4 }
 0xc58   : > { %v8189_v63 = vpop.eup %6936 }
 0xc59   : > { %v4457_v6 = vsel %vm1036_vm3, %v8189_v63, 0.0 }
 0xc5a   : > { %4458 = vadd.xlane.f32.xlu1 %v4457_v6 }
 0xc60   : > { %v8193_v8 = vpop.eup %6938 }
 0xc61   : > { %v4463_v11 = vsel %vm1036_vm3, %v8193_v8, 0.0 }
 0xc62   : > { %4464 = vadd.xlane.f32.xlu1 %v4463_v11 }
 0xc73   : > { %4538 = vrot.lane.b32.xlu1 %v7455_v10, %s7129_s25 }
 0xc77   : > { %4586 = vrot.lane.b32.xlu1 %v7459_v13, %s7129_s25 }
 0xc7b   : > { %v4122_v15 = vpop.f32.mrb[92].mxu0  ;;  %4634 = vrot.lane.b32.xlu1 %v7464_v20, %s7129_s25 }
 0xc7c   : > { %v4380_v12 = vmul.f32 0.35355338, %v4122_v15  ;;  %v6550_v18 = vpop.f32.mrb[93].mxu0 }
 0xc7d   : > { %v4125_v26 = vpop.f32.mrb[94].mxu0 }
 0xc7e   : > { %v8204_v53 = vadd.f32 %v7949_v27, %v4380_v12  ;;  %v6551_v55 = vpop.f32.mrb[95].mxu0 }
 0xc7f   : > { %4730 = vrot.lane.b32.xlu1 %v7470_v24, %s7129_s25 }
 0xc80   : > { %v4400_v10 = vsel %vm1036_vm3, %v8204_v53, -inf }
 0xc81   : > { %4401 = vmax.xlane.f32.xlu0 %v4400_v10 }
 0xc83   : > { %v4222_v58 = vpop.f32.mrb[96].mxu0  ;;  %4826 = vrot.lane.b32.xlu1 %v7474_v25, %s7129_s25 }
 0xc84   : > { %v4382_v13 = vmul.f32 0.35355338, %v4222_v58  ;;  %v6562_v20 = vpop.f32.mrb[97].mxu0 }
 0xc85   : > { %v4225_v2 = vpop.f32.mrb[98].mxu0 }
 0xc86   : > { %v8213_v30 = vadd.f32 %v7949_v27, %v4382_v13  ;;  %v6563_v31 = vpop.f32.mrb[99].mxu0 }
 0xc88   : > { %v4406_v61 = vsel %vm1036_vm3, %v8213_v30, -inf }
 0xc89   : > { %4407 = vmax.xlane.f32.xlu0 %v4406_v61 }
 0xc8b   : > { %v4322_v24 = vpop.f32.mrb[100].mxu0 }
 0xc8c   : > { %v4384_v57 = vmul.f32 0.35355338, %v4322_v24  ;;  %v6574_v5 = vpop.f32.mrb[101].mxu0 }
 0xc8d   : > { %v4325_v14 = vpop.f32.mrb[102].mxu0 }
 0xc8e   : > { %v8218_v1 = vadd.f32 %v7949_v27, %v4384_v57  ;;  %v6575_v16 = vpop.f32.mrb[103].mxu0 }
 0xc90   : > { %v4412_v25 = vsel %vm1036_vm3, %v8218_v1, -inf }
 0xc91   : > { %4413 = vmax.xlane.f32.xlu0 %v4412_v25 }
 0xca7   : > { %4490 = vrot.lane.b32.xlu0 %v7453_v7, %s7129_s25 }
 0xccf   : > { %v4444_v59 = vpop.xlane.xlu0 %4443 }
 0xcd7   : > { %v4447_v33 = vpop.xlane.xlu1 %4446 }
 0xcd8   : > { %6940 = vrcp.f32 %v4447_v33 }
 0xcdf   : > { %v4453_v34 = vpop.xlane.xlu1 %4452 }
 0xce0   : > { %6942 = vrcp.f32 %v4453_v34 }
 0xce2   : > { %v6941_v21 = vpop.eup %6940 }
 0xce3   : > { %v4475_v51 = vmul.f32 %v6941_v21, %v6933_v46 }
 0xce5   : > { %v4483_v40 = vpack.c.bf16 %v4475_v51, %v4475_v51 }
 0xce7   : > { %v4459_v35 = vpop.xlane.xlu1 %4458 }
 0xce8   : > { %6944 = vrcp.f32 %v4459_v35 }
 0xcea   : > { %v6943_v3 = vpop.eup %6942 }
 0xceb   : > { %v4477_v7 = vmul.f32 %v6943_v3, %v6935_v0 }
 0xced   : > { %v4485_v44 = vpack.c.bf16 %v4477_v7, %v4477_v7 }
 0xcef   : > { %v4465_v9 = vpop.xlane.xlu1 %4464 }
 0xcf0   : > { %6946 = vrcp.f32 %v4465_v9 }
 0xcf2   : > { %v6945_v23 = vpop.eup %6944 }
 0xcf3   : > { %v4539_v54 = vpop.permute.xlu1 %4538  ;;  %v4479_v42 = vmul.f32 %v6945_v23, %v8189_v63 }
 0xcf4   : > { %v4544_v27 = vsel %vm1543_vm4, %v4539_v54, 0 }
 0xcf5   : > { %6589 = vmatpush3.bf16.msra.mxu1 %v4544_v27  ;;  %v4487_v36 = vpack.c.bf16 %v4479_v42, %v4479_v42 }
 0xcf6   : > { %6600 = vmatprep.subr.bf16.mxu1 %v7117_v56 }
 0xcf7   : > { %v4587_v39 = vpop.permute.xlu1 %4586 }
 0xcf8   : > { %6591 = vmatmul.mubr.msk.bf16.vlgmr.msra.gmra.mrb[136].mxu1 %vm1036_vm3, %v4483_v40  ;;  %v4592_v11 = vsel %vm1543_vm4, %v4587_v39, 0 }
 0xcf9   : > { %6602 = vmatprep.mubr.msk.bf16.mxu1 %vm7118_vm2, %v7117_v56 }
 0xcfa   : > { %v6947_v43 = vpop.eup %6946 }
 0xcfb   : > { %v4635_v17 = vpop.permute.xlu1 %4634  ;;  %v4481_v37 = vmul.f32 %v6947_v43, %v8193_v8 }
 0xcfc   : > { %v4640_v28 = vsel %vm1543_vm4, %v4635_v17, 0 }
 0xcfd   : > { %6601 = vmatpush3.bf16.msra.mxu1 %v4640_v28  ;;  %v4489_v62 = vpack.c.bf16 %v4481_v37, %v4481_v37  ;;  %v4878_v28 = vld [vmem:[%s7326_s18 + $0xc] sm:$0xf] }
 0xcfe   : > { %6612 = vmatprep.subr.bf16.mxu1 %v7117_v56 }
 0xcff   : > { %v4731_v45 = vpop.permute.xlu1 %4730 }
 0xd00   : > { %v4736_v38 = vsel %vm1543_vm4, %v4731_v45, 0  ;;  %6603 = vmatmul.mubr.msk.bf16.vlgmr.msra.gmra.mrb[140].mxu1 %vm1036_vm3, %v4485_v44 }
 0xd01   : > { %6613 = vmatpush3.bf16.msra.mxu1 %v4736_v38  ;;  %6614 = vmatprep.mubr.msk.bf16.mxu1 %vm7118_vm2, %v7117_v56 }
 0xd02   : > { %6624 = vmatprep.subr.bf16.mxu1 %v7117_v56 }
 0xd03   : > { %v4827_v48 = vpop.permute.xlu1 %4826 }
 0xd04   : > { %v4832_v29 = vsel %vm1543_vm4, %v4827_v48, 0 }
 0xd08   : > { %6615 = vmatmul.mubr.msk.bf16.vlgmr.msra.gmra.mrb[144].mxu1 %vm1036_vm3, %v4487_v36 }
 0xd09   : > { %6625 = vmatpush3.bf16.msra.mxu1 %v4832_v29  ;;  %6626 = vmatprep.mubr.msk.bf16.mxu1 %vm7118_vm2, %v7117_v56  ;;  %v4892_v29 = vsel %vm1543_vm4, %v4878_v28, 0 }
 0xd0e   : > { %v4402_v46 = vpop.xlane.xlu0 %4401 }
 0xd0f   : > { %v4420_v32 = vsub.f32 %v8204_v53, %v4402_v46 }
 0xd10   : > { %6627 = vmatmul.mubr.msk.bf16.vlgmr.msra.gmra.mrb[148].mxu1 %vm1036_vm3, %v4489_v62 }
 0xd11   : > { %v4430_v49 = vmul.f32 1.442695, %v4420_v32 }
 0xd13   : > { %6948 = vpow2.f32 %v4430_v49 }
 0xd14   : > { %6950 = vrcp.f32 %v4444_v59 }
 0xd16   : > { %v4408_v52 = vpop.xlane.xlu0 %4407 }
 0xd1d   : > { %v6949_v0 = vpop.eup %6948 }
 0xd1e   : > { %v6951_v41 = vpop.eup %6950  ;;  %v4414_v47 = vpop.xlane.xlu0 %4413  ;;  %v4448_v60 = vsel %vm1036_vm3, %v6949_v0, 0.0 }
 0xd1f   : > { %4449 = vadd.xlane.f32.xlu0 %v4448_v60  ;;  %v4474_v4 = vmul.f32 %v6951_v41, %v8183_v50  ;;  %v4422_v50 = vsub.f32 %v8213_v30, %v4408_v52  ;;  %v4424_v12 = vsub.f32 %v8218_v1, %v4414_v47 }
 0xd21   : > { %v4482_v8 = vpack.c.bf16 %v4474_v4, %v4474_v4  ;;  %v4434_v15 = vmul.f32 1.442695, %v4422_v50  ;;  %v4438_v18 = vmul.f32 1.442695, %v4424_v12 }
 0xd22   : > { %v4491_v63 = vpop.permute.xlu0 %4490 }
 0xd23   : > { %v4496_v6 = vsel %vm1543_vm4, %v4491_v63, 0  ;;  %6952 = vpow2.f32 %v4434_v15  ;;  %v6995_v15 = vld [vmem:[#allocation2 + $0x10] sm:$0xff] }
 0xd24   : > { %6583 = vmatpush3.bf16.msra.mxu0 %v4496_v6  ;;  %6954 = vpow2.f32 %v4438_v18  ;;  %v6996_v18 = vld [vmem:[#allocation2] sm:$0xff] }
 0xd25   : > { %6594 = vmatprep.subr.bf16.mxu0 %v7117_v56 }
 0xd27   : > { %6585 = vmatmul.mubr.msk.bf16.vlgmr.msra.gmra.mrb[104].mxu0 %vm1036_vm3, %v4482_v8 }
 0xd28   : > { %6595 = vmatpush3.bf16.msra.mxu0 %v4592_v11  ;;  %6596 = vmatprep.mubr.msk.bf16.mxu0 %vm7118_vm2, %v7117_v56  ;;  %v5988_v11 = vld [vmem:[%s8649_s15] ss:$0 sm:$0xff] }
 0xd29   : > { %6606 = vmatprep.subr.bf16.mxu0 %v7117_v56 }
 0xd2d   : > { %v6953_v26 = vpop.eup %6952 }
 0xd2e   : > { %v4454_v53 = vsel %vm1036_vm3, %v6953_v26, 0.0  ;;  %v6955_v55 = vpop.eup %6954 }
 0xd2f   : > { %v4460_v10 = vsel %vm1036_vm3, %v6955_v55, 0.0 }
 0xd35   : > { %4682 = vrot.lane.b32.xlu0 %v7461_v19, %s7129_s25 }
 0xd54   : > { %4455 = vadd.xlane.f32.xlu0 %v4454_v53 }
 0xd58   : > { %4461 = vadd.xlane.f32.xlu0 %v4460_v10 }
 0xd6e   : > { %4778 = vrot.lane.b32.xlu0 %v7467_v22, %s7129_s25 }
 0xdac   : > { %v4450_v19 = vpop.xlane.xlu0 %4449 }
 0xdad   : > { %6956 = vrcp.f32 %v4450_v19  ;;  %v6997_v19 = vld [vmem:[#allocation2 + $0x8] sm:$0xff] }
 0xdb0   : > { %v4683_v20 = vpop.permute.xlu0 %4682 }
 0xdb1   : > { %v4688_v30 = vsel %vm1543_vm4, %v4683_v20, 0  ;;  %v6998_v20 = vld [vmem:[#allocation2 + $0x18] sm:$0xff] }
 0xdb7   : > { %v6957_v58 = vpop.eup %6956 }
 0xdb8   : > { %v4476_v13 = vmul.f32 %v6957_v58, %v6949_v0 }
 0xdba   : > { %v4484_v2 = vpack.c.bf16 %v4476_v13, %v4476_v13 }
 0xdbc   : > { %6597 = vmatmul.mubr.msk.bf16.vlgmr.msra.gmra.mrb[108].mxu0 %vm1036_vm3, %v4484_v2 }
 0xdbd   : > { %6607 = vmatpush3.bf16.msra.mxu0 %v4688_v30  ;;  %6608 = vmatprep.mubr.msk.bf16.mxu0 %vm7118_vm2, %v7117_v56 }
 0xdbe   : > { %6618 = vmatprep.subr.bf16.mxu0 %v7117_v56 }
 0xdcb   : > { %v4580_v31 = vpop.f32.mrb[136].mxu1 }
 0xdcc   : > { %v6592_v61 = vpop.f32.mrb[137].mxu1 }
 0xdcd   : > { %v4583_v24 = vpop.f32.mrb[138].mxu1 }
 0xdce   : > { %v6593_v22 = vpop.f32.mrb[139].mxu1 }
 0xdd3   : > { %v4676_v57 = vpop.f32.mrb[140].mxu1 }
 0xdd4   : > { %v6604_v5 = vpop.f32.mrb[141].mxu1 }
 0xdd5   : > { %v4679_v14 = vpop.f32.mrb[142].mxu1 }
 0xdd6   : > { %v6605_v1 = vpop.f32.mrb[143].mxu1  ;;  %v6999_v14 = vld [vmem:[#allocation2 + $0x30] sm:$0xff] }
 0xddb   : > { %v4772_v16 = vpop.f32.mrb[144].mxu1 }
 0xddc   : > { %v6616_v25 = vpop.f32.mrb[145].mxu1 }
 0xddd   : > { %v4775_v33 = vpop.f32.mrb[146].mxu1  ;;  %v7000_v25 = vld [vmem:[#allocation2 + $0x20] sm:$0xff] }
 0xdde   : > { %v6617_v34 = vpop.f32.mrb[147].mxu1 }
 0xde1   : > { %v4456_v35 = vpop.xlane.xlu0 %4455 }
 0xde2   : > { %6958 = vrcp.f32 %v4456_v35 }
 0xde3   : > { %v4868_v21 = vpop.f32.mrb[148].mxu1 }
 0xde4   : > { %v6628_v9 = vpop.f32.mrb[149].mxu1 }
 0xde5   : > { %v4871_v51 = vpop.f32.mrb[150].mxu1  ;;  %v4462_v54 = vpop.xlane.xlu0 %4461 }
 0xde6   : > { %6960 = vrcp.f32 %v4462_v54  ;;  %v6629_v27 = vpop.f32.mrb[151].mxu1 }
 0xde7   : > { %v7002_v27 = vld [vmem:[#allocation2 + $0x28] sm:$0xff] }
 0xde9   : > { %v4779_v39 = vpop.permute.xlu0 %4778 }
 0xdea   : > { %v4784_v44 = vsel %vm1543_vm4, %v4779_v39, 0 }
 0xdec   : > { %v6959_v40 = vpop.eup %6958 }
 0xded   : > { %v4478_v3 = vmul.f32 %v6959_v40, %v6953_v26 }
 0xdef   : > { %v4486_v7 = vpack.c.bf16 %v4478_v3, %v4478_v3 }
 0xdf0   : > { %v6961_v17 = vpop.eup %6960 }
 0xdf1   : > { %6609 = vmatmul.mubr.msk.bf16.vlgmr.msra.gmra.mrb[112].mxu0 %vm1036_vm3, %v4486_v7  ;;  %v4480_v23 = vmul.f32 %v6961_v17, %v6955_v55 }
 0xdf2   : > { %6619 = vmatpush3.bf16.msra.mxu0 %v4784_v44  ;;  %6620 = vmatprep.mubr.msk.bf16.mxu0 %vm7118_vm2, %v7117_v56 }
 0xdf3   : > { %6719 = vmatprep.subr.msk.bf16.mxu0 %vm1543_vm4, %v4878_v28  ;;  %v4488_v45 = vpack.c.bf16 %v4480_v23, %v4480_v23 }
 0xdf9   : > { %6621 = vmatmul.mubr.msk.bf16.vlgmr.msra.gmra.mrb[116].mxu0 %vm1036_vm3, %v4488_v45 }
 0xdfa   : > { %v4532_v38 = vpop.f32.mrb[104].mxu0  ;;  %6631 = vmatpush3.bf16.msra.mxu0 %v4892_v29 }
 0xdfb   : > { %v4874_v42 = vpack.c.bf16 %v4580_v31, %v4532_v38  ;;  %v6586_v48 = vpop.f32.mrb[105].mxu0 }
 0xdfc   : > { %v4535_v36 = vpop.f32.mrb[106].mxu0 }
 0xdfd   : > { %v6587_v43 = vpop.f32.mrb[107].mxu0  ;;  %6632 = vmatprep.mubr.msk.bf16.mxu0 %vm1036_vm3, %v4874_v42 }
 0xe8f   : > { %v4628_v59 = vpop.f32.mrb[108].mxu0 }
 0xe90   : > { %v4875_v37 = vpack.c.bf16 %v4676_v57, %v4628_v59  ;;  %v6598_v46 = vpop.f32.mrb[109].mxu0 }
 0xe91   : > { %v4631_v56 = vpop.f32.mrb[110].mxu0 }
 0xe92   : > { %v6599_v62 = vpop.f32.mrb[111].mxu0  ;;  %6633 = vmatmul.mubr.msk.bf16.vlgmr.msra.gmra.mrb[60].mxu0 %vm1036_vm3, %v4875_v37 }
 0xec4   : > { %v4724_v32 = vpop.f32.mrb[112].mxu0 }
 0xec5   : > { %v4876_v49 = vpack.c.bf16 %v4772_v16, %v4724_v32  ;;  %v6610_v52 = vpop.f32.mrb[113].mxu0 }
 0xec6   : > { %v4727_v0 = vpop.f32.mrb[114].mxu0 }
 0xec7   : > { %v6611_v41 = vpop.f32.mrb[115].mxu0  ;;  %6636 = vmatprep.mubr.msk.bf16.mxu0 %vm1036_vm3, %v4876_v49 }
 0xecc   : > { %v4820_v47 = vpop.f32.mrb[116].mxu0 }
 0xecd   : > { %v4877_v60 = vpack.c.bf16 %v4868_v21, %v4820_v47  ;;  %v6622_v4 = vpop.f32.mrb[117].mxu0  ;;  %v7001_v21 = vld [vmem:[#allocation2 + $0x38] sm:$0xff] }
 0xece   : > { %v4823_v63 = vpop.f32.mrb[118].mxu0  ;;  %v6808_v4 = vld [vmem:[%s7343_s29] sm:$0xff]  }
 0xecf   : > { %v6623_v6 = vpop.f32.mrb[119].mxu0  ;;  %6637 = vmatmul.mubr.msk.bf16.gmra.mrb[64].mxu0 %vm1036_vm3, %v4877_v60  ;;  %6640 = vmatprep.subr.bf16.mxu1 %v6808_v4  ;;  %v6809_v63 = vld [vmem:[%s7343_s29 + $0x8] sm:$0xff]  }
 0xed0   : > { %6641 = vmatpush3.bf16.msra.mxu1 %v6808_v4 }
 0xed1   : > { %6642 = vmatprep.subr.bf16.mxu1 %v6809_v63 }
 0xed4   : > { %6643 = vmatpush3.bf16.msra.mxu1 %v6809_v63 }
 0xf65   : > { %v6634_v8 = vpop.f32.mrb[60].mxu0 }
 0xf66   : > { %v4928_v50 = vpop.f32.mrb[61].mxu0  ;;  %v4969_v12 = vadd.f32 %v6995_v15, %v6634_v8 }
 0xf67   : > { %v4967_v26 = vadd.f32 %v6996_v18, %v4928_v50  ;;  %v6635_v53 = vpop.f32.mrb[62].mxu0 }
 0xf68   : > { %v4931_v55 = vpop.f32.mrb[63].mxu0  ;;  %v8285_v13 = vadd.f32 %v5988_v11, %v4969_v12  ;;  %v4970_v2 = vadd.f32 %v6998_v20, %v6635_v53 }
 0xf69   : > { %v8283_v10 = vadd.f32 %v5988_v11, %v4967_v26  ;;  %v4968_v58 = vadd.f32 %v6997_v19, %v4931_v55 }
 0xf6a   : > { %v8293_v24 = vadd.f32 %v5988_v11, %v4970_v2  ;;  %v4998_v22 = vsel %vm787_vm1, %v8285_v13, 0.0 }
 0xf6b   : > { %v8287_v30 = vadd.f32 %v5988_v11, %v4968_v58  ;;  %v4992_v31 = vsel %vm787_vm1, %v8283_v10, 0.0 }
 0xf6c   : > { %4993 = vadd.xlane.f32.xlu0 %v4992_v31  ;;  %v5001_v57 = vsel %vm787_vm1, %v8293_v24, 0.0 }
 0xf6d   : > { %v4995_v61 = vsel %vm787_vm1, %v8287_v30, 0.0 }
 0xf6e   : > { %4996 = vadd.xlane.f32.xlu1 %v4995_v61 }
 0xf70   : > { %4999 = vadd.xlane.f32.xlu0 %v4998_v22 }
 0xf74   : > { %5002 = vadd.xlane.f32.xlu0 %v5001_v57 }
 0xfa2   : > { %v6638_v5 = vpop.f32.mrb[64].mxu0 }
 0xfa3   : > { %v4973_v1 = vadd.f32 %v6999_v14, %v6638_v5  ;;  %v4944_v16 = vpop.f32.mrb[65].mxu0 }
 0xfa4   : > { %v4971_v33 = vadd.f32 %v7000_v25, %v4944_v16  ;;  %v6639_v34 = vpop.f32.mrb[66].mxu0  ;;  %v6811_v16 = vld [vmem:[%s7357_s30 + $0x8] sm:$0xff]  }
 0xfa5   : > { %v8299_v35 = vadd.f32 %v5988_v11, %v4973_v1  ;;  %v4974_v9 = vadd.f32 %v7001_v21, %v6639_v34  ;;  %v4947_v51 = vpop.f32.mrb[67].mxu0  ;;  %v6810_v1 = vld [vmem:[%s7357_s30] sm:$0xff]  }
 0xfa6   : > { %v8301_v54 = vadd.f32 %v5988_v11, %v4971_v33  ;;  %v4972_v40 = vadd.f32 %v7002_v27, %v4947_v51  ;;  %6652 = vmatprep.subr.bf16.mxu0 %v6810_v1 }
 0xfa7   : > { %v8303_v3 = vadd.f32 %v5988_v11, %v4974_v9  ;;  %v5010_v28 = vsel %vm787_vm1, %v8299_v35, 0.0  ;;  %6653 = vmatpush3.bf16.msra.mxu0 %v6810_v1 }
 0xfa8   : > { %v8305_v39 = vadd.f32 %v5988_v11, %v4972_v40  ;;  %v5004_v7 = vsel %vm787_vm1, %v8301_v54, 0.0  ;;  %6654 = vmatprep.subr.bf16.mxu0 %v6811_v16 }
 0xfa9   : > { %5005 = vadd.xlane.f32.xlu0 %v5004_v7  ;;  %v5013_v44 = vsel %vm787_vm1, %v8303_v3, 0.0 }
 0xfaa   : > { %v5007_v17 = vsel %vm787_vm1, %v8305_v39, 0.0 }
 0xfab   : > { %5008 = vadd.xlane.f32.xlu1 %v5007_v17  ;;  %6655 = vmatpush3.bf16.msra.mxu0 %v6811_v16 }
 0xfad   : > { %5011 = vadd.xlane.f32.xlu0 %v5010_v28 }
 0xfaf   : > { %5014 = vadd.xlane.f32.xlu1 %v5013_v44 }
 0xff9   : > { %v4994_v23 = vpop.xlane.xlu0 %4993 }
 0xffa   : > { %v5016_v45 = vmul.f32 0.03125, %v4994_v23 }
 0xffb   : > { %v4997_v38 = vpop.xlane.xlu1 %4996 }
 0xffc   : > { %v8316_v42 = vsub.f32 %v8283_v10, %v5016_v45  ;;  %v5017_v48 = vmul.f32 0.03125, %v4997_v38  ;;  %v5989_v45 = vld [vmem:[%s8650_s16] ss:$0 sm:$0xff] }
 0xffd   : > { %v5000_v36 = vpop.xlane.xlu0 %4999 }
 0xffe   : > { %v8319_v43 = vsub.f32 %v8287_v30, %v5017_v48  ;;  %v5018_v29 = vmul.f32 0.03125, %v5000_v36  ;;  %v5032_v59 = vmul.f32 %v8316_v42, %v8316_v42 }
0x1000   : > { %v8324_v37 = vsub.f32 %v8285_v13, %v5018_v29  ;;  %v5040_v46 = vsel %vm787_vm1, %v5032_v59, 0.0  ;;  %v5033_v56 = vmul.f32 %v8319_v43, %v8319_v43 }
0x1001   : > { %v5003_v62 = vpop.xlane.xlu0 %5002  ;;  %5041 = vadd.xlane.f32.xlu0 %v5040_v46  ;;  %v5990_v46 = vld [vmem:[%s736_s4] ss:$0 sm:$0xff] }
0x1002   : > { %v5019_v32 = vmul.f32 0.03125, %v5003_v62  ;;  %v5043_v49 = vsel %vm787_vm1, %v5033_v56, 0.0  ;;  %v5034_v52 = vmul.f32 %v8324_v37, %v8324_v37 }
0x1003   : > { %5044 = vadd.xlane.f32.xlu1 %v5043_v49 }
0x1004   : > { %v8333_v0 = vsub.f32 %v8293_v24, %v5019_v32  ;;  %v5046_v41 = vsel %vm787_vm1, %v5034_v52, 0.0 }
0x1005   : > { %5047 = vadd.xlane.f32.xlu0 %v5046_v41 }
0x1006   : > { %v5035_v47 = vmul.f32 %v8333_v0, %v8333_v0 }
0x1008   : > { %v5049_v60 = vsel %vm787_vm1, %v5035_v47, 0.0 }
0x1009   : > { %5050 = vadd.xlane.f32.xlu1 %v5049_v60 }
0x1036   : > { %v5006_v6 = vpop.xlane.xlu0 %5005 }
0x1037   : > { %v5020_v8 = vmul.f32 0.03125, %v5006_v6 }
0x1038   : > { %v5009_v11 = vpop.xlane.xlu1 %5008 }
0x1039   : > { %v8342_v50 = vsub.f32 %v8301_v54, %v5020_v8  ;;  %v5021_v15 = vmul.f32 0.03125, %v5009_v11 }
0x103a   : > { %v5012_v12 = vpop.xlane.xlu0 %5011 }
0x103b   : > { %v8345_v18 = vsub.f32 %v8305_v39, %v5021_v15  ;;  %v5022_v26 = vmul.f32 0.03125, %v5012_v12  ;;  %v5036_v53 = vmul.f32 %v8342_v50, %v8342_v50 }
0x103c   : > { %v5015_v55 = vpop.xlane.xlu1 %5014 }
0x103d   : > { %v8350_v19 = vsub.f32 %v8299_v35, %v5022_v26  ;;  %v5023_v58 = vmul.f32 0.03125, %v5015_v55  ;;  %v5052_v20 = vsel %vm787_vm1, %v5036_v53, 0.0  ;;  %v5037_v2 = vmul.f32 %v8345_v18, %v8345_v18 }
0x103e   : > { %5053 = vadd.xlane.f32.xlu0 %v5052_v20 }
0x103f   : > { %v8356_v31 = vsub.f32 %v8303_v3, %v5023_v58  ;;  %v5055_v61 = vsel %vm787_vm1, %v5037_v2, 0.0  ;;  %v5038_v22 = vmul.f32 %v8350_v19, %v8350_v19 }
0x1040   : > { %5056 = vadd.xlane.f32.xlu1 %v5055_v61 }
0x1041   : > { %v5058_v57 = vsel %vm787_vm1, %v5038_v22, 0.0  ;;  %v5039_v5 = vmul.f32 %v8356_v31, %v8356_v31 }
0x1042   : > { %5059 = vadd.xlane.f32.xlu0 %v5058_v57 }
0x1043   : > { %v5061_v14 = vsel %vm787_vm1, %v5039_v5, 0.0 }
0x1044   : > { %5062 = vadd.xlane.f32.xlu1 %v5061_v14 }
0x108e   : > { %v5042_v25 = vpop.xlane.xlu0 %5041 }
0x108f   : > { %v5064_v33 = vmul.f32 0.03125, %v5042_v25 }
0x1090   : > { %v5045_v34 = vpop.xlane.xlu1 %5044 }
0x1091   : > { %v5072_v21 = vadd.f32 1e-05, %v5064_v33  ;;  %v5065_v9 = vmul.f32 0.03125, %v5045_v34 }
0x1092   : > { %v5048_v51 = vpop.xlane.xlu0 %5047 }
0x1093   : > { %6962 = vrsqrt.f32 %v5072_v21  ;;  %v5073_v27 = vadd.f32 1e-05, %v5065_v9  ;;  %v5066_v40 = vmul.f32 0.03125, %v5048_v51 }
0x1095   : > { %6964 = vrsqrt.f32 %v5073_v27  ;;  %v5074_v7 = vadd.f32 1e-05, %v5066_v40 }
0x1096   : > { %v5051_v17 = vpop.xlane.xlu1 %5050 }
0x1097   : > { %6966 = vrsqrt.f32 %v5074_v7  ;;  %v5067_v28 = vmul.f32 0.03125, %v5051_v17  ;;  %v6814_v7 = vld [vmem:[%s7357_s30 + $0x20] sm:$0xff]   ;;  %v6815_v17 = vld [vmem:[%s7357_s30 + $0x28] sm:$0xff]  }
0x1099   : > { %v5075_v44 = vadd.f32 1e-05, %v5067_v28  ;;  %v6816_v28 = vld [vmem:[%s7357_s30 + $0x30] sm:$0xff]  }
0x109b   : > { %6968 = vrsqrt.f32 %v5075_v44  ;;  %v6817_v44 = vld [vmem:[%s7357_s30 + $0x38] sm:$0xff]  }
0x109d   : > { %v6963_v23 = vpop.eup %6962 }
0x109e   : > { %v5088_v38 = vmul.f32 %v6963_v23, %v8316_v42  ;;  %v5991_v23 = vld [vmem:[%s744_s20] ss:$0 sm:$0xff] }
0x109f   : > { %v6965_v48 = vpop.eup %6964 }
0x10a0   : > { %v5089_v36 = vmul.f32 %v6965_v48, %v8319_v43  ;;  %v5102_v29 = vmul.f32 %v5989_v45, %v5088_v38 }
0x10a1   : > { %v6967_v59 = vpop.eup %6966 }
0x10a2   : > { %v5090_v56 = vmul.f32 %v6967_v59, %v8324_v37  ;;  %v5103_v62 = vmul.f32 %v5989_v45, %v5089_v36  ;;  %v5116_v32 = vadd.f32 %v5990_v46, %v5102_v29 }
0x10a4   : > { %v5117_v49 = vadd.f32 %v5990_v46, %v5103_v62  ;;  %v5104_v41 = vmul.f32 %v5989_v45, %v5090_v56 }
0x10a5   : > { %v6969_v52 = vpop.eup %6968 }
0x10a6   : > { %v5091_v47 = vmul.f32 %v6969_v52, %v8333_v0  ;;  %v5124_v42 = vpack.c.bf16 %v5117_v49, %v5116_v32  ;;  %v5118_v43 = vadd.f32 %v5990_v46, %v5104_v41 }
0x10a8   : > { %v5105_v60 = vmul.f32 %v5989_v45, %v5091_v47  ;;  %6644 = vmatprep.mubr.msk.bf16.mxu1 %vm787_vm1, %v5124_v42 }
0x10aa   : > { %v5119_v4 = vadd.f32 %v5990_v46, %v5105_v60 }
0x10ac   : > { %v5125_v63 = vpack.c.bf16 %v5119_v4, %v5118_v43 }
0x10ae   : > { %6645 = vmatmul.mubr.msk.bf16.vlgmr.msra.gmra.mrb[152].mxu1 %vm787_vm1, %v5125_v63 }
0x10cb   : > { %v5054_v6 = vpop.xlane.xlu0 %5053 }
0x10cc   : > { %v5068_v8 = vmul.f32 0.03125, %v5054_v6 }
0x10cd   : > { %v5057_v11 = vpop.xlane.xlu1 %5056 }
0x10ce   : > { %v5076_v37 = vadd.f32 1e-05, %v5068_v8  ;;  %v5069_v15 = vmul.f32 0.03125, %v5057_v11 }
0x10cf   : > { %v5060_v12 = vpop.xlane.xlu0 %5059 }
0x10d0   : > { %6970 = vrsqrt.f32 %v5076_v37  ;;  %v5077_v26 = vadd.f32 1e-05, %v5069_v15  ;;  %v5070_v53 = vmul.f32 0.03125, %v5060_v12 }
0x10d1   : > { %v5063_v55 = vpop.xlane.xlu1 %5062 }
0x10d2   : > { %6972 = vrsqrt.f32 %v5077_v26  ;;  %v5078_v0 = vadd.f32 1e-05, %v5070_v53  ;;  %v5071_v58 = vmul.f32 0.03125, %v5063_v55 }
0x10d4   : > { %6974 = vrsqrt.f32 %v5078_v0  ;;  %v5079_v20 = vadd.f32 1e-05, %v5071_v58 }
0x10d6   : > { %6976 = vrsqrt.f32 %v5079_v20 }
0x10da   : > { %v6971_v2 = vpop.eup %6970 }
0x10db   : > { %v5092_v61 = vmul.f32 %v6971_v2, %v8342_v50 }
0x10dc   : > { %v6973_v22 = vpop.eup %6972 }
0x10dd   : > { %v5093_v57 = vmul.f32 %v6973_v22, %v8345_v18  ;;  %v5106_v5 = vmul.f32 %v5989_v45, %v5092_v61 }
0x10de   : > { %v6975_v14 = vpop.eup %6974 }
0x10df   : > { %v5094_v1 = vmul.f32 %v6975_v14, %v8350_v19  ;;  %v5107_v16 = vmul.f32 %v5989_v45, %v5093_v57  ;;  %v5120_v34 = vadd.f32 %v5990_v46, %v5106_v5  ;;  %v6812_v19 = vld [vmem:[%s7357_s30 + $0x10] sm:$0xff]  }
0x10e0   : > { %v6977_v25 = vpop.eup %6976  ;;  %6656 = vmatprep.subr.bf16.mxu0 %v6812_v19 }
0x10e1   : > { %v5095_v33 = vmul.f32 %v6977_v25, %v8356_v31  ;;  %v5121_v21 = vadd.f32 %v5990_v46, %v5107_v16  ;;  %v5108_v9 = vmul.f32 %v5989_v45, %v5094_v1  ;;  %6657 = vmatpush3.bf16.msra.mxu0 %v6812_v19  ;;  %v6813_v31 = vld [vmem:[%s7357_s30 + $0x18] sm:$0xff]  }
0x10e2   : > { %6658 = vmatprep.subr.bf16.mxu0 %v6813_v31 }
0x10e3   : > { %v5126_v51 = vpack.c.bf16 %v5121_v21, %v5120_v34  ;;  %v5109_v50 = vmul.f32 %v5989_v45, %v5095_v33  ;;  %v5122_v18 = vadd.f32 %v5990_v46, %v5108_v9 }
0x10e5   : > { %6648 = vmatprep.mubr.msk.bf16.mxu1 %vm787_vm1, %v5126_v51  ;;  %v5123_v27 = vadd.f32 %v5990_v46, %v5109_v50  ;;  %6659 = vmatpush3.bf16.msra.mxu0 %v6813_v31 }
0x10e6   : > { %6660 = vmatprep.subr.bf16.mxu0 %v6814_v7 }
0x10e7   : > { %v5127_v40 = vpack.c.bf16 %v5123_v27, %v5122_v18 }
0x10e9   : > { %6649 = vmatmul.mubr.msk.bf16.gmra.mrb[156].mxu1 %vm787_vm1, %v5127_v40  ;;  %6661 = vmatpush3.bf16.msra.mxu0 %v6814_v7 }
0x10ea   : > { %6662 = vmatprep.subr.bf16.mxu0 %v6815_v17 }
0x10ed   : > { %6663 = vmatpush3.bf16.msra.mxu0 %v6815_v17 }
0x10ee   : > { %6664 = vmatprep.subr.bf16.mxu0 %v6816_v28 }
0x10f1   : > { %6665 = vmatpush3.bf16.msra.mxu0 %v6816_v28 }
0x10f2   : > { %6666 = vmatprep.subr.bf16.mxu0 %v6817_v44 }
0x10f5   : > { %6667 = vmatpush3.bf16.msra.mxu0 %v6817_v44 }
0x1181   : > { %v6646_v45 = vpop.f32.mrb[152].mxu1 }
0x1182   : > { %v5206_v38 = vadd.f32 %v6646_v45, %v5991_v23  ;;  %v5197_v48 = vpop.f32.mrb[153].mxu1 }
0x1183   : > { %v5198_v36 = vadd.f32 %v5991_v23, %v5197_v48  ;;  %v6647_v29 = vpop.f32.mrb[154].mxu1 }
0x1184   : > { %v5238_v59 = vmul.f32 0.70710677, %v5206_v38  ;;  %v5209_v46 = vadd.f32 %v6647_v29, %v5991_v23  ;;  %v5200_v56 = vpop.f32.mrb[155].mxu1  ;;  %v5230_v63 = vmul.f32 0.5, %v5206_v38 }
0x1185   : > { %v5236_v62 = vmul.f32 0.70710677, %v5198_v36  ;;  %v5201_v32 = vadd.f32 %v5991_v23, %v5200_v56  ;;  %v5228_v11 = vmul.f32 0.5, %v5198_v36 }
0x1186   : > { %6978 = verf.f32 %v5238_v59  ;;  %v5239_v49 = vmul.f32 0.70710677, %v5209_v46  ;;  %v5231_v6 = vmul.f32 0.5, %v5209_v46  ;;  %v6006_v59 = vld [vmem:[%s752_s17] ss:$0 sm:$0xff] }
0x1187   : > { %6980 = verf.f32 %v5236_v62  ;;  %v5237_v52 = vmul.f32 0.70710677, %v5201_v32  ;;  %v5229_v37 = vmul.f32 0.5, %v5201_v32 }
0x1188   : > { %6982 = verf.f32 %v5239_v49 }
0x1189   : > { %6984 = verf.f32 %v5237_v52 }
0x1190   : > { %v6979_v41 = vpop.eup %6978 }
0x1191   : > { %v6981_v47 = vpop.eup %6980  ;;  %v5254_v42 = vadd.f32 1.0, %v6979_v41 }
0x1192   : > { %v6983_v60 = vpop.eup %6982  ;;  %v5252_v43 = vadd.f32 1.0, %v6981_v47 }
0x1193   : > { %v6985_v4 = vpop.eup %6984  ;;  %v5255_v8 = vadd.f32 1.0, %v6983_v60  ;;  %v5262_v12 = vmul.f32 %v5254_v42, %v5230_v63 }
0x1194   : > { %v5253_v15 = vadd.f32 1.0, %v6985_v4  ;;  %v5260_v53 = vmul.f32 %v5252_v43, %v5228_v11 }
0x1195   : > { %v5263_v26 = vmul.f32 %v5255_v8, %v5231_v6 }
0x1196   : > { %v5261_v55 = vmul.f32 %v5253_v15, %v5229_v37 }
0x1197   : > { %v5269_v0 = vpack.c.bf16 %v5263_v26, %v5262_v12 }
0x1198   : > { %v5268_v58 = vpack.c.bf16 %v5261_v55, %v5260_v53 }
0x119a   : > { %6668 = vmatprep.mubr.bf16.mxu0 %v5268_v58 }
0x119b   : > { %6669 = vmatmul.mubr.bf16.vlgmr.msra.gmra.mrb[120].mxu0 %v5269_v0 }
0x11bc   : > { %v6650_v20 = vpop.f32.mrb[156].mxu1 }
0x11bd   : > { %v5222_v2 = vadd.f32 %v6650_v20, %v5991_v23  ;;  %v5213_v61 = vpop.f32.mrb[157].mxu1 }
0x11be   : > { %v5214_v22 = vadd.f32 %v5991_v23, %v5213_v61  ;;  %v6651_v57 = vpop.f32.mrb[158].mxu1 }
0x11bf   : > { %v5242_v5 = vmul.f32 0.70710677, %v5222_v2  ;;  %v5225_v14 = vadd.f32 %v6651_v57, %v5991_v23  ;;  %v5216_v1 = vpop.f32.mrb[159].mxu1  ;;  %v5234_v40 = vmul.f32 0.5, %v5222_v2 }
0x11c0   : > { %v5240_v16 = vmul.f32 0.70710677, %v5214_v22  ;;  %v5217_v25 = vadd.f32 %v5991_v23, %v5216_v1  ;;  %v5232_v7 = vmul.f32 0.5, %v5214_v22 }
0x11c1   : > { %6986 = verf.f32 %v5242_v5  ;;  %v5243_v33 = vmul.f32 0.70710677, %v5225_v14  ;;  %v5235_v19 = vmul.f32 0.5, %v5225_v14 }
0x11c2   : > { %6988 = verf.f32 %v5240_v16  ;;  %v5241_v34 = vmul.f32 0.70710677, %v5217_v25  ;;  %v5233_v17 = vmul.f32 0.5, %v5217_v25 }
0x11c3   : > { %6990 = verf.f32 %v5243_v33 }
0x11c4   : > { %6992 = verf.f32 %v5241_v34 }
0x11cb   : > { %v6987_v21 = vpop.eup %6986 }
0x11cc   : > { %v6989_v9 = vpop.eup %6988  ;;  %v5258_v51 = vadd.f32 1.0, %v6987_v21 }
0x11cd   : > { %v6991_v50 = vpop.eup %6990  ;;  %v5256_v18 = vadd.f32 1.0, %v6989_v9 }
0x11ce   : > { %v6993_v27 = vpop.eup %6992  ;;  %v5259_v31 = vadd.f32 1.0, %v6991_v50  ;;  %v5266_v44 = vmul.f32 %v5258_v51, %v5234_v40 }
0x11cf   : > { %v5257_v28 = vadd.f32 1.0, %v6993_v27  ;;  %v5264_v45 = vmul.f32 %v5256_v18, %v5232_v7 }
0x11d0   : > { %v5267_v23 = vmul.f32 %v5259_v31, %v5235_v19 }
0x11d1   : > { %v5265_v38 = vmul.f32 %v5257_v28, %v5233_v17 }
0x11d2   : > { %v5271_v48 = vpack.c.bf16 %v5267_v23, %v5266_v44 }
0x11d3   : > { %v5270_v36 = vpack.c.bf16 %v5265_v38, %v5264_v45 }
0x11d5   : > { %6672 = vmatprep.mubr.bf16.mxu0 %v5270_v36 }
0x11d6   : > { %6673 = vmatmul.mubr.bf16.gmra.mrb[124].mxu0 %v5271_v48 }
0x126e   : > { %v6670_v29 = vpop.f32.mrb[120].mxu0 }
0x126f   : > { %v5403_v46 = vadd.f32 %v6670_v29, %v8285_v13  ;;  %v5370_v56 = vpop.f32.mrb[121].mxu0 }
0x1270   : > { %v5401_v62 = vadd.f32 %v5370_v56, %v8283_v10  ;;  %v6671_v32 = vpop.f32.mrb[122].mxu0 }
0x1271   : > { %v8407_v49 = vadd.f32 %v6006_v59, %v5403_v46  ;;  %v5404_v52 = vadd.f32 %v6671_v32, %v8293_v24  ;;  %v5373_v41 = vpop.f32.mrb[123].mxu0 }
0x1272   : > { %v5416_v47 = vadd.f32 %v6006_v59, %v5401_v62  ;;  %v5402_v42 = vadd.f32 %v5373_v41, %v8287_v30 }
0x1273   : > { %5426 = vst.msk [vmem:[#allocation2 + $0x10] sm:$0xff] %vm787_vm1, %v8407_v49  ;;  %v8413_v60 = vadd.f32 %v6006_v59, %v5404_v52  ;;  %v5444_v26 = vsel (!%p6007_p1), %vm787_vm1, %v8407_v49, 0.0 }
0x1274   : > { %5424 = vst.msk [vmem:[#allocation2] sm:$0xff] %vm787_vm1, %v5416_v47  ;;  %v5417_v13 = vadd.f32 %v6006_v59, %v5402_v42  ;;  %v7004_v42 = vld [vmem:[%s8653_s23 + $0x8] sm:$0xff] (!%p6007_p1)  }
0x1275   : > { %5427 = vst.msk [vmem:[#allocation2 + $0x18] sm:$0xff] %vm787_vm1, %v8413_v60  ;;  %v5447_v53 = vsel (!%p6007_p1), %vm787_vm1, %v8413_v60, 0.0 }
0x1276   : > { %5425 = vst.msk [vmem:[#allocation2 + $0x8] sm:$0xff] %vm787_vm1, %v5417_v13 }
0x12a9   : > { %v6674_v10 = vpop.f32.mrb[124].mxu0 }
0x12aa   : > { %v5407_v24 = vadd.f32 %v6674_v10, %v8299_v35  ;;  %v5386_v43 = vpop.f32.mrb[125].mxu0  ;;  %v5438_v35 = vsel (!%p6007_p1), %vm787_vm1, %v5416_v47, 0.0 }
0x12ab   : > { %v5405_v4 = vadd.f32 %v5386_v43, %v8301_v54  ;;  %v6675_v30 = vpop.f32.mrb[126].mxu0  ;;  %5435 = sbr.rel (%p6007_p1) target bundleno = 5326 (0x14ce), region = 96  ;;  %5439 = vadd.xlane.f32.xlu0 (!%p6007_p1), %v5438_v35 }
0x12ac   : > { %v8421_v63 = vadd.f32 %v6006_v59, %v5407_v24  ;;  %v5408_v6 = vadd.f32 %v6675_v30, %v8303_v3  ;;  %v5389_v8 = vpop.f32.mrb[127].mxu0  ;;  %v5441_v3 = vsel (!%p6007_p1), %vm787_vm1, %v5417_v13, 0.0 }
0x12ad   : > { %v5420_v11 = vadd.f32 %v6006_v59, %v5405_v4  ;;  %v5406_v37 = vadd.f32 %v5389_v8, %v8305_v39 }
0x12ae   : > { %5430 = vst.msk [vmem:[#allocation2 + $0x30] sm:$0xff] %vm787_vm1, %v8421_v63  ;;  %v5423_v15 = vadd.f32 %v6006_v59, %v5408_v6  ;;  %v5456_v55 = vsel (!%p6007_p1), %vm787_vm1, %v8421_v63, 0.0 }
0x12af   : > { %5428 = vst.msk [vmem:[#allocation2 + $0x20] sm:$0xff] %vm787_vm1, %v5420_v11  ;;  %v5421_v12 = vadd.f32 %v6006_v59, %v5406_v37  ;;  %v5450_v54 = vsel (!%p6007_p1), %vm787_vm1, %v5420_v11, 0.0  ;;  %5442 = vadd.xlane.f32.xlu0 (!%p6007_p1), %v5441_v3 }
0x12b0   : > { %5431 = vst.msk [vmem:[#allocation2 + $0x38] sm:$0xff] %vm787_vm1, %v5423_v15  ;;  %5451 = vadd.xlane.f32.xlu1 (!%p6007_p1), %v5450_v54  ;;  %v5459_v0 = vsel (!%p6007_p1), %vm787_vm1, %v5423_v15, 0.0 }
0x12b1   : > { %5429 = vst.msk [vmem:[#allocation2 + $0x28] sm:$0xff] %vm787_vm1, %v5421_v12  ;;  %v5453_v39 = vsel (!%p6007_p1), %vm787_vm1, %v5421_v12, 0.0 }
0x12b3   : > { %5445 = vadd.xlane.f32.xlu0 %v5444_v26 }
0x12b4   : > { %5454 = vadd.xlane.f32.xlu1 %v5453_v39 }
0x12b7   : > { %5457 = vadd.xlane.f32.xlu0 %v5456_v55 }
0x12b8   : > { %5448 = vadd.xlane.f32.xlu1 %v5447_v53 }
0x12bc   : > { %5460 = vadd.xlane.f32.xlu1 %v5459_v0 }
0x1338   : > { %v5440_v58 = vpop.xlane.xlu0 %5439 }
0x1339   : > { %v5462_v2 = vmul.f32 0.03125, %v5440_v58 }
0x133b   : > { %v8442_v22 = vsub.f32 %v5416_v47, %v5462_v2  ;;  %v7003_v47 = vld [vmem:[%s8652_s0] sm:$0xff]  }
0x133c   : > { %v5443_v5 = vpop.xlane.xlu0 %5442  ;;  %6676 = vmatprep.subr.bf16.mxu0 %v7003_v47  ;;  %6712 = vmatprep.subr.bf16.mxu1 %v7003_v47 }
0x133d   : > { %v5452_v20 = vpop.xlane.xlu1 %5451  ;;  %v5463_v1 = vmul.f32 0.03125, %v5443_v5  ;;  %v5478_v25 = vmul.f32 %v8442_v22, %v8442_v22  ;;  %6677 = vmatpush3.bf16.msra.mxu0 %v7003_v47  ;;  %6714 = vmatpush3.bf16.msra.mxu1 %v7003_v47 }
0x133e   : > { %v5466_v61 = vmul.f32 0.03125, %v5452_v20  ;;  %6678 = vmatprep.subr.bf16.mxu0 %v7004_v42  ;;  %6713 = vmatprep.subr.bf16.mxu1 %v7004_v42 }
0x133f   : > { %v8450_v34 = vsub.f32 %v5417_v13, %v5463_v1  ;;  %v5486_v9 = vsel %vm787_vm1, %v5478_v25, 0.0 }
0x1340   : > { %v8444_v57 = vsub.f32 %v5420_v11, %v5466_v61  ;;  %5487 = vadd.xlane.f32.xlu0 %v5486_v9  ;;  %v5446_v51 = vpop.xlane.xlu0 %5445  ;;  %v6008_v61 = vld [vmem:[%s8654_s21] ss:$0 sm:$0xff] }
0x1341   : > { %v5455_v14 = vpop.xlane.xlu1 %5454  ;;  %v5464_v27 = vmul.f32 0.03125, %v5446_v51  ;;  %v5479_v19 = vmul.f32 %v8450_v34, %v8450_v34  ;;  %6679 = vmatpush3.bf16.msra.mxu0 %v7004_v42  ;;  %6715 = vmatpush3.bf16.msra.mxu1 %v7004_v42 }
0x1342   : > { %v5467_v16 = vmul.f32 0.03125, %v5455_v14  ;;  %v5482_v33 = vmul.f32 %v8444_v57, %v8444_v57 }
0x1343   : > { %v8461_v7 = vsub.f32 %v8407_v49, %v5464_v27  ;;  %v5489_v28 = vsel %vm787_vm1, %v5479_v19, 0.0 }
0x1344   : > { %v8452_v21 = vsub.f32 %v5421_v12, %v5467_v16  ;;  %v5498_v18 = vsel %vm787_vm1, %v5482_v33, 0.0  ;;  %5490 = vadd.xlane.f32.xlu1 %v5489_v28  ;;  %v5458_v44 = vpop.xlane.xlu0 %5457  ;;  %v6009_v33 = vld [vmem:[%s8655_s6] ss:$0 sm:$0xff] }
0x1345   : > { %v5449_v50 = vpop.xlane.xlu1 %5448  ;;  %5499 = vadd.xlane.f32.xlu0 %v5498_v18  ;;  %v5468_v38 = vmul.f32 0.03125, %v5458_v44  ;;  %v5480_v36 = vmul.f32 %v8461_v7, %v8461_v7 }
0x1346   : > { %v5465_v40 = vmul.f32 0.03125, %v5449_v50  ;;  %v5483_v31 = vmul.f32 %v8452_v21, %v8452_v21 }
0x1347   : > { %v8473_v59 = vsub.f32 %v8421_v63, %v5468_v38  ;;  %v5492_v56 = vsel %vm787_vm1, %v5480_v36, 0.0 }
0x1348   : > { %v8464_v17 = vsub.f32 %v8413_v60, %v5465_v40  ;;  %v5501_v45 = vsel %vm787_vm1, %v5483_v31, 0.0 }
0x1349   : > { %v5461_v23 = vpop.xlane.xlu1 %5460  ;;  %5502 = vadd.xlane.f32.xlu1 %v5501_v45  ;;  %5493 = vadd.xlane.f32.xlu0 %v5492_v56  ;;  %v5484_v32 = vmul.f32 %v8473_v59, %v8473_v59 }
0x134a   : > { %v5469_v48 = vmul.f32 0.03125, %v5461_v23  ;;  %v5481_v29 = vmul.f32 %v8464_v17, %v8464_v17 }
0x134b   : > { %v5504_v52 = vsel %vm787_vm1, %v5484_v32, 0.0 }
0x134c   : > { %v8475_v46 = vsub.f32 %v5423_v15, %v5469_v48  ;;  %v5495_v62 = vsel %vm787_vm1, %v5481_v29, 0.0 }
0x134d   : > { %5496 = vadd.xlane.f32.xlu1 %v5495_v62  ;;  %5505 = vadd.xlane.f32.xlu0 %v5504_v52 }
0x134e   : > { %v5485_v49 = vmul.f32 %v8475_v46, %v8475_v46 }
0x1350   : > { %v5507_v41 = vsel %vm787_vm1, %v5485_v49, 0.0 }
0x1351   : > { %5508 = vadd.xlane.f32.xlu1 %v5507_v41 }
0x13cd   : > { %v5488_v60 = vpop.xlane.xlu0 %5487 }
0x13ce   : > { %v5510_v13 = vmul.f32 0.03125, %v5488_v60 }
0x13d0   : > { %v5518_v10 = vadd.f32 1e-05, %v5510_v13 }
0x13d1   : > { %v5491_v24 = vpop.xlane.xlu1 %5490 }
0x13d2   : > { %v5500_v43 = vpop.xlane.xlu0 %5499  ;;  %7005 = vrsqrt.f32 %v5518_v10  ;;  %v5511_v4 = vmul.f32 0.03125, %v5491_v24 }
0x13d3   : > { %v5514_v30 = vmul.f32 0.03125, %v5500_v43 }
0x13d4   : > { %v5519_v63 = vadd.f32 1e-05, %v5511_v4 }
0x13d5   : > { %v5522_v6 = vadd.f32 1e-05, %v5514_v30 }
0x13d6   : > { %v5503_v8 = vpop.xlane.xlu1 %5502  ;;  %v5494_v11 = vpop.xlane.xlu0 %5493  ;;  %7007 = vrsqrt.f32 %v5519_v63 }
0x13d7   : > { %v5515_v37 = vmul.f32 0.03125, %v5503_v8  ;;  %v5512_v15 = vmul.f32 0.03125, %v5494_v11  ;;  %7009 = vrsqrt.f32 %v5522_v6 }
0x13d9   : > { %v5523_v12 = vadd.f32 1e-05, %v5515_v37  ;;  %v5520_v35 = vadd.f32 1e-05, %v5512_v15 }
0x13da   : > { %v5497_v54 = vpop.xlane.xlu1 %5496  ;;  %v5506_v3 = vpop.xlane.xlu0 %5505 }
0x13db   : > { %7011 = vrsqrt.f32 %v5523_v12  ;;  %v5513_v39 = vmul.f32 0.03125, %v5497_v54  ;;  %v5516_v26 = vmul.f32 0.03125, %v5506_v3 }
0x13dc   : > { %7013 = vrsqrt.f32 %v5520_v35  ;;  %v7006_v53 = vpop.eup %7005 }
0x13dd   : > { %v5521_v55 = vadd.f32 1e-05, %v5513_v39  ;;  %v5524_v0 = vadd.f32 1e-05, %v5516_v26  ;;  %v5534_v20 = vmul.f32 %v7006_v53, %v8442_v22 }
0x13de   : > { %v5509_v58 = vpop.xlane.xlu1 %5508 }
0x13df   : > { %7015 = vrsqrt.f32 %v5521_v55  ;;  %v5517_v2 = vmul.f32 0.03125, %v5509_v58  ;;  %v5548_v25 = vmul.f32 %v6008_v61, %v5534_v20 }
0x13e0   : > { %7017 = vrsqrt.f32 %v5524_v0  ;;  %v7008_v5 = vpop.eup %7007 }
0x13e1   : > { %v5525_v14 = vadd.f32 1e-05, %v5517_v2  ;;  %v7010_v1 = vpop.eup %7009  ;;  %v5535_v16 = vmul.f32 %v7008_v5, %v8450_v34  ;;  %v5562_v18 = vadd.f32 %v6009_v33, %v5548_v25 }
0x13e2   : > { %v5538_v22 = vmul.f32 %v7010_v1, %v8444_v57 }
0x13e3   : > { %7019 = vrsqrt.f32 %v5525_v14  ;;  %v5549_v9 = vmul.f32 %v6008_v61, %v5535_v16 }
0x13e4   : > { %v5552_v19 = vmul.f32 %v6008_v61, %v5538_v22 }
0x13e5   : > { %v7012_v51 = vpop.eup %7011  ;;  %v5563_v27 = vadd.f32 %v6009_v33, %v5549_v9 }
0x13e6   : > { %v7014_v50 = vpop.eup %7013  ;;  %v5539_v40 = vmul.f32 %v7012_v51, %v8452_v21  ;;  %v5566_v45 = vadd.f32 %v6009_v33, %v5552_v19 }
0x13e7   : > { %v5536_v31 = vmul.f32 %v7014_v50, %v8461_v7  ;;  %v5570_v28 = vpack.c.bf16 %v5563_v27, %v5562_v18 }
0x13e8   : > { %v5553_v34 = vmul.f32 %v6008_v61, %v5539_v40 }
0x13e9   : > { %v7016_v44 = vpop.eup %7015  ;;  %6680 = vmatprep.mubr.msk.bf16.mxu0 %vm787_vm1, %v5570_v28  ;;  %v5550_v48 = vmul.f32 %v6008_v61, %v5536_v31 }
0x13ea   : > { %v7018_v23 = vpop.eup %7017  ;;  %v5567_v38 = vadd.f32 %v6009_v33, %v5553_v34  ;;  %v5537_v57 = vmul.f32 %v7016_v44, %v8464_v17 }
0x13eb   : > { %v5540_v36 = vmul.f32 %v7018_v23, %v8473_v59  ;;  %v5564_v7 = vadd.f32 %v6009_v33, %v5550_v48 }
0x13ec   : > { %v5572_v29 = vpack.c.bf16 %v5567_v38, %v5566_v45  ;;  %v5551_v56 = vmul.f32 %v6008_v61, %v5537_v57 }
0x13ed   : > { %v7020_v21 = vpop.eup %7019  ;;  %v5554_v49 = vmul.f32 %v6008_v61, %v5540_v36 }
0x13ee   : > { %6684 = vmatprep.mubr.msk.bf16.mxu1 %vm787_vm1, %v5572_v29  ;;  %v5565_v62 = vadd.f32 %v6009_v33, %v5551_v56  ;;  %v5541_v32 = vmul.f32 %v7020_v21, %v8475_v46 }
0x13ef   : > { %v5568_v59 = vadd.f32 %v6009_v33, %v5554_v49 }
0x13f0   : > { %v5571_v52 = vpack.c.bf16 %v5565_v62, %v5564_v7  ;;  %v5555_v17 = vmul.f32 %v6008_v61, %v5541_v32 }
0x13f2   : > { %6681 = vmatmul.mubr.msk.bf16.vlgmr.msra.gmra.mrb[0].mxu0 %vm787_vm1, %v5571_v52  ;;  %v5569_v41 = vadd.f32 %v6009_v33, %v5555_v17 }
0x13f4   : > { %v5573_v47 = vpack.c.bf16 %v5569_v41, %v5568_v59 }
0x13f6   : > { %6685 = vmatmul.mubr.msk.bf16.vlgmr.msra.gmra.mrb[0].mxu1 %vm787_vm1, %v5573_v47 }
0x14c5   : > { %v6682_v42 = vpop.f32.mrb[0].mxu0 }
0x14c6   : > { %5669 = vst [vmem:[%s7359_s14 + $0x10] sm:$0xff] %v6682_v42  ;;  %v5636_v60 = vpop.f32.mrb[1].mxu0 }
0x14c7   : > { %5667 = vst [vmem:[%s7359_s14] sm:$0xff] %v5636_v60  ;;  %v6683_v46 = vpop.f32.mrb[2].mxu0 }
0x14c8   : > { %5670 = vst [vmem:[%s7359_s14 + $0x18] sm:$0xff] %v6683_v46  ;;  %v5639_v13 = vpop.f32.mrb[3].mxu0 }
0x14c9   : > { %5668 = vst [vmem:[%s7359_s14 + $0x8] sm:$0xff] %v5639_v13  ;;  %v6686_v10 = vpop.f32.mrb[0].mxu1 }
0x14ca   : > { %5673 = vst [vmem:[%s7359_s14 + $0x30] sm:$0xff] %v6686_v10  ;;  %v5652_v24 = vpop.f32.mrb[1].mxu1 }
0x14cb   : > { %5671 = vst [vmem:[%s7359_s14 + $0x20] sm:$0xff] %v5652_v24  ;;  %v6687_v43 = vpop.f32.mrb[2].mxu1 }
0x14cc   : > { %5674 = vst [vmem:[%s7359_s14 + $0x38] sm:$0xff] %v6687_v43  ;;  %v5655_v4 = vpop.f32.mrb[3].mxu1 }
0x14cd   : > { %5672 = vst [vmem:[%s7359_s14 + $0x28] sm:$0xff] %v5655_v4 }
0x14ce PF: > { %s8656_s16 = sld [smem:[#allocation10_spill]]  ;;  %s8657_s24 = sld [smem:[#allocation7_spill]] }
0x14cf   : > { %s8659_s20 = sld [smem:[#allocation27_spill]]  ;;  %s5689_s17 = sshll.u32 %s7359_s14, 4  ;;  %s8524_s17 = int_to_ptr.vmem [resolvable:$true] %s5689_s17 }
0x14d0   : > { %s7021_s26 = scalar_lea.vmem %s8524_s17, 1024  ;;  %s7130_s1 = smov [#allocation3]  }
0x14d1   : > { %p7022_p2 = scmp.ne.s32.totalorder %s8524_s17, %s7021_s26  ;;  %s7025_s25 = sshll.u32 %s7130_s1, 4  ;;  %s7026_s25 = int_to_ptr.vmem [resolvable:$false] %s7025_s25 }
0x14d2   : > { %s7027_s18 = scalar_lea.vmem %s7026_s25, 2048  ;;  %p7028_p6 = scmp.lt.s32.totalorder %s8524_s17, %s7026_s25 }
0x14d3   : > { %p7023_p4 = pnand %p7022_p2, %p7272_p3  ;;  %p7029_p7 = scmp.lt.s32.totalorder %s7027_s18, %s7021_s26 }
0x14d4   : > { %s6025_s4 = sshll.u32 %s8656_s16, 10  ;;  %s8660_s27 = sand.u32 1, %s8657_s24  }
0x14d5   : > { %s8521_s22 = scalar_lea.hbm %s8659_s20, %s6025_s4  ;;  %s8528_s0 = scalar_lea.sflag [#allocation4], %s8660_s27 }
0x14d6   : > { %p7024_p5 = pneg %p7023_p4  ;;  %p7030_p8 = por %p7029_p7, %p7028_p6 }
0x14d8   : > { %p7031_p10 = pnand %p7030_p8, %p7024_p5 }
0x14da   : > { %7034 = shalt.err (!%p7031_p10)
}
0x14db   : > { %s7035_s14 = scalar_lea.hbm %s8521_s22, 1024  ;;  %s7039_s29 = scalar_lea.hbm %s8659_s20, 2048 }
0x14dc   : > { %p7036_p11 = scmp.ne.s32.totalorder %s8521_s22, %s7035_s14  ;;  %p7040_p0 = scmp.lt.u32.totalorder %s8521_s22, %s8659_s20 }
0x14dd   : > { %p7041_p1 = scmp.lt.u32.totalorder %s7039_s29, %s7035_s14  ;;  %p7043_p4 = scmp.lt.u32.totalorder %s7035_s14, %s8521_s22 }
0x14de   : > { %p7037_p12 = pnand %p7036_p11, %p7272_p3 }
0x14df   : > { %p7042_p2 = por %p7041_p1, %p7040_p0 }
0x14e0   : > { %p7038_p13 = pneg %p7037_p12 }
0x14e1   : > { %p7044_p5 = por %p7043_p4, %p7042_p2 }
0x14e3   : > { %p7045_p6 = pnand %p7044_p5, %p7038_p13 }
0x14e5   : > { %7048 = shalt.err (!%p7045_p6)
}
0x14e6   : > { %s7131_s24 = smov 128   ;;  %s7132_s4 = smov 8  }
0x14e7   : > { %6720 = dma.vmem_to_hbm [thread:$0]  (%p7272_p3), %s8524_s17, 1024, %s8521_s22, %s8528_s0, %s7131_s24, %s7131_s24, %s7132_s4  }
0x14e8 PF: > { %s8661_s19 = sld [smem:[#allocation13_spill]]  ;;  %s8662_s30 = sld [smem:[#allocation6_spill]] }
0x14ee   : > { %p6726_p7 = scmp.ge.s32.totalorder %s8661_s19, 2  ;;  %s5704_s26 = sand.u32 1, %s8662_s30  }
0x14ef   : > { %s5705_s1 = scalar_lea.sflag [#allocation4], %s5704_s26 }
0x14f0   : > { %p6723_p8 = pnand %p6726_p7, %p7282_p9 }
0x14f2   : > { %7082 = dma.done.wait (!%p6723_p8), %s5705_s1, 1024  }
0x14f3   : > { %7084 = vsyncadd (!%p6723_p8), %s5705_s1, 4294966272  ;;  %s30_s30 = sadd.s32 1, %s8661_s19   ;;  %s8664_s24 = sld [smem:[#allocation7_spill]] }
0x14f4   : > { %p27_p10 = scmp.ge.s32.totalorder %s30_s30, 6   ;;  %s8665_s25 = sld [smem:[#allocation8_spill]] }
0x14f5   : > { %s8666_s26 = sld [smem:[#allocation18_spill]]  ;;  %s8667_s27 = sld [smem:[#allocation11_spill]] }
0x14f6   : > { %s8668_s28 = sld [smem:[#allocation12_spill]]  ;;  %s8669_s29 = sld [smem:[#allocation14_spill]] }
0x14f7   : > { %s8670_s0 = sld [smem:[#allocation16_spill]]  ;;  %29 = sbr.rel (!%p27_p10) target bundleno = 15 (0xf), region = 167 }
0x14fe   :  { %5710 = vsyncpa [#allocation4], 1 }
0x14ff   :  { %5712 = vsyncpa [#allocation4 + $0x1], 1 }

</bundles_post_ra>
